<compile_context>
chip_gen: v7x
topology: tpu7x:2x2x1
jax: 0.10.0
libtpu: 0.0.40
codegen_flags: <defaults>
</compile_context>

<pallas_src>
import functools

import jax
import jax.numpy as jnp
from jax.experimental import pallas as pl
from jax.experimental.pallas import tpu as pltpu


_VMEM_LIMIT = 48 * 1024 * 1024  # fits v7x 64 MiB VMEM with headroom; fine on v5e/v6e


def _round_up(x, m):
    return ((x + m - 1) // m) * m


def _choose_tm(m_pad):
    for tm in (2048, 1024, 512, 256, 128):
        if m_pad % tm == 0:
            return tm
    return m_pad  # unreachable: m_pad is a multiple of 128


# ----------------------------------------------------------------------------
# Pallas kernel 1: fused GEMM (lane-dense output) + bias [+ residual] [+ ReLU]
#   out(Cout, M) = W(Cout, K) @ X(K, M)
# ----------------------------------------------------------------------------
def _gemm_kernel(w_ref, x_ref, b_ref, *rest, relu, has_res):
    if has_res:
        r_ref, o_ref = rest
    else:
        (o_ref,) = rest
    acc = jnp.dot(w_ref[...], x_ref[...], preferred_element_type=jnp.float32)
    acc = acc + b_ref[...]                       # (Cout, 1) broadcast over lanes
    if has_res:
        acc = acc + r_ref[...]                   # fused residual add
    if relu:
        acc = jnp.maximum(acc, 0.0)              # fused ReLU epilogue
    o_ref[...] = acc


def gemm_bias_act(w_mat, x_mat, bias, *, relu=False, residual=None):
    """w_mat: (Cout, K) bf16; x_mat: (K, M) bf16; bias: (Cout,) f32;
    residual: (Cout, M) f32 or None  ->  (Cout, M) f32 (lane-dense on M)."""
    cout, k = w_mat.shape
    _, m = x_mat.shape
    m_pad = _round_up(m, 128)
    tm = _choose_tm(m_pad)
    if m_pad != m:
        x_mat = jnp.pad(x_mat, ((0, 0), (0, m_pad - m)))
        if residual is not None:
            residual = jnp.pad(residual, ((0, 0), (0, m_pad - m)))

    in_specs = [
        pl.BlockSpec((cout, k), lambda i: (0, 0)),
        pl.BlockSpec((k, tm), lambda i: (0, i)),
        pl.BlockSpec((cout, 1), lambda i: (0, 0)),
    ]
    args = [w_mat, x_mat, bias.reshape(cout, 1).astype(jnp.float32)]
    if residual is not None:
        in_specs.append(pl.BlockSpec((cout, tm), lambda i: (0, i)))
        args.append(residual)

    out = pl.pallas_call(
        functools.partial(_gemm_kernel, relu=relu, has_res=residual is not None),
        out_shape=jax.ShapeDtypeStruct((cout, m_pad), jnp.float32),
        grid=(m_pad // tm,),
        in_specs=in_specs,
        out_specs=pl.BlockSpec((cout, tm), lambda i: (0, i)),
        compiler_params=pltpu.CompilerParams(
            dimension_semantics=("parallel",),
            vmem_limit_bytes=_VMEM_LIMIT),
    )(*args)
    return out[:, :m] if m_pad != m else out


# ----------------------------------------------------------------------------
# Pallas kernel 2: k = mean_{H,W}( out - mean_C(out) + 1/ks^2 )   (per sample)
#   Input laid out (N, K2, H*W): spatial on lanes, K2 on sublanes.
# ----------------------------------------------------------------------------
def _kmean_kernel(x_ref, o_ref, *, k2):
    x = x_ref[0]                                     # (K2, H*W), lane-dense
    mean_c = jnp.mean(x, axis=0, keepdims=True)      # channel mean  (sublane reduce)
    k = x - mean_c + (1.0 / k2)
    o_ref[0] = jnp.mean(k, axis=1, keepdims=True)    # spatial mean  (lane reduce)


def kernel_mean(out_cnhw, ks):
    k2 = ks * ks
    c, n, h, w = out_cnhw.shape
    assert c == k2
    x = jnp.transpose(out_cnhw, (1, 0, 2, 3)).reshape(n, k2, h * w)
    km = pl.pallas_call(
        functools.partial(_kmean_kernel, k2=k2),
        out_shape=jax.ShapeDtypeStruct((n, k2, 1), jnp.float32),
        grid=(n,),
        in_specs=[pl.BlockSpec((1, k2, h * w), lambda i: (i, 0, 0))],
        out_specs=pl.BlockSpec((1, k2, 1), lambda i: (i, 0, 0)),
        compiler_params=pltpu.CompilerParams(
            dimension_semantics=("parallel",),
            vmem_limit_bytes=_VMEM_LIMIT),
    )(x)
    return km.reshape(n, k2)


# ----------------------------------------------------------------------------
# Pallas kernel 3: per-sample blur = conv(sharp, k[n])  as 9 shifted VPU FMAs.
#   blur[n,c,y,x] = sum_{i,j} sharp_pad[n,c,y+i,x+j] * k[n, i*ks+j]
#   k lives in SMEM (scalars); no K2x patch blow-up in HBM.
# ----------------------------------------------------------------------------
def _blur_kernel(k_ref, sp_ref, o_ref, *, ks):
    n = pl.program_id(0)
    _, c, h, w = o_ref.shape
    sp = sp_ref[0]                                   # (C, H+2p, W+2p)
    acc = jnp.zeros((c, h, w), jnp.float32)
    for dy in range(ks):
        for dx in range(ks):
            acc = acc + k_ref[n, dy * ks + dx] * sp[:, dy:dy + h, dx:dx + w]
    o_ref[0] = acc


def apply_blur_kernel(sharp_nchw, k, ks):
    n, c, h, w = sharp_nchw.shape
    pad = ks // 2
    sp = jnp.pad(sharp_nchw, ((0, 0), (0, 0), (pad, pad), (pad, pad)))
    hp, wp = h + 2 * pad, w + 2 * pad
    return pl.pallas_call(
        functools.partial(_blur_kernel, ks=ks),
        out_shape=jax.ShapeDtypeStruct((n, c, h, w), jnp.float32),
        grid=(n,),
        in_specs=[
            pl.BlockSpec(memory_space=pltpu.MemorySpace.SMEM),    # k: (N, ks*ks) f32
            pl.BlockSpec((1, c, hp, wp), lambda i: (i, 0, 0, 0)),
        ],
        out_specs=pl.BlockSpec((1, c, h, w), lambda i: (i, 0, 0, 0)),
        compiler_params=pltpu.CompilerParams(
            dimension_semantics=("parallel",),
            vmem_limit_bytes=_VMEM_LIMIT),
    )(k, sp)


# ----------------------------------------------------------------------------
# Glue: im2col patch extraction (bf16), pooling, channel concat.
# TODO(synk): im2col is still built in XLA glue; in-kernel im2col (shifted-dot
# accumulation over a padded activation block) would cut activation HBM traffic
# by the remaining ~9x/16x factor.
# ----------------------------------------------------------------------------
def conv3x3(x, w, b, *, relu=False, residual=None):
    """x: (Cin, N, H, W) f32; w: (Cout, Cin, 3, 3) torch layout; pad=1, stride=1.
    Optional fused residual add (Cout, N, H, W) and trailing ReLU."""
    cin, n, h, wd = x.shape
    cout = w.shape[0]
    xp = jnp.pad(x, ((0, 0), (0, 0), (1, 1), (1, 1)))
    cols = [xp[:, :, dy:dy + h, dx:dx + wd] for dy in range(3) for dx in range(3)]
    patches = jnp.stack(cols, axis=0).reshape(9 * cin, n * h * wd).astype(jnp.bfloat16)
    w_mat = jnp.transpose(w, (0, 2, 3, 1)).reshape(cout, 9 * cin).astype(jnp.bfloat16)
    res = None if residual is None else residual.reshape(cout, n * h * wd)
    out = gemm_bias_act(w_mat, patches, b, relu=relu, residual=res)
    return out.reshape(cout, n, h, wd)


def conv_transpose_4x4_s2(x, w_t, b):
    """ConvTranspose2d(k=4, stride=2, pad=1). x: (Cin, N, H, W); w_t: (Cin, Cout, 4, 4)."""
    cin, n, h, wd = x.shape
    cout = w_t.shape[1]
    ho, wo = 2 * h, 2 * wd
    xd = jnp.zeros((cin, n, 2 * h - 1, 2 * wd - 1), x.dtype)
    xd = xd.at[:, :, ::2, ::2].set(x)                              # dilate by stride
    xp = jnp.pad(xd, ((0, 0), (0, 0), (2, 2), (2, 2)))             # pad by k-1-p = 2
    cols = [xp[:, :, dy:dy + ho, dx:dx + wo] for dy in range(4) for dx in range(4)]
    patches = jnp.stack(cols, axis=0).reshape(16 * cin, n * ho * wo).astype(jnp.bfloat16)
    w_mat = (jnp.flip(w_t, axis=(2, 3)).transpose(1, 2, 3, 0)
             .reshape(cout, 16 * cin).astype(jnp.bfloat16))        # flipped kernel
    out = gemm_bias_act(w_mat, patches, b, relu=False)
    return out.reshape(cout, n, ho, wo)


def maxpool2x2(x):
    # TODO(synk): MaxPool2d kept as plain-XLA glue (cheap, not on the matmul hot path).
    c, n, h, w = x.shape
    return jnp.max(x.reshape(c, n, h // 2, 2, w // 2, 2), axis=(3, 5))


# ----------------------------------------------------------------------------
# Blocks (norm='none' -> Identity; use_bias=False for ResnetBlock convs)
# ----------------------------------------------------------------------------
def resnet_block(x, p, *, final_relu=False):
    # conv -> Identity norm -> ReLU -> conv -> Identity norm, then x + h.
    # Residual add (and the Enc/Dec block's trailing ReLU) fused into conv2 epilogue.
    h = conv3x3(x, p["c1_w"], p["c1_b"], relu=True)
    return conv3x3(h, p["c2_w"], p["c2_b"], relu=final_relu, residual=x)


def enc_block(x, p):
    h = conv3x3(x, p["conv_w"], p["conv_b"], relu=False)
    h = resnet_block(h, p["res1"], final_relu=False)
    h = resnet_block(h, p["res2"], final_relu=True)     # ReLU(True) fused
    return h, maxpool2x2(h)


def dec_block(x, enc, p):
    h = conv_transpose_4x4_s2(x, p["ct_w"], p["ct_b"])
    h = jnp.concatenate([h, enc], axis=0)               # torch.cat((x, enc), dim=1)
    h = conv3x3(h, p["conv_w"], p["conv_b"], relu=False)
    h = resnet_block(h, p["res1"], final_relu=False)
    h = resnet_block(h, p["res2"], final_relu=True)     # ReLU(True) fused
    return h


# ----------------------------------------------------------------------------
# Deterministic parameter init
# ----------------------------------------------------------------------------
def init_params(key, opt):
    nf = opt["nf"]
    ks2 = opt["kernel_size"] ** 2
    in_nc = opt["in_channels"] * 2 if opt["use_sharp"] else opt["in_channels"]
    keys = iter(jax.random.split(key, 64))

    def conv(cout, cin, kk=3, bias=True, scale=0.1):
        k1, k2 = jax.random.split(next(keys))
        w = jax.random.normal(k1, (cout, cin, kk, kk), jnp.float32) * scale
        b = (jax.random.normal(k2, (cout,), jnp.float32) * scale
             if bias else jnp.zeros((cout,), jnp.float32))
        return w, b

    def conv_t(cin, cout, kk=4, scale=0.1):
        k1, k2 = jax.random.split(next(keys))
        w = jax.random.normal(k1, (cin, cout, kk, kk), jnp.float32) * scale
        b = jax.random.normal(k2, (cout,), jnp.float32) * scale
        return w, b

    def res(dim):  # use_bias=False (norm='none')
        c1w, c1b = conv(dim, dim, 3, bias=False)
        c2w, c2b = conv(dim, dim, 3, bias=False)
        return {"c1_w": c1w, "c1_b": c1b, "c2_w": c2w, "c2_b": c2b}

    def enc(cin, cout):
        cw, cb = conv(cout, cin, 3)
        return {"conv_w": cw, "conv_b": cb, "res1": res(cout), "res2": res(cout)}

    def dec(cin, cout):
        ctw, ctb = conv_t(cin, cout, 4)
        cw, cb = conv(cout, cout * 2, 3)
        return {"ct_w": ctw, "ct_b": ctb, "conv_w": cw, "conv_b": cb,
                "res1": res(cout), "res2": res(cout)}

    conv1 = []
    w, b = conv(nf * 4, nf * 2, 3)
    conv1.append({"w": w, "b": b})
    for _ in range(4):
        w, b = conv(nf * 4, nf * 4, 3)
        conv1.append({"w": w, "b": b})

    c2a_w, c2a_b = conv(nf, nf, 3)
    c2b_w, c2b_b = conv(ks2, nf, 3)

    return {
        "enc1": enc(in_nc, nf),
        "enc2": enc(nf, nf * 2),
        "conv1": conv1,
        "dec1": dec(nf * 4, nf * 2),
        "dec2": dec(nf * 2, nf),
        "conv2": [{"w": c2a_w, "b": c2a_b}, {"w": c2b_w, "b": c2b_b}],
    }


# ----------------------------------------------------------------------------
# Full forward
# ----------------------------------------------------------------------------
def kernel_extractor_forward(params, sharp, blur, opt):
    ks = opt["kernel_size"]
    k2 = ks * ks
    input_nc = opt["in_channels"] * 2 if opt["use_sharp"] else opt["in_channels"]

    inp_nchw = jnp.concatenate([sharp, blur], axis=1) if input_nc == 6 else blur
    inp = jnp.transpose(inp_nchw, (1, 0, 2, 3))        # NCHW -> (C, N, H, W)

    x1_, x1 = enc_block(inp, params["enc1"])
    x2_, x2 = enc_block(x1, params["enc2"])

    x3 = x2
    for p in params["conv1"]:
        x3 = conv3x3(x3, p["w"], p["b"], relu=True)

    x4 = dec_block(x3, x2_, params["dec1"])
    x5 = dec_block(x4, x1_, params["dec2"])

    h = conv3x3(x5, params["conv2"][0]["w"], params["conv2"][0]["b"], relu=True)
    out = conv3x3(h, params["conv2"][1]["w"], params["conv2"][1]["b"], relu=True)
    # out: (ks^2, N, H, W)

    k = kernel_mean(out, ks)                           # (N, ks^2)
    blur_pred = apply_blur_kernel(sharp, k, ks)        # (N, C, H, W)  (NCHW like torch)
    k_out = k.reshape(k.shape[0], k2, 1, 1)            # (N, ks^2, 1, 1) like torch
    return k_out, blur_pred


if __name__ == "__main__":
    opt = dict(nf=8, kernel_size=3, use_sharp=True, use_vae=False,
               norm="none", padding_type="zero", use_dropout=False,
               in_channels=3, out_channels=3)

    root = jax.random.PRNGKey(0)
    k_params, k_sharp, k_blur = jax.random.split(root, 3)

    params = init_params(k_params, opt)
    sharp = jax.random.normal(k_sharp, (2, 3, 16, 16), jnp.float32)  # NCHW
    blur = jax.random.normal(k_blur, (2, 3, 16, 16), jnp.float32)    # NCHW

    fwd = jax.jit(functools.partial(kernel_extractor_forward, opt=opt))
    k_out, blur_out = fwd(params, sharp, blur)
    jax.block_until_ready((k_out, blur_out))
    assert k_out.shape == (2, 9, 1, 1)
    assert blur_out.shape == (2, 3, 16, 16)
    print("KERNEL_OK")
</pallas_src>

<mosaic_0001>
module attributes {stable_mosaic.version = 11 : i64} {
  func.func @_gemm_kernel(%arg0: i32, %arg1: memref<8x54xbf16, #tpu.memory_space<vmem>>, %arg2: memref<54x512xbf16, #tpu.memory_space<vmem>>, %arg3: memref<8x1xf32, #tpu.memory_space<vmem>>, %arg4: memref<8x512xf32, #tpu.memory_space<vmem>>) attributes {dimension_semantics = [#tpu.dimension_semantics<parallel>], iteration_bounds = array<i64: 1>, scalar_prefetch = 0 : i64, scratch_operands = 0 : i64, tpu.core_type = #tpu.core_type<tc>, window_params = [{pipeline_mode = #tpu.pipeline_mode<synchronous>, transform_indices = @transform_0, window_bounds = array<i64: 8, 54>}, {transform_indices = @transform_1, window_bounds = array<i64: 54, 512>}, {pipeline_mode = #tpu.pipeline_mode<synchronous>, transform_indices = @transform_2, window_bounds = array<i64: 8, 1>}, {transform_indices = @transform_3, window_bounds = array<i64: 8, 512>}]} {
    %c0 = arith.constant 0 : index
    %c0_0 = arith.constant 0 : index
    %0 = vector.load %arg1[%c0, %c0_0] : memref<8x54xbf16, #tpu.memory_space<vmem>>, vector<8x54xbf16>
    %c0_1 = arith.constant 0 : index
    %c0_2 = arith.constant 0 : index
    %1 = vector.load %arg2[%c0_1, %c0_2] : memref<54x512xbf16, #tpu.memory_space<vmem>>, vector<54x512xbf16>
    %cst = arith.constant dense<0.000000e+00> : vector<8x512xf32>
    %2 = tpu.matmul %0, %1, %cst {dimension_numbers = #tpu.dot_dimension_numbers<[1], [0], [0], [1], [0, 0, 1, 1], [], []>} : vector<8x54xbf16>, vector<54x512xbf16>, vector<8x512xf32> -> vector<8x512xf32>
    %c0_3 = arith.constant 0 : index
    %c0_4 = arith.constant 0 : index
    %3 = vector.load %arg3[%c0_3, %c0_4] : memref<8x1xf32, #tpu.memory_space<vmem>>, vector<8x1xf32>
    %4 = vector.broadcast %3 : vector<8x1xf32> to vector<8x512xf32>
    %5 = arith.addf %2, %4 : vector<8x512xf32>
    %c0_5 = arith.constant 0 : index
    %c0_6 = arith.constant 0 : index
    %6 = vector.load %arg4[%c0_5, %c0_6] : memref<8x512xf32, #tpu.memory_space<vmem>>, vector<8x512xf32>
    tpu.vector_store %arg4[%c0_5, %c0_6], %5 {strides = array<i32>} : memref<8x512xf32, #tpu.memory_space<vmem>>, vector<8x512xf32>,
    return
  }
  func.func @transform_0(%arg0: i32) -> (i32, i32) {
    %c0_i32 = arith.constant 0 : i32
    %c0_i32_0 = arith.constant 0 : i32
    %c0_i32_1 = arith.constant 0 : i32
    return %c0_i32, %c0_i32_0 : i32, i32
  }
  func.func @transform_1(%arg0: i32) -> (i32, i32) {
    %c0_i32 = arith.constant 0 : i32
    %c0_i32_0 = arith.constant 0 : i32
    return %c0_i32, %arg0 : i32, i32
  }
  func.func @transform_2(%arg0: i32) -> (i32, i32) {
    %c0_i32 = arith.constant 0 : i32
    %c0_i32_0 = arith.constant 0 : i32
    %c0_i32_1 = arith.constant 0 : i32
    return %c0_i32, %c0_i32_0 : i32, i32
  }
  func.func @transform_3(%arg0: i32) -> (i32, i32) {
    %c0_i32 = arith.constant 0 : i32
    %c0_i32_0 = arith.constant 0 : i32
    return %c0_i32, %arg0 : i32, i32
  }
}

module attributes {stable_mosaic.version = 11 : i64} {
  func.func @_gemm_kernel(%arg0: i32, %arg1: memref<8x72xbf16, #tpu.memory_space<vmem>>, %arg2: memref<72x512xbf16, #tpu.memory_space<vmem>>, %arg3: memref<8x1xf32, #tpu.memory_space<vmem>>, %arg4: memref<8x512xf32, #tpu.memory_space<vmem>>) attributes {dimension_semantics = [#tpu.dimension_semantics<parallel>], iteration_bounds = array<i64: 1>, scalar_prefetch = 0 : i64, scratch_operands = 0 : i64, tpu.core_type = #tpu.core_type<tc>, window_params = [{pipeline_mode = #tpu.pipeline_mode<synchronous>, transform_indices = @transform_0, window_bounds = array<i64: 8, 72>}, {transform_indices = @transform_1, window_bounds = array<i64: 72, 512>}, {pipeline_mode = #tpu.pipeline_mode<synchronous>, transform_indices = @transform_2, window_bounds = array<i64: 8, 1>}, {transform_indices = @transform_3, window_bounds = array<i64: 8, 512>}]} {
    %c0 = arith.constant 0 : index
    %c0_0 = arith.constant 0 : index
    %0 = vector.load %arg1[%c0, %c0_0] : memref<8x72xbf16, #tpu.memory_space<vmem>>, vector<8x72xbf16>
    %c0_1 = arith.constant 0 : index
    %c0_2 = arith.constant 0 : index
    %1 = vector.load %arg2[%c0_1, %c0_2] : memref<72x512xbf16, #tpu.memory_space<vmem>>, vector<72x512xbf16>
    %cst = arith.constant dense<0.000000e+00> : vector<8x512xf32>
    %2 = tpu.matmul %0, %1, %cst {dimension_numbers = #tpu.dot_dimension_numbers<[1], [0], [0], [1], [0, 0, 1, 1], [], []>} : vector<8x72xbf16>, vector<72x512xbf16>, vector<8x512xf32> -> vector<8x512xf32>
    %c0_3 = arith.constant 0 : index
    %c0_4 = arith.constant 0 : index
    %3 = vector.load %arg3[%c0_3, %c0_4] : memref<8x1xf32, #tpu.memory_space<vmem>>, vector<8x1xf32>
    %4 = vector.broadcast %3 : vector<8x1xf32> to vector<8x512xf32>
    %5 = arith.addf %2, %4 : vector<8x512xf32>
    %cst_5 = arith.constant 0.000000e+00 : f32
    %6 = vector.broadcast %cst_5 : f32 to vector<8x512xf32>
    %7 = arith.maximumf %5, %6 : vector<8x512xf32>
    %c0_6 = arith.constant 0 : index
    %c0_7 = arith.constant 0 : index
    %8 = vector.load %arg4[%c0_6, %c0_7] : memref<8x512xf32, #tpu.memory_space<vmem>>, vector<8x512xf32>
    tpu.vector_store %arg4[%c0_6, %c0_7], %7 {strides = array<i32>} : memref<8x512xf32, #tpu.memory_space<vmem>>, vector<8x512xf32>,
    return
  }
  func.func @transform_0(%arg0: i32) -> (i32, i32) {
    %c0_i32 = arith.constant 0 : i32
    %c0_i32_0 = arith.constant 0 : i32
    %c0_i32_1 = arith.constant 0 : i32
    return %c0_i32, %c0_i32_0 : i32, i32
  }
  func.func @transform_1(%arg0: i32) -> (i32, i32) {
    %c0_i32 = arith.constant 0 : i32
    %c0_i32_0 = arith.constant 0 : i32
    return %c0_i32, %arg0 : i32, i32
  }
  func.func @transform_2(%arg0: i32) -> (i32, i32) {
    %c0_i32 = arith.constant 0 : i32
    %c0_i32_0 = arith.constant 0 : i32
    %c0_i32_1 = arith.constant 0 : i32
    return %c0_i32, %c0_i32_0 : i32, i32
  }
  func.func @transform_3(%arg0: i32) -> (i32, i32) {
    %c0_i32 = arith.constant 0 : i32
    %c0_i32_0 = arith.constant 0 : i32
    return %c0_i32, %arg0 : i32, i32
  }
}

module attributes {stable_mosaic.version = 11 : i64} {
  func.func @_gemm_kernel(%arg0: i32, %arg1: memref<8x72xbf16, #tpu.memory_space<vmem>>, %arg2: memref<72x512xbf16, #tpu.memory_space<vmem>>, %arg3: memref<8x1xf32, #tpu.memory_space<vmem>>, %arg4: memref<8x512xf32, #tpu.memory_space<vmem>>, %arg5: memref<8x512xf32, #tpu.memory_space<vmem>>) attributes {dimension_semantics = [#tpu.dimension_semantics<parallel>], iteration_bounds = array<i64: 1>, scalar_prefetch = 0 : i64, scratch_operands = 0 : i64, tpu.core_type = #tpu.core_type<tc>, window_params = [{pipeline_mode = #tpu.pipeline_mode<synchronous>, transform_indices = @transform_0, window_bounds = array<i64: 8, 72>}, {transform_indices = @transform_1, window_bounds = array<i64: 72, 512>}, {pipeline_mode = #tpu.pipeline_mode<synchronous>, transform_indices = @transform_2, window_bounds = array<i64: 8, 1>}, {transform_indices = @transform_3, window_bounds = array<i64: 8, 512>}, {transform_indices = @transform_4, window_bounds = array<i64: 8, 512>}]} {
    %c0 = arith.constant 0 : index
    %c0_0 = arith.constant 0 : index
    %0 = vector.load %arg1[%c0, %c0_0] : memref<8x72xbf16, #tpu.memory_space<vmem>>, vector<8x72xbf16>
    %c0_1 = arith.constant 0 : index
    %c0_2 = arith.constant 0 : index
    %1 = vector.load %arg2[%c0_1, %c0_2] : memref<72x512xbf16, #tpu.memory_space<vmem>>, vector<72x512xbf16>
    %cst = arith.constant dense<0.000000e+00> : vector<8x512xf32>
    %2 = tpu.matmul %0, %1, %cst {dimension_numbers = #tpu.dot_dimension_numbers<[1], [0], [0], [1], [0, 0, 1, 1], [], []>} : vector<8x72xbf16>, vector<72x512xbf16>, vector<8x512xf32> -> vector<8x512xf32>
    %c0_3 = arith.constant 0 : index
    %c0_4 = arith.constant 0 : index
    %3 = vector.load %arg3[%c0_3, %c0_4] : memref<8x1xf32, #tpu.memory_space<vmem>>, vector<8x1xf32>
    %4 = vector.broadcast %3 : vector<8x1xf32> to vector<8x512xf32>
    %5 = arith.addf %2, %4 : vector<8x512xf32>
    %c0_5 = arith.constant 0 : index
    %c0_6 = arith.constant 0 : index
    %6 = vector.load %arg4[%c0_5, %c0_6] : memref<8x512xf32, #tpu.memory_space<vmem>>, vector<8x512xf32>
    %7 = arith.addf %5, %6 : vector<8x512xf32>
    %c0_7 = arith.constant 0 : index
    %c0_8 = arith.constant 0 : index
    %8 = vector.load %arg5[%c0_7, %c0_8] : memref<8x512xf32, #tpu.memory_space<vmem>>, vector<8x512xf32>
    tpu.vector_store %arg5[%c0_7, %c0_8], %7 {strides = array<i32>} : memref<8x512xf32, #tpu.memory_space<vmem>>, vector<8x512xf32>,
    return
  }
  func.func @transform_0(%arg0: i32) -> (i32, i32) {
    %c0_i32 = arith.constant 0 : i32
    %c0_i32_0 = arith.constant 0 : i32
    %c0_i32_1 = arith.constant 0 : i32
    return %c0_i32, %c0_i32_0 : i32, i32
  }
  func.func @transform_1(%arg0: i32) -> (i32, i32) {
    %c0_i32 = arith.constant 0 : i32
    %c0_i32_0 = arith.constant 0 : i32
    return %c0_i32, %arg0 : i32, i32
  }
  func.func @transform_2(%arg0: i32) -> (i32, i32) {
    %c0_i32 = arith.constant 0 : i32
    %c0_i32_0 = arith.constant 0 : i32
    %c0_i32_1 = arith.constant 0 : i32
    return %c0_i32, %c0_i32_0 : i32, i32
  }
  func.func @transform_3(%arg0: i32) -> (i32, i32) {
    %c0_i32 = arith.constant 0 : i32
    %c0_i32_0 = arith.constant 0 : i32
    return %c0_i32, %arg0 : i32, i32
  }
  func.func @transform_4(%arg0: i32) -> (i32, i32) {
    %c0_i32 = arith.constant 0 : i32
    %c0_i32_0 = arith.constant 0 : i32
    return %c0_i32, %arg0 : i32, i32
  }
}

module attributes {stable_mosaic.version = 11 : i64} {
  func.func @_gemm_kernel(%arg0: i32, %arg1: memref<8x72xbf16, #tpu.memory_space<vmem>>, %arg2: memref<72x512xbf16, #tpu.memory_space<vmem>>, %arg3: memref<8x1xf32, #tpu.memory_space<vmem>>, %arg4: memref<8x512xf32, #tpu.memory_space<vmem>>, %arg5: memref<8x512xf32, #tpu.memory_space<vmem>>) attributes {dimension_semantics = [#tpu.dimension_semantics<parallel>], iteration_bounds = array<i64: 1>, scalar_prefetch = 0 : i64, scratch_operands = 0 : i64, tpu.core_type = #tpu.core_type<tc>, window_params = [{pipeline_mode = #tpu.pipeline_mode<synchronous>, transform_indices = @transform_0, window_bounds = array<i64: 8, 72>}, {transform_indices = @transform_1, window_bounds = array<i64: 72, 512>}, {pipeline_mode = #tpu.pipeline_mode<synchronous>, transform_indices = @transform_2, window_bounds = array<i64: 8, 1>}, {transform_indices = @transform_3, window_bounds = array<i64: 8, 512>}, {transform_indices = @transform_4, window_bounds = array<i64: 8, 512>}]} {
    %c0 = arith.constant 0 : index
    %c0_0 = arith.constant 0 : index
    %0 = vector.load %arg1[%c0, %c0_0] : memref<8x72xbf16, #tpu.memory_space<vmem>>, vector<8x72xbf16>
    %c0_1 = arith.constant 0 : index
    %c0_2 = arith.constant 0 : index
    %1 = vector.load %arg2[%c0_1, %c0_2] : memref<72x512xbf16, #tpu.memory_space<vmem>>, vector<72x512xbf16>
    %cst = arith.constant dense<0.000000e+00> : vector<8x512xf32>
    %2 = tpu.matmul %0, %1, %cst {dimension_numbers = #tpu.dot_dimension_numbers<[1], [0], [0], [1], [0, 0, 1, 1], [], []>} : vector<8x72xbf16>, vector<72x512xbf16>, vector<8x512xf32> -> vector<8x512xf32>
    %c0_3 = arith.constant 0 : index
    %c0_4 = arith.constant 0 : index
    %3 = vector.load %arg3[%c0_3, %c0_4] : memref<8x1xf32, #tpu.memory_space<vmem>>, vector<8x1xf32>
    %4 = vector.broadcast %3 : vector<8x1xf32> to vector<8x512xf32>
    %5 = arith.addf %2, %4 : vector<8x512xf32>
    %c0_5 = arith.constant 0 : index
    %c0_6 = arith.constant 0 : index
    %6 = vector.load %arg4[%c0_5, %c0_6] : memref<8x512xf32, #tpu.memory_space<vmem>>, vector<8x512xf32>
    %7 = arith.addf %5, %6 : vector<8x512xf32>
    %cst_7 = arith.constant 0.000000e+00 : f32
    %8 = vector.broadcast %cst_7 : f32 to vector<8x512xf32>
    %9 = arith.maximumf %7, %8 : vector<8x512xf32>
    %c0_8 = arith.constant 0 : index
    %c0_9 = arith.constant 0 : index
    %10 = vector.load %arg5[%c0_8, %c0_9] : memref<8x512xf32, #tpu.memory_space<vmem>>, vector<8x512xf32>
    tpu.vector_store %arg5[%c0_8, %c0_9], %9 {strides = array<i32>} : memref<8x512xf32, #tpu.memory_space<vmem>>, vector<8x512xf32>,
    return
  }
  func.func @transform_0(%arg0: i32) -> (i32, i32) {
    %c0_i32 = arith.constant 0 : i32
    %c0_i32_0 = arith.constant 0 : i32
    %c0_i32_1 = arith.constant 0 : i32
    return %c0_i32, %c0_i32_0 : i32, i32
  }
  func.func @transform_1(%arg0: i32) -> (i32, i32) {
    %c0_i32 = arith.constant 0 : i32
    %c0_i32_0 = arith.constant 0 : i32
    return %c0_i32, %arg0 : i32, i32
  }
  func.func @transform_2(%arg0: i32) -> (i32, i32) {
    %c0_i32 = arith.constant 0 : i32
    %c0_i32_0 = arith.constant 0 : i32
    %c0_i32_1 = arith.constant 0 : i32
    return %c0_i32, %c0_i32_0 : i32, i32
  }
  func.func @transform_3(%arg0: i32) -> (i32, i32) {
    %c0_i32 = arith.constant 0 : i32
    %c0_i32_0 = arith.constant 0 : i32
    return %c0_i32, %arg0 : i32, i32
  }
  func.func @transform_4(%arg0: i32) -> (i32, i32) {
    %c0_i32 = arith.constant 0 : i32
    %c0_i32_0 = arith.constant 0 : i32
    return %c0_i32, %arg0 : i32, i32
  }
}

module attributes {stable_mosaic.version = 11 : i64} {
  func.func @_gemm_kernel(%arg0: i32, %arg1: memref<16x72xbf16, #tpu.memory_space<vmem>>, %arg2: memref<72x128xbf16, #tpu.memory_space<vmem>>, %arg3: memref<16x1xf32, #tpu.memory_space<vmem>>, %arg4: memref<16x128xf32, #tpu.memory_space<vmem>>) attributes {dimension_semantics = [#tpu.dimension_semantics<parallel>], iteration_bounds = array<i64: 1>, scalar_prefetch = 0 : i64, scratch_operands = 0 : i64, tpu.core_type = #tpu.core_type<tc>, window_params = [{pipeline_mode = #tpu.pipeline_mode<synchronous>, transform_indices = @transform_0, window_bounds = array<i64: 16, 72>}, {transform_indices = @transform_1, window_bounds = array<i64: 72, 128>}, {pipeline_mode = #tpu.pipeline_mode<synchronous>, transform_indices = @transform_2, window_bounds = array<i64: 16, 1>}, {transform_indices = @transform_3, window_bounds = array<i64: 16, 128>}]} {
    %c0 = arith.constant 0 : index
    %c0_0 = arith.constant 0 : index
    %0 = vector.load %arg1[%c0, %c0_0] : memref<16x72xbf16, #tpu.memory_space<vmem>>, vector<16x72xbf16>
    %c0_1 = arith.constant 0 : index
    %c0_2 = arith.constant 0 : index
    %1 = vector.load %arg2[%c0_1, %c0_2] : memref<72x128xbf16, #tpu.memory_space<vmem>>, vector<72x128xbf16>
    %cst = arith.constant dense<0.000000e+00> : vector<16x128xf32>
    %2 = tpu.matmul %0, %1, %cst {dimension_numbers = #tpu.dot_dimension_numbers<[1], [0], [0], [1], [0, 0, 1, 1], [], []>} : vector<16x72xbf16>, vector<72x128xbf16>, vector<16x128xf32> -> vector<16x128xf32>
    %c0_3 = arith.constant 0 : index
    %c0_4 = arith.constant 0 : index
    %3 = vector.load %arg3[%c0_3, %c0_4] : memref<16x1xf32, #tpu.memory_space<vmem>>, vector<16x1xf32>
    %4 = vector.broadcast %3 : vector<16x1xf32> to vector<16x128xf32>
    %5 = arith.addf %2, %4 : vector<16x128xf32>
    %c0_5 = arith.constant 0 : index
    %c0_6 = arith.constant 0 : index
    %6 = vector.load %arg4[%c0_5, %c0_6] : memref<16x128xf32, #tpu.memory_space<vmem>>, vector<16x128xf32>
    tpu.vector_store %arg4[%c0_5, %c0_6], %5 {strides = array<i32>} : memref<16x128xf32, #tpu.memory_space<vmem>>, vector<16x128xf32>,
    return
  }
  func.func @transform_0(%arg0: i32) -> (i32, i32) {
    %c0_i32 = arith.constant 0 : i32
    %c0_i32_0 = arith.constant 0 : i32
    %c0_i32_1 = arith.constant 0 : i32
    return %c0_i32, %c0_i32_0 : i32, i32
  }
  func.func @transform_1(%arg0: i32) -> (i32, i32) {
    %c0_i32 = arith.constant 0 : i32
    %c0_i32_0 = arith.constant 0 : i32
    return %c0_i32, %arg0 : i32, i32
  }
  func.func @transform_2(%arg0: i32) -> (i32, i32) {
    %c0_i32 = arith.constant 0 : i32
    %c0_i32_0 = arith.constant 0 : i32
    %c0_i32_1 = arith.constant 0 : i32
    return %c0_i32, %c0_i32_0 : i32, i32
  }
  func.func @transform_3(%arg0: i32) -> (i32, i32) {
    %c0_i32 = arith.constant 0 : i32
    %c0_i32_0 = arith.constant 0 : i32
    return %c0_i32, %arg0 : i32, i32
  }
}

module attributes {stable_mosaic.version = 11 : i64} {
  func.func @_gemm_kernel(%arg0: i32, %arg1: memref<16x144xbf16, #tpu.memory_space<vmem>>, %arg2: memref<144x128xbf16, #tpu.memory_space<vmem>>, %arg3: memref<16x1xf32, #tpu.memory_space<vmem>>, %arg4: memref<16x128xf32, #tpu.memory_space<vmem>>) attributes {dimension_semantics = [#tpu.dimension_semantics<parallel>], iteration_bounds = array<i64: 1>, scalar_prefetch = 0 : i64, scratch_operands = 0 : i64, tpu.core_type = #tpu.core_type<tc>, window_params = [{pipeline_mode = #tpu.pipeline_mode<synchronous>, transform_indices = @transform_0, window_bounds = array<i64: 16, 144>}, {transform_indices = @transform_1, window_bounds = array<i64: 144, 128>}, {pipeline_mode = #tpu.pipeline_mode<synchronous>, transform_indices = @transform_2, window_bounds = array<i64: 16, 1>}, {transform_indices = @transform_3, window_bounds = array<i64: 16, 128>}]} {
    %c0 = arith.constant 0 : index
    %c0_0 = arith.constant 0 : index
    %0 = vector.load %arg1[%c0, %c0_0] : memref<16x144xbf16, #tpu.memory_space<vmem>>, vector<16x144xbf16>
    %c0_1 = arith.constant 0 : index
    %c0_2 = arith.constant 0 : index
    %1 = vector.load %arg2[%c0_1, %c0_2] : memref<144x128xbf16, #tpu.memory_space<vmem>>, vector<144x128xbf16>
    %cst = arith.constant dense<0.000000e+00> : vector<16x128xf32>
    %2 = tpu.matmul %0, %1, %cst {dimension_numbers = #tpu.dot_dimension_numbers<[1], [0], [0], [1], [0, 0, 1, 1], [], []>} : vector<16x144xbf16>, vector<144x128xbf16>, vector<16x128xf32> -> vector<16x128xf32>
    %c0_3 = arith.constant 0 : index
    %c0_4 = arith.constant 0 : index
    %3 = vector.load %arg3[%c0_3, %c0_4] : memref<16x1xf32, #tpu.memory_space<vmem>>, vector<16x1xf32>
    %4 = vector.broadcast %3 : vector<16x1xf32> to vector<16x128xf32>
    %5 = arith.addf %2, %4 : vector<16x128xf32>
    %cst_5 = arith.constant 0.000000e+00 : f32
    %6 = vector.broadcast %cst_5 : f32 to vector<16x128xf32>
    %7 = arith.maximumf %5, %6 : vector<16x128xf32>
    %c0_6 = arith.constant 0 : index
    %c0_7 = arith.constant 0 : index
    %8 = vector.load %arg4[%c0_6, %c0_7] : memref<16x128xf32, #tpu.memory_space<vmem>>, vector<16x128xf32>
    tpu.vector_store %arg4[%c0_6, %c0_7], %7 {strides = array<i32>} : memref<16x128xf32, #tpu.memory_space<vmem>>, vector<16x128xf32>,
    return
  }
  func.func @transform_0(%arg0: i32) -> (i32, i32) {
    %c0_i32 = arith.constant 0 : i32
    %c0_i32_0 = arith.constant 0 : i32
    %c0_i32_1 = arith.constant 0 : i32
    return %c0_i32, %c0_i32_0 : i32, i32
  }
  func.func @transform_1(%arg0: i32) -> (i32, i32) {
    %c0_i32 = arith.constant 0 : i32
    %c0_i32_0 = arith.constant 0 : i32
    return %c0_i32, %arg0 : i32, i32
  }
  func.func @transform_2(%arg0: i32) -> (i32, i32) {
    %c0_i32 = arith.constant 0 : i32
    %c0_i32_0 = arith.constant 0 : i32
    %c0_i32_1 = arith.constant 0 : i32
    return %c0_i32, %c0_i32_0 : i32, i32
  }
  func.func @transform_3(%arg0: i32) -> (i32, i32) {
    %c0_i32 = arith.constant 0 : i32
    %c0_i32_0 = arith.constant 0 : i32
    return %c0_i32, %arg0 : i32, i32
  }
}

module attributes {stable_mosaic.version = 11 : i64} {
  func.func @_gemm_kernel(%arg0: i32, %arg1: memref<16x144xbf16, #tpu.memory_space<vmem>>, %arg2: memref<144x128xbf16, #tpu.memory_space<vmem>>, %arg3: memref<16x1xf32, #tpu.memory_space<vmem>>, %arg4: memref<16x128xf32, #tpu.memory_space<vmem>>, %arg5: memref<16x128xf32, #tpu.memory_space<vmem>>) attributes {dimension_semantics = [#tpu.dimension_semantics<parallel>], iteration_bounds = array<i64: 1>, scalar_prefetch = 0 : i64, scratch_operands = 0 : i64, tpu.core_type = #tpu.core_type<tc>, window_params = [{pipeline_mode = #tpu.pipeline_mode<synchronous>, transform_indices = @transform_0, window_bounds = array<i64: 16, 144>}, {transform_indices = @transform_1, window_bounds = array<i64: 144, 128>}, {pipeline_mode = #tpu.pipeline_mode<synchronous>, transform_indices = @transform_2, window_bounds = array<i64: 16, 1>}, {transform_indices = @transform_3, window_bounds = array<i64: 16, 128>}, {transform_indices = @transform_4, window_bounds = array<i64: 16, 128>}]} {
    %c0 = arith.constant 0 : index
    %c0_0 = arith.constant 0 : index
    %0 = vector.load %arg1[%c0, %c0_0] : memref<16x144xbf16, #tpu.memory_space<vmem>>, vector<16x144xbf16>
    %c0_1 = arith.constant 0 : index
    %c0_2 = arith.constant 0 : index
    %1 = vector.load %arg2[%c0_1, %c0_2] : memref<144x128xbf16, #tpu.memory_space<vmem>>, vector<144x128xbf16>
    %cst = arith.constant dense<0.000000e+00> : vector<16x128xf32>
    %2 = tpu.matmul %0, %1, %cst {dimension_numbers = #tpu.dot_dimension_numbers<[1], [0], [0], [1], [0, 0, 1, 1], [], []>} : vector<16x144xbf16>, vector<144x128xbf16>, vector<16x128xf32> -> vector<16x128xf32>
    %c0_3 = arith.constant 0 : index
    %c0_4 = arith.constant 0 : index
    %3 = vector.load %arg3[%c0_3, %c0_4] : memref<16x1xf32, #tpu.memory_space<vmem>>, vector<16x1xf32>
    %4 = vector.broadcast %3 : vector<16x1xf32> to vector<16x128xf32>
    %5 = arith.addf %2, %4 : vector<16x128xf32>
    %c0_5 = arith.constant 0 : index
    %c0_6 = arith.constant 0 : index
    %6 = vector.load %arg4[%c0_5, %c0_6] : memref<16x128xf32, #tpu.memory_space<vmem>>, vector<16x128xf32>
    %7 = arith.addf %5, %6 : vector<16x128xf32>
    %c0_7 = arith.constant 0 : index
    %c0_8 = arith.constant 0 : index
    %8 = vector.load %arg5[%c0_7, %c0_8] : memref<16x128xf32, #tpu.memory_space<vmem>>, vector<16x128xf32>
    tpu.vector_store %arg5[%c0_7, %c0_8], %7 {strides = array<i32>} : memref<16x128xf32, #tpu.memory_space<vmem>>, vector<16x128xf32>,
    return
  }
  func.func @transform_0(%arg0: i32) -> (i32, i32) {
    %c0_i32 = arith.constant 0 : i32
    %c0_i32_0 = arith.constant 0 : i32
    %c0_i32_1 = arith.constant 0 : i32
    return %c0_i32, %c0_i32_0 : i32, i32
  }
  func.func @transform_1(%arg0: i32) -> (i32, i32) {
    %c0_i32 = arith.constant 0 : i32
    %c0_i32_0 = arith.constant 0 : i32
    return %c0_i32, %arg0 : i32, i32
  }
  func.func @transform_2(%arg0: i32) -> (i32, i32) {
    %c0_i32 = arith.constant 0 : i32
    %c0_i32_0 = arith.constant 0 : i32
    %c0_i32_1 = arith.constant 0 : i32
    return %c0_i32, %c0_i32_0 : i32, i32
  }
  func.func @transform_3(%arg0: i32) -> (i32, i32) {
    %c0_i32 = arith.constant 0 : i32
    %c0_i32_0 = arith.constant 0 : i32
    return %c0_i32, %arg0 : i32, i32
  }
  func.func @transform_4(%arg0: i32) -> (i32, i32) {
    %c0_i32 = arith.constant 0 : i32
    %c0_i32_0 = arith.constant 0 : i32
    return %c0_i32, %arg0 : i32, i32
  }
}

module attributes {stable_mosaic.version = 11 : i64} {
  func.func @_gemm_kernel(%arg0: i32, %arg1: memref<16x144xbf16, #tpu.memory_space<vmem>>, %arg2: memref<144x128xbf16, #tpu.memory_space<vmem>>, %arg3: memref<16x1xf32, #tpu.memory_space<vmem>>, %arg4: memref<16x128xf32, #tpu.memory_space<vmem>>, %arg5: memref<16x128xf32, #tpu.memory_space<vmem>>) attributes {dimension_semantics = [#tpu.dimension_semantics<parallel>], iteration_bounds = array<i64: 1>, scalar_prefetch = 0 : i64, scratch_operands = 0 : i64, tpu.core_type = #tpu.core_type<tc>, window_params = [{pipeline_mode = #tpu.pipeline_mode<synchronous>, transform_indices = @transform_0, window_bounds = array<i64: 16, 144>}, {transform_indices = @transform_1, window_bounds = array<i64: 144, 128>}, {pipeline_mode = #tpu.pipeline_mode<synchronous>, transform_indices = @transform_2, window_bounds = array<i64: 16, 1>}, {transform_indices = @transform_3, window_bounds = array<i64: 16, 128>}, {transform_indices = @transform_4, window_bounds = array<i64: 16, 128>}]} {
    %c0 = arith.constant 0 : index
    %c0_0 = arith.constant 0 : index
    %0 = vector.load %arg1[%c0, %c0_0] : memref<16x144xbf16, #tpu.memory_space<vmem>>, vector<16x144xbf16>
    %c0_1 = arith.constant 0 : index
    %c0_2 = arith.constant 0 : index
    %1 = vector.load %arg2[%c0_1, %c0_2] : memref<144x128xbf16, #tpu.memory_space<vmem>>, vector<144x128xbf16>
    %cst = arith.constant dense<0.000000e+00> : vector<16x128xf32>
    %2 = tpu.matmul %0, %1, %cst {dimension_numbers = #tpu.dot_dimension_numbers<[1], [0], [0], [1], [0, 0, 1, 1], [], []>} : vector<16x144xbf16>, vector<144x128xbf16>, vector<16x128xf32> -> vector<16x128xf32>
    %c0_3 = arith.constant 0 : index
    %c0_4 = arith.constant 0 : index
    %3 = vector.load %arg3[%c0_3, %c0_4] : memref<16x1xf32, #tpu.memory_space<vmem>>, vector<16x1xf32>
    %4 = vector.broadcast %3 : vector<16x1xf32> to vector<16x128xf32>
    %5 = arith.addf %2, %4 : vector<16x128xf32>
    %c0_5 = arith.constant 0 : index
    %c0_6 = arith.constant 0 : index
    %6 = vector.load %arg4[%c0_5, %c0_6] : memref<16x128xf32, #tpu.memory_space<vmem>>, vector<16x128xf32>
    %7 = arith.addf %5, %6 : vector<16x128xf32>
    %cst_7 = arith.constant 0.000000e+00 : f32
    %8 = vector.broadcast %cst_7 : f32 to vector<16x128xf32>
    %9 = arith.maximumf %7, %8 : vector<16x128xf32>
    %c0_8 = arith.constant 0 : index
    %c0_9 = arith.constant 0 : index
    %10 = vector.load %arg5[%c0_8, %c0_9] : memref<16x128xf32, #tpu.memory_space<vmem>>, vector<16x128xf32>
    tpu.vector_store %arg5[%c0_8, %c0_9], %9 {strides = array<i32>} : memref<16x128xf32, #tpu.memory_space<vmem>>, vector<16x128xf32>,
    return
  }
  func.func @transform_0(%arg0: i32) -> (i32, i32) {
    %c0_i32 = arith.constant 0 : i32
    %c0_i32_0 = arith.constant 0 : i32
    %c0_i32_1 = arith.constant 0 : i32
    return %c0_i32, %c0_i32_0 : i32, i32
  }
  func.func @transform_1(%arg0: i32) -> (i32, i32) {
    %c0_i32 = arith.constant 0 : i32
    %c0_i32_0 = arith.constant 0 : i32
    return %c0_i32, %arg0 : i32, i32
  }
  func.func @transform_2(%arg0: i32) -> (i32, i32) {
    %c0_i32 = arith.constant 0 : i32
    %c0_i32_0 = arith.constant 0 : i32
    %c0_i32_1 = arith.constant 0 : i32
    return %c0_i32, %c0_i32_0 : i32, i32
  }
  func.func @transform_3(%arg0: i32) -> (i32, i32) {
    %c0_i32 = arith.constant 0 : i32
    %c0_i32_0 = arith.constant 0 : i32
    return %c0_i32, %arg0 : i32, i32
  }
  func.func @transform_4(%arg0: i32) -> (i32, i32) {
    %c0_i32 = arith.constant 0 : i32
    %c0_i32_0 = arith.constant 0 : i32
    return %c0_i32, %arg0 : i32, i32
  }
}

module attributes {stable_mosaic.version = 11 : i64} {
  func.func @_gemm_kernel(%arg0: i32, %arg1: memref<32x144xbf16, #tpu.memory_space<vmem>>, %arg2: memref<144x128xbf16, #tpu.memory_space<vmem>>, %arg3: memref<32x1xf32, #tpu.memory_space<vmem>>, %arg4: memref<32x128xf32, #tpu.memory_space<vmem>>) attributes {dimension_semantics = [#tpu.dimension_semantics<parallel>], iteration_bounds = array<i64: 1>, scalar_prefetch = 0 : i64, scratch_operands = 0 : i64, tpu.core_type = #tpu.core_type<tc>, window_params = [{pipeline_mode = #tpu.pipeline_mode<synchronous>, transform_indices = @transform_0, window_bounds = array<i64: 32, 144>}, {transform_indices = @transform_1, window_bounds = array<i64: 144, 128>}, {pipeline_mode = #tpu.pipeline_mode<synchronous>, transform_indices = @transform_2, window_bounds = array<i64: 32, 1>}, {transform_indices = @transform_3, window_bounds = array<i64: 32, 128>}]} {
    %c0 = arith.constant 0 : index
    %c0_0 = arith.constant 0 : index
    %0 = vector.load %arg1[%c0, %c0_0] : memref<32x144xbf16, #tpu.memory_space<vmem>>, vector<32x144xbf16>
    %c0_1 = arith.constant 0 : index
    %c0_2 = arith.constant 0 : index
    %1 = vector.load %arg2[%c0_1, %c0_2] : memref<144x128xbf16, #tpu.memory_space<vmem>>, vector<144x128xbf16>
    %cst = arith.constant dense<0.000000e+00> : vector<32x128xf32>
    %2 = tpu.matmul %0, %1, %cst {dimension_numbers = #tpu.dot_dimension_numbers<[1], [0], [0], [1], [0, 0, 1, 1], [], []>} : vector<32x144xbf16>, vector<144x128xbf16>, vector<32x128xf32> -> vector<32x128xf32>
    %c0_3 = arith.constant 0 : index
    %c0_4 = arith.constant 0 : index
    %3 = vector.load %arg3[%c0_3, %c0_4] : memref<32x1xf32, #tpu.memory_space<vmem>>, vector<32x1xf32>
    %4 = vector.broadcast %3 : vector<32x1xf32> to vector<32x128xf32>
    %5 = arith.addf %2, %4 : vector<32x128xf32>
    %cst_5 = arith.constant 0.000000e+00 : f32
    %6 = vector.broadcast %cst_5 : f32 to vector<32x128xf32>
    %7 = arith.maximumf %5, %6 : vector<32x128xf32>
    %c0_6 = arith.constant 0 : index
    %c0_7 = arith.constant 0 : index
    %8 = vector.load %arg4[%c0_6, %c0_7] : memref<32x128xf32, #tpu.memory_space<vmem>>, vector<32x128xf32>
    tpu.vector_store %arg4[%c0_6, %c0_7], %7 {strides = array<i32>} : memref<32x128xf32, #tpu.memory_space<vmem>>, vector<32x128xf32>,
    return
  }
  func.func @transform_0(%arg0: i32) -> (i32, i32) {
    %c0_i32 = arith.constant 0 : i32
    %c0_i32_0 = arith.constant 0 : i32
    %c0_i32_1 = arith.constant 0 : i32
    return %c0_i32, %c0_i32_0 : i32, i32
  }
  func.func @transform_1(%arg0: i32) -> (i32, i32) {
    %c0_i32 = arith.constant 0 : i32
    %c0_i32_0 = arith.constant 0 : i32
    return %c0_i32, %arg0 : i32, i32
  }
  func.func @transform_2(%arg0: i32) -> (i32, i32) {
    %c0_i32 = arith.constant 0 : i32
    %c0_i32_0 = arith.constant 0 : i32
    %c0_i32_1 = arith.constant 0 : i32
    return %c0_i32, %c0_i32_0 : i32, i32
  }
  func.func @transform_3(%arg0: i32) -> (i32, i32) {
    %c0_i32 = arith.constant 0 : i32
    %c0_i32_0 = arith.constant 0 : i32
    return %c0_i32, %arg0 : i32, i32
  }
}

module attributes {stable_mosaic.version = 11 : i64} {
  func.func @_gemm_kernel(%arg0: i32, %arg1: memref<32x288xbf16, #tpu.memory_space<vmem>>, %arg2: memref<288x128xbf16, #tpu.memory_space<vmem>>, %arg3: memref<32x1xf32, #tpu.memory_space<vmem>>, %arg4: memref<32x128xf32, #tpu.memory_space<vmem>>) attributes {dimension_semantics = [#tpu.dimension_semantics<parallel>], iteration_bounds = array<i64: 1>, scalar_prefetch = 0 : i64, scratch_operands = 0 : i64, tpu.core_type = #tpu.core_type<tc>, window_params = [{pipeline_mode = #tpu.pipeline_mode<synchronous>, transform_indices = @transform_0, window_bounds = array<i64: 32, 288>}, {transform_indices = @transform_1, window_bounds = array<i64: 288, 128>}, {pipeline_mode = #tpu.pipeline_mode<synchronous>, transform_indices = @transform_2, window_bounds = array<i64: 32, 1>}, {transform_indices = @transform_3, window_bounds = array<i64: 32, 128>}]} {
    %c0 = arith.constant 0 : index
    %c0_0 = arith.constant 0 : index
    %0 = vector.load %arg1[%c0, %c0_0] : memref<32x288xbf16, #tpu.memory_space<vmem>>, vector<32x288xbf16>
    %c0_1 = arith.constant 0 : index
    %c0_2 = arith.constant 0 : index
    %1 = vector.load %arg2[%c0_1, %c0_2] : memref<288x128xbf16, #tpu.memory_space<vmem>>, vector<288x128xbf16>
    %cst = arith.constant dense<0.000000e+00> : vector<32x128xf32>
    %2 = tpu.matmul %0, %1, %cst {dimension_numbers = #tpu.dot_dimension_numbers<[1], [0], [0], [1], [0, 0, 1, 1], [], []>} : vector<32x288xbf16>, vector<288x128xbf16>, vector<32x128xf32> -> vector<32x128xf32>
    %c0_3 = arith.constant 0 : index
    %c0_4 = arith.constant 0 : index
    %3 = vector.load %arg3[%c0_3, %c0_4] : memref<32x1xf32, #tpu.memory_space<vmem>>, vector<32x1xf32>
    %4 = vector.broadcast %3 : vector<32x1xf32> to vector<32x128xf32>
    %5 = arith.addf %2, %4 : vector<32x128xf32>
    %cst_5 = arith.constant 0.000000e+00 : f32
    %6 = vector.broadcast %cst_5 : f32 to vector<32x128xf32>
    %7 = arith.maximumf %5, %6 : vector<32x128xf32>
    %c0_6 = arith.constant 0 : index
    %c0_7 = arith.constant 0 : index
    %8 = vector.load %arg4[%c0_6, %c0_7] : memref<32x128xf32, #tpu.memory_space<vmem>>, vector<32x128xf32>
    tpu.vector_store %arg4[%c0_6, %c0_7], %7 {strides = array<i32>} : memref<32x128xf32, #tpu.memory_space<vmem>>, vector<32x128xf32>,
    return
  }
  func.func @transform_0(%arg0: i32) -> (i32, i32) {
    %c0_i32 = arith.constant 0 : i32
    %c0_i32_0 = arith.constant 0 : i32
    %c0_i32_1 = arith.constant 0 : i32
    return %c0_i32, %c0_i32_0 : i32, i32
  }
  func.func @transform_1(%arg0: i32) -> (i32, i32) {
    %c0_i32 = arith.constant 0 : i32
    %c0_i32_0 = arith.constant 0 : i32
    return %c0_i32, %arg0 : i32, i32
  }
  func.func @transform_2(%arg0: i32) -> (i32, i32) {
    %c0_i32 = arith.constant 0 : i32
    %c0_i32_0 = arith.constant 0 : i32
    %c0_i32_1 = arith.constant 0 : i32
    return %c0_i32, %c0_i32_0 : i32, i32
  }
  func.func @transform_3(%arg0: i32) -> (i32, i32) {
    %c0_i32 = arith.constant 0 : i32
    %c0_i32_0 = arith.constant 0 : i32
    return %c0_i32, %arg0 : i32, i32
  }
}

module attributes {stable_mosaic.version = 11 : i64} {
  func.func @_gemm_kernel(%arg0: i32, %arg1: memref<16x512xbf16, #tpu.memory_space<vmem>>, %arg2: memref<512x128xbf16, #tpu.memory_space<vmem>>, %arg3: memref<16x1xf32, #tpu.memory_space<vmem>>, %arg4: memref<16x128xf32, #tpu.memory_space<vmem>>) attributes {dimension_semantics = [#tpu.dimension_semantics<parallel>], iteration_bounds = array<i64: 1>, scalar_prefetch = 0 : i64, scratch_operands = 0 : i64, tpu.core_type = #tpu.core_type<tc>, window_params = [{pipeline_mode = #tpu.pipeline_mode<synchronous>, transform_indices = @transform_0, window_bounds = array<i64: 16, 512>}, {transform_indices = @transform_1, window_bounds = array<i64: 512, 128>}, {pipeline_mode = #tpu.pipeline_mode<synchronous>, transform_indices = @transform_2, window_bounds = array<i64: 16, 1>}, {transform_indices = @transform_3, window_bounds = array<i64: 16, 128>}]} {
    %c0 = arith.constant 0 : index
    %c0_0 = arith.constant 0 : index
    %0 = vector.load %arg1[%c0, %c0_0] : memref<16x512xbf16, #tpu.memory_space<vmem>>, vector<16x512xbf16>
    %c0_1 = arith.constant 0 : index
    %c0_2 = arith.constant 0 : index
    %1 = vector.load %arg2[%c0_1, %c0_2] : memref<512x128xbf16, #tpu.memory_space<vmem>>, vector<512x128xbf16>
    %cst = arith.constant dense<0.000000e+00> : vector<16x128xf32>
    %2 = tpu.matmul %0, %1, %cst {dimension_numbers = #tpu.dot_dimension_numbers<[1], [0], [0], [1], [0, 0, 1, 1], [], []>} : vector<16x512xbf16>, vector<512x128xbf16>, vector<16x128xf32> -> vector<16x128xf32>
    %c0_3 = arith.constant 0 : index
    %c0_4 = arith.constant 0 : index
    %3 = vector.load %arg3[%c0_3, %c0_4] : memref<16x1xf32, #tpu.memory_space<vmem>>, vector<16x1xf32>
    %4 = vector.broadcast %3 : vector<16x1xf32> to vector<16x128xf32>
    %5 = arith.addf %2, %4 : vector<16x128xf32>
    %c0_5 = arith.constant 0 : index
    %c0_6 = arith.constant 0 : index
    %6 = vector.load %arg4[%c0_5, %c0_6] : memref<16x128xf32, #tpu.memory_space<vmem>>, vector<16x128xf32>
    tpu.vector_store %arg4[%c0_5, %c0_6], %5 {strides = array<i32>} : memref<16x128xf32, #tpu.memory_space<vmem>>, vector<16x128xf32>,
    return
  }
  func.func @transform_0(%arg0: i32) -> (i32, i32) {
    %c0_i32 = arith.constant 0 : i32
    %c0_i32_0 = arith.constant 0 : i32
    %c0_i32_1 = arith.constant 0 : i32
    return %c0_i32, %c0_i32_0 : i32, i32
  }
  func.func @transform_1(%arg0: i32) -> (i32, i32) {
    %c0_i32 = arith.constant 0 : i32
    %c0_i32_0 = arith.constant 0 : i32
    return %c0_i32, %arg0 : i32, i32
  }
  func.func @transform_2(%arg0: i32) -> (i32, i32) {
    %c0_i32 = arith.constant 0 : i32
    %c0_i32_0 = arith.constant 0 : i32
    %c0_i32_1 = arith.constant 0 : i32
    return %c0_i32, %c0_i32_0 : i32, i32
  }
  func.func @transform_3(%arg0: i32) -> (i32, i32) {
    %c0_i32 = arith.constant 0 : i32
    %c0_i32_0 = arith.constant 0 : i32
    return %c0_i32, %arg0 : i32, i32
  }
}

module attributes {stable_mosaic.version = 11 : i64} {
  func.func @_gemm_kernel(%arg0: i32, %arg1: memref<16x288xbf16, #tpu.memory_space<vmem>>, %arg2: memref<288x128xbf16, #tpu.memory_space<vmem>>, %arg3: memref<16x1xf32, #tpu.memory_space<vmem>>, %arg4: memref<16x128xf32, #tpu.memory_space<vmem>>) attributes {dimension_semantics = [#tpu.dimension_semantics<parallel>], iteration_bounds = array<i64: 1>, scalar_prefetch = 0 : i64, scratch_operands = 0 : i64, tpu.core_type = #tpu.core_type<tc>, window_params = [{pipeline_mode = #tpu.pipeline_mode<synchronous>, transform_indices = @transform_0, window_bounds = array<i64: 16, 288>}, {transform_indices = @transform_1, window_bounds = array<i64: 288, 128>}, {pipeline_mode = #tpu.pipeline_mode<synchronous>, transform_indices = @transform_2, window_bounds = array<i64: 16, 1>}, {transform_indices = @transform_3, window_bounds = array<i64: 16, 128>}]} {
    %c0 = arith.constant 0 : index
    %c0_0 = arith.constant 0 : index
    %0 = vector.load %arg1[%c0, %c0_0] : memref<16x288xbf16, #tpu.memory_space<vmem>>, vector<16x288xbf16>
    %c0_1 = arith.constant 0 : index
    %c0_2 = arith.constant 0 : index
    %1 = vector.load %arg2[%c0_1, %c0_2] : memref<288x128xbf16, #tpu.memory_space<vmem>>, vector<288x128xbf16>
    %cst = arith.constant dense<0.000000e+00> : vector<16x128xf32>
    %2 = tpu.matmul %0, %1, %cst {dimension_numbers = #tpu.dot_dimension_numbers<[1], [0], [0], [1], [0, 0, 1, 1], [], []>} : vector<16x288xbf16>, vector<288x128xbf16>, vector<16x128xf32> -> vector<16x128xf32>
    %c0_3 = arith.constant 0 : index
    %c0_4 = arith.constant 0 : index
    %3 = vector.load %arg3[%c0_3, %c0_4] : memref<16x1xf32, #tpu.memory_space<vmem>>, vector<16x1xf32>
    %4 = vector.broadcast %3 : vector<16x1xf32> to vector<16x128xf32>
    %5 = arith.addf %2, %4 : vector<16x128xf32>
    %c0_5 = arith.constant 0 : index
    %c0_6 = arith.constant 0 : index
    %6 = vector.load %arg4[%c0_5, %c0_6] : memref<16x128xf32, #tpu.memory_space<vmem>>, vector<16x128xf32>
    tpu.vector_store %arg4[%c0_5, %c0_6], %5 {strides = array<i32>} : memref<16x128xf32, #tpu.memory_space<vmem>>, vector<16x128xf32>,
    return
  }
  func.func @transform_0(%arg0: i32) -> (i32, i32) {
    %c0_i32 = arith.constant 0 : i32
    %c0_i32_0 = arith.constant 0 : i32
    %c0_i32_1 = arith.constant 0 : i32
    return %c0_i32, %c0_i32_0 : i32, i32
  }
  func.func @transform_1(%arg0: i32) -> (i32, i32) {
    %c0_i32 = arith.constant 0 : i32
    %c0_i32_0 = arith.constant 0 : i32
    return %c0_i32, %arg0 : i32, i32
  }
  func.func @transform_2(%arg0: i32) -> (i32, i32) {
    %c0_i32 = arith.constant 0 : i32
    %c0_i32_0 = arith.constant 0 : i32
    %c0_i32_1 = arith.constant 0 : i32
    return %c0_i32, %c0_i32_0 : i32, i32
  }
  func.func @transform_3(%arg0: i32) -> (i32, i32) {
    %c0_i32 = arith.constant 0 : i32
    %c0_i32_0 = arith.constant 0 : i32
    return %c0_i32, %arg0 : i32, i32
  }
}

module attributes {stable_mosaic.version = 11 : i64} {
  func.func @_gemm_kernel(%arg0: i32, %arg1: memref<8x256xbf16, #tpu.memory_space<vmem>>, %arg2: memref<256x512xbf16, #tpu.memory_space<vmem>>, %arg3: memref<8x1xf32, #tpu.memory_space<vmem>>, %arg4: memref<8x512xf32, #tpu.memory_space<vmem>>) attributes {dimension_semantics = [#tpu.dimension_semantics<parallel>], iteration_bounds = array<i64: 1>, scalar_prefetch = 0 : i64, scratch_operands = 0 : i64, tpu.core_type = #tpu.core_type<tc>, window_params = [{pipeline_mode = #tpu.pipeline_mode<synchronous>, transform_indices = @transform_0, window_bounds = array<i64: 8, 256>}, {transform_indices = @transform_1, window_bounds = array<i64: 256, 512>}, {pipeline_mode = #tpu.pipeline_mode<synchronous>, transform_indices = @transform_2, window_bounds = array<i64: 8, 1>}, {transform_indices = @transform_3, window_bounds = array<i64: 8, 512>}]} {
    %c0 = arith.constant 0 : index
    %c0_0 = arith.constant 0 : index
    %0 = vector.load %arg1[%c0, %c0_0] : memref<8x256xbf16, #tpu.memory_space<vmem>>, vector<8x256xbf16>
    %c0_1 = arith.constant 0 : index
    %c0_2 = arith.constant 0 : index
    %1 = vector.load %arg2[%c0_1, %c0_2] : memref<256x512xbf16, #tpu.memory_space<vmem>>, vector<256x512xbf16>
    %cst = arith.constant dense<0.000000e+00> : vector<8x512xf32>
    %2 = tpu.matmul %0, %1, %cst {dimension_numbers = #tpu.dot_dimension_numbers<[1], [0], [0], [1], [0, 0, 1, 1], [], []>} : vector<8x256xbf16>, vector<256x512xbf16>, vector<8x512xf32> -> vector<8x512xf32>
    %c0_3 = arith.constant 0 : index
    %c0_4 = arith.constant 0 : index
    %3 = vector.load %arg3[%c0_3, %c0_4] : memref<8x1xf32, #tpu.memory_space<vmem>>, vector<8x1xf32>
    %4 = vector.broadcast %3 : vector<8x1xf32> to vector<8x512xf32>
    %5 = arith.addf %2, %4 : vector<8x512xf32>
    %c0_5 = arith.constant 0 : index
    %c0_6 = arith.constant 0 : index
    %6 = vector.load %arg4[%c0_5, %c0_6] : memref<8x512xf32, #tpu.memory_space<vmem>>, vector<8x512xf32>
    tpu.vector_store %arg4[%c0_5, %c0_6], %5 {strides = array<i32>} : memref<8x512xf32, #tpu.memory_space<vmem>>, vector<8x512xf32>,
    return
  }
  func.func @transform_0(%arg0: i32) -> (i32, i32) {
    %c0_i32 = arith.constant 0 : i32
    %c0_i32_0 = arith.constant 0 : i32
    %c0_i32_1 = arith.constant 0 : i32
    return %c0_i32, %c0_i32_0 : i32, i32
  }
  func.func @transform_1(%arg0: i32) -> (i32, i32) {
    %c0_i32 = arith.constant 0 : i32
    %c0_i32_0 = arith.constant 0 : i32
    return %c0_i32, %arg0 : i32, i32
  }
  func.func @transform_2(%arg0: i32) -> (i32, i32) {
    %c0_i32 = arith.constant 0 : i32
    %c0_i32_0 = arith.constant 0 : i32
    %c0_i32_1 = arith.constant 0 : i32
    return %c0_i32, %c0_i32_0 : i32, i32
  }
  func.func @transform_3(%arg0: i32) -> (i32, i32) {
    %c0_i32 = arith.constant 0 : i32
    %c0_i32_0 = arith.constant 0 : i32
    return %c0_i32, %arg0 : i32, i32
  }
}

module attributes {stable_mosaic.version = 11 : i64} {
  func.func @_gemm_kernel(%arg0: i32, %arg1: memref<8x144xbf16, #tpu.memory_space<vmem>>, %arg2: memref<144x512xbf16, #tpu.memory_space<vmem>>, %arg3: memref<8x1xf32, #tpu.memory_space<vmem>>, %arg4: memref<8x512xf32, #tpu.memory_space<vmem>>) attributes {dimension_semantics = [#tpu.dimension_semantics<parallel>], iteration_bounds = array<i64: 1>, scalar_prefetch = 0 : i64, scratch_operands = 0 : i64, tpu.core_type = #tpu.core_type<tc>, window_params = [{pipeline_mode = #tpu.pipeline_mode<synchronous>, transform_indices = @transform_0, window_bounds = array<i64: 8, 144>}, {transform_indices = @transform_1, window_bounds = array<i64: 144, 512>}, {pipeline_mode = #tpu.pipeline_mode<synchronous>, transform_indices = @transform_2, window_bounds = array<i64: 8, 1>}, {transform_indices = @transform_3, window_bounds = array<i64: 8, 512>}]} {
    %c0 = arith.constant 0 : index
    %c0_0 = arith.constant 0 : index
    %0 = vector.load %arg1[%c0, %c0_0] : memref<8x144xbf16, #tpu.memory_space<vmem>>, vector<8x144xbf16>
    %c0_1 = arith.constant 0 : index
    %c0_2 = arith.constant 0 : index
    %1 = vector.load %arg2[%c0_1, %c0_2] : memref<144x512xbf16, #tpu.memory_space<vmem>>, vector<144x512xbf16>
    %cst = arith.constant dense<0.000000e+00> : vector<8x512xf32>
    %2 = tpu.matmul %0, %1, %cst {dimension_numbers = #tpu.dot_dimension_numbers<[1], [0], [0], [1], [0, 0, 1, 1], [], []>} : vector<8x144xbf16>, vector<144x512xbf16>, vector<8x512xf32> -> vector<8x512xf32>
    %c0_3 = arith.constant 0 : index
    %c0_4 = arith.constant 0 : index
    %3 = vector.load %arg3[%c0_3, %c0_4] : memref<8x1xf32, #tpu.memory_space<vmem>>, vector<8x1xf32>
    %4 = vector.broadcast %3 : vector<8x1xf32> to vector<8x512xf32>
    %5 = arith.addf %2, %4 : vector<8x512xf32>
    %c0_5 = arith.constant 0 : index
    %c0_6 = arith.constant 0 : index
    %6 = vector.load %arg4[%c0_5, %c0_6] : memref<8x512xf32, #tpu.memory_space<vmem>>, vector<8x512xf32>
    tpu.vector_store %arg4[%c0_5, %c0_6], %5 {strides = array<i32>} : memref<8x512xf32, #tpu.memory_space<vmem>>, vector<8x512xf32>,
    return
  }
  func.func @transform_0(%arg0: i32) -> (i32, i32) {
    %c0_i32 = arith.constant 0 : i32
    %c0_i32_0 = arith.constant 0 : i32
    %c0_i32_1 = arith.constant 0 : i32
    return %c0_i32, %c0_i32_0 : i32, i32
  }
  func.func @transform_1(%arg0: i32) -> (i32, i32) {
    %c0_i32 = arith.constant 0 : i32
    %c0_i32_0 = arith.constant 0 : i32
    return %c0_i32, %arg0 : i32, i32
  }
  func.func @transform_2(%arg0: i32) -> (i32, i32) {
    %c0_i32 = arith.constant 0 : i32
    %c0_i32_0 = arith.constant 0 : i32
    %c0_i32_1 = arith.constant 0 : i32
    return %c0_i32, %c0_i32_0 : i32, i32
  }
  func.func @transform_3(%arg0: i32) -> (i32, i32) {
    %c0_i32 = arith.constant 0 : i32
    %c0_i32_0 = arith.constant 0 : i32
    return %c0_i32, %arg0 : i32, i32
  }
}

module attributes {stable_mosaic.version = 11 : i64} {
  func.func @_gemm_kernel(%arg0: i32, %arg1: memref<9x72xbf16, #tpu.memory_space<vmem>>, %arg2: memref<72x512xbf16, #tpu.memory_space<vmem>>, %arg3: memref<9x1xf32, #tpu.memory_space<vmem>>, %arg4: memref<9x512xf32, #tpu.memory_space<vmem>>) attributes {dimension_semantics = [#tpu.dimension_semantics<parallel>], iteration_bounds = array<i64: 1>, scalar_prefetch = 0 : i64, scratch_operands = 0 : i64, tpu.core_type = #tpu.core_type<tc>, window_params = [{pipeline_mode = #tpu.pipeline_mode<synchronous>, transform_indices = @transform_0, window_bounds = array<i64: 9, 72>}, {transform_indices = @transform_1, window_bounds = array<i64: 72, 512>}, {pipeline_mode = #tpu.pipeline_mode<synchronous>, transform_indices = @transform_2, window_bounds = array<i64: 9, 1>}, {transform_indices = @transform_3, window_bounds = array<i64: 9, 512>}]} {
    %c0 = arith.constant 0 : index
    %c0_0 = arith.constant 0 : index
    %0 = vector.load %arg1[%c0, %c0_0] : memref<9x72xbf16, #tpu.memory_space<vmem>>, vector<9x72xbf16>
    %c0_1 = arith.constant 0 : index
    %c0_2 = arith.constant 0 : index
    %1 = vector.load %arg2[%c0_1, %c0_2] : memref<72x512xbf16, #tpu.memory_space<vmem>>, vector<72x512xbf16>
    %cst = arith.constant dense<0.000000e+00> : vector<9x512xf32>
    %2 = tpu.matmul %0, %1, %cst {dimension_numbers = #tpu.dot_dimension_numbers<[1], [0], [0], [1], [0, 0, 1, 1], [], []>} : vector<9x72xbf16>, vector<72x512xbf16>, vector<9x512xf32> -> vector<9x512xf32>
    %c0_3 = arith.constant 0 : index
    %c0_4 = arith.constant 0 : index
    %3 = vector.load %arg3[%c0_3, %c0_4] : memref<9x1xf32, #tpu.memory_space<vmem>>, vector<9x1xf32>
    %4 = vector.broadcast %3 : vector<9x1xf32> to vector<9x512xf32>
    %5 = arith.addf %2, %4 : vector<9x512xf32>
    %cst_5 = arith.constant 0.000000e+00 : f32
    %6 = vector.broadcast %cst_5 : f32 to vector<9x512xf32>
    %7 = arith.maximumf %5, %6 : vector<9x512xf32>
    %c0_6 = arith.constant 0 : index
    %c0_7 = arith.constant 0 : index
    %8 = vector.load %arg4[%c0_6, %c0_7] : memref<9x512xf32, #tpu.memory_space<vmem>>, vector<9x512xf32>
    tpu.vector_store %arg4[%c0_6, %c0_7], %7 {strides = array<i32>} : memref<9x512xf32, #tpu.memory_space<vmem>>, vector<9x512xf32>,
    return
  }
  func.func @transform_0(%arg0: i32) -> (i32, i32) {
    %c0_i32 = arith.constant 0 : i32
    %c0_i32_0 = arith.constant 0 : i32
    %c0_i32_1 = arith.constant 0 : i32
    return %c0_i32, %c0_i32_0 : i32, i32
  }
  func.func @transform_1(%arg0: i32) -> (i32, i32) {
    %c0_i32 = arith.constant 0 : i32
    %c0_i32_0 = arith.constant 0 : i32
    return %c0_i32, %arg0 : i32, i32
  }
  func.func @transform_2(%arg0: i32) -> (i32, i32) {
    %c0_i32 = arith.constant 0 : i32
    %c0_i32_0 = arith.constant 0 : i32
    %c0_i32_1 = arith.constant 0 : i32
    return %c0_i32, %c0_i32_0 : i32, i32
  }
  func.func @transform_3(%arg0: i32) -> (i32, i32) {
    %c0_i32 = arith.constant 0 : i32
    %c0_i32_0 = arith.constant 0 : i32
    return %c0_i32, %arg0 : i32, i32
  }
}

module attributes {stable_mosaic.version = 11 : i64} {
  func.func @_kmean_kernel(%arg0: i32, %arg1: memref<1x9x256xf32, #tpu.memory_space<vmem>>, %arg2: memref<1x9x1xf32, #tpu.memory_space<vmem>>) attributes {dimension_semantics = [#tpu.dimension_semantics<parallel>], iteration_bounds = array<i64: 2>, scalar_prefetch = 0 : i64, scratch_operands = 0 : i64, tpu.core_type = #tpu.core_type<tc>, window_params = [{transform_indices = @transform_0, window_bounds = array<i64: 1, 9, 256>}, {transform_indices = @transform_1, window_bounds = array<i64: 1, 9, 1>}]} {
    %c0 = arith.constant 0 : index
    %c0_0 = arith.constant 0 : index
    %c0_1 = arith.constant 0 : index
    %0 = vector.load %arg1[%c0, %c0_0, %c0_1] : memref<1x9x256xf32, #tpu.memory_space<vmem>>, vector<1x9x256xf32>
    %1 = vector.shape_cast %0 : vector<1x9x256xf32> to vector<9x256xf32>
    %cst = arith.constant dense<0.000000e+00> : vector<256xf32>
    %2 = vector.multi_reduction <add>, %1, %cst [0] : vector<9x256xf32> to vector<256xf32>
    %3 = vector.shape_cast %2 : vector<256xf32> to vector<1x256xf32>
    %cst_2 = arith.constant 9.000000e+00 : f32
    %4 = vector.broadcast %cst_2 : f32 to vector<1x256xf32>
    %5 = arith.divf %3, %4 : vector<1x256xf32>
    %6 = vector.broadcast %5 : vector<1x256xf32> to vector<9x256xf32>
    %7 = arith.subf %1, %6 : vector<9x256xf32>
    %cst_3 = arith.constant 0.111111112 : f32
    %8 = vector.broadcast %cst_3 : f32 to vector<9x256xf32>
    %9 = arith.addf %7, %8 : vector<9x256xf32>
    %cst_4 = arith.constant dense<0.000000e+00> : vector<9xf32>
    %10 = vector.multi_reduction <add>, %9, %cst_4 [1] : vector<9x256xf32> to vector<9xf32>
    %11 = vector.shape_cast %10 : vector<9xf32> to vector<9x1xf32>
    %cst_5 = arith.constant 2.560000e+02 : f32
    %12 = vector.broadcast %cst_5 : f32 to vector<9x1xf32>
    %13 = arith.divf %11, %12 : vector<9x1xf32>
    %c0_6 = arith.constant 0 : index
    %c0_7 = arith.constant 0 : index
    %c0_8 = arith.constant 0 : index
    %14 = vector.load %arg2[%c0_6, %c0_7, %c0_8] : memref<1x9x1xf32, #tpu.memory_space<vmem>>, vector<1x9x1xf32>
    %15 = vector.shape_cast %14 : vector<1x9x1xf32> to vector<9x1xf32>
    %16 = vector.shape_cast %13 : vector<9x1xf32> to vector<1x9x1xf32>
    tpu.vector_store %arg2[%c0_6, %c0_7, %c0_8], %16 {strides = array<i32>} : memref<1x9x1xf32, #tpu.memory_space<vmem>>, vector<1x9x1xf32>,
    return
  }
  func.func @transform_0(%arg0: i32) -> (i32, i32, i32) {
    %c0_i32 = arith.constant 0 : i32
    %c0_i32_0 = arith.constant 0 : i32
    %c0_i32_1 = arith.constant 0 : i32
    return %arg0, %c0_i32, %c0_i32_0 : i32, i32, i32
  }
  func.func @transform_1(%arg0: i32) -> (i32, i32, i32) {
    %c0_i32 = arith.constant 0 : i32
    %c0_i32_0 = arith.constant 0 : i32
    %c0_i32_1 = arith.constant 0 : i32
    return %arg0, %c0_i32, %c0_i32_0 : i32, i32, i32
  }
}

module attributes {stable_mosaic.version = 11 : i64} {
  func.func @_blur_kernel(%arg0: i32, %arg1: memref<2x9xf32, #tpu.memory_space<smem>>, %arg2: memref<1x3x18x18xf32, #tpu.memory_space<vmem>>, %arg3: memref<1x3x16x16xf32, #tpu.memory_space<vmem>>) attributes {dimension_semantics = [#tpu.dimension_semantics<parallel>], iteration_bounds = array<i64: 2>, scalar_prefetch = 0 : i64, scratch_operands = 0 : i64, tpu.core_type = #tpu.core_type<tc>, window_params = [{transform_indices = @transform_0, window_bounds = array<i64: 2, 9>}, {transform_indices = @transform_1, window_bounds = array<i64: 1, 3, 18, 18>}, {transform_indices = @transform_2, window_bounds = array<i64: 1, 3, 16, 16>}]} {
    %c0 = arith.constant 0 : index
    %c0_0 = arith.constant 0 : index
    %c0_1 = arith.constant 0 : index
    %c0_2 = arith.constant 0 : index
    %0 = vector.load %arg2[%c0, %c0_0, %c0_1, %c0_2] : memref<1x3x18x18xf32, #tpu.memory_space<vmem>>, vector<1x3x18x18xf32>
    %1 = vector.shape_cast %0 : vector<1x3x18x18xf32> to vector<3x18x18xf32>
    %cst = arith.constant 0.000000e+00 : f32
    %2 = vector.broadcast %cst : f32 to vector<3x16x16xf32>
    %3 = arith.index_cast %arg0 : i32 to index
    %c0_3 = arith.constant 0 : index
    %4 = memref.load %arg1[%3, %c0_3] : memref<2x9xf32, #tpu.memory_space<smem>>
    %5 = vector.extract_strided_slice %1 {offsets = [0, 0, 0], sizes = [3, 16, 16], strides = [1, 1, 1]} : vector<3x18x18xf32> to vector<3x16x16xf32>
    %6 = vector.broadcast %4 : f32 to vector<3x16x16xf32>
    %7 = arith.mulf %6, %5 : vector<3x16x16xf32>
    %8 = arith.addf %2, %7 : vector<3x16x16xf32>
    %9 = arith.index_cast %arg0 : i32 to index
    %c1 = arith.constant 1 : index
    %10 = memref.load %arg1[%9, %c1] : memref<2x9xf32, #tpu.memory_space<smem>>
    %11 = vector.extract_strided_slice %1 {offsets = [0, 0, 1], sizes = [3, 16, 16], strides = [1, 1, 1]} : vector<3x18x18xf32> to vector<3x16x16xf32>
    %12 = vector.broadcast %10 : f32 to vector<3x16x16xf32>
    %13 = arith.mulf %12, %11 : vector<3x16x16xf32>
    %14 = arith.addf %8, %13 : vector<3x16x16xf32>
    %15 = arith.index_cast %arg0 : i32 to index
    %c2 = arith.constant 2 : index
    %16 = memref.load %arg1[%15, %c2] : memref<2x9xf32, #tpu.memory_space<smem>>
    %17 = vector.extract_strided_slice %1 {offsets = [0, 0, 2], sizes = [3, 16, 16], strides = [1, 1, 1]} : vector<3x18x18xf32> to vector<3x16x16xf32>
    %18 = vector.broadcast %16 : f32 to vector<3x16x16xf32>
    %19 = arith.mulf %18, %17 : vector<3x16x16xf32>
    %20 = arith.addf %14, %19 : vector<3x16x16xf32>
    %21 = arith.index_cast %arg0 : i32 to index
    %c3 = arith.constant 3 : index
    %22 = memref.load %arg1[%21, %c3] : memref<2x9xf32, #tpu.memory_space<smem>>
    %23 = vector.extract_strided_slice %1 {offsets = [0, 1, 0], sizes = [3, 16, 16], strides = [1, 1, 1]} : vector<3x18x18xf32> to vector<3x16x16xf32>
    %24 = vector.broadcast %22 : f32 to vector<3x16x16xf32>
    %25 = arith.mulf %24, %23 : vector<3x16x16xf32>
    %26 = arith.addf %20, %25 : vector<3x16x16xf32>
    %27 = arith.index_cast %arg0 : i32 to index
    %c4 = arith.constant 4 : index
    %28 = memref.load %arg1[%27, %c4] : memref<2x9xf32, #tpu.memory_space<smem>>
    %29 = vector.extract_strided_slice %1 {offsets = [0, 1, 1], sizes = [3, 16, 16], strides = [1, 1, 1]} : vector<3x18x18xf32> to vector<3x16x16xf32>
    %30 = vector.broadcast %28 : f32 to vector<3x16x16xf32>
    %31 = arith.mulf %30, %29 : vector<3x16x16xf32>
    %32 = arith.addf %26, %31 : vector<3x16x16xf32>
    %33 = arith.index_cast %arg0 : i32 to index
    %c5 = arith.constant 5 : index
    %34 = memref.load %arg1[%33, %c5] : memref<2x9xf32, #tpu.memory_space<smem>>
    %35 = vector.extract_strided_slice %1 {offsets = [0, 1, 2], sizes = [3, 16, 16], strides = [1, 1, 1]} : vector<3x18x18xf32> to vector<3x16x16xf32>
    %36 = vector.broadcast %34 : f32 to vector<3x16x16xf32>
    %37 = arith.mulf %36, %35 : vector<3x16x16xf32>
    %38 = arith.addf %32, %37 : vector<3x16x16xf32>
    %39 = arith.index_cast %arg0 : i32 to index
    %c6 = arith.constant 6 : index
    %40 = memref.load %arg1[%39, %c6] : memref<2x9xf32, #tpu.memory_space<smem>>
    %41 = vector.extract_strided_slice %1 {offsets = [0, 2, 0], sizes = [3, 16, 16], strides = [1, 1, 1]} : vector<3x18x18xf32> to vector<3x16x16xf32>
    %42 = vector.broadcast %40 : f32 to vector<3x16x16xf32>
    %43 = arith.mulf %42, %41 : vector<3x16x16xf32>
    %44 = arith.addf %38, %43 : vector<3x16x16xf32>
    %45 = arith.index_cast %arg0 : i32 to index
    %c7 = arith.constant 7 : index
    %46 = memref.load %arg1[%45, %c7] : memref<2x9xf32, #tpu.memory_space<smem>>
    %47 = vector.extract_strided_slice %1 {offsets = [0, 2, 1], sizes = [3, 16, 16], strides = [1, 1, 1]} : vector<3x18x18xf32> to vector<3x16x16xf32>
    %48 = vector.broadcast %46 : f32 to vector<3x16x16xf32>
    %49 = arith.mulf %48, %47 : vector<3x16x16xf32>
    %50 = arith.addf %44, %49 : vector<3x16x16xf32>
    %51 = arith.index_cast %arg0 : i32 to index
    %c8 = arith.constant 8 : index
    %52 = memref.load %arg1[%51, %c8] : memref<2x9xf32, #tpu.memory_space<smem>>
    %53 = vector.extract_strided_slice %1 {offsets = [0, 2, 2], sizes = [3, 16, 16], strides = [1, 1, 1]} : vector<3x18x18xf32> to vector<3x16x16xf32>
    %54 = vector.broadcast %52 : f32 to vector<3x16x16xf32>
    %55 = arith.mulf %54, %53 : vector<3x16x16xf32>
    %56 = arith.addf %50, %55 : vector<3x16x16xf32>
    %c0_4 = arith.constant 0 : index
    %c0_5 = arith.constant 0 : index
    %c0_6 = arith.constant 0 : index
    %c0_7 = arith.constant 0 : index
    %57 = vector.load %arg3[%c0_4, %c0_5, %c0_6, %c0_7] : memref<1x3x16x16xf32, #tpu.memory_space<vmem>>, vector<1x3x16x16xf32>
    %58 = vector.shape_cast %57 : vector<1x3x16x16xf32> to vector<3x16x16xf32>
    %59 = vector.shape_cast %56 : vector<3x16x16xf32> to vector<1x3x16x16xf32>
    tpu.vector_store %arg3[%c0_4, %c0_5, %c0_6, %c0_7], %59 {strides = array<i32>} : memref<1x3x16x16xf32, #tpu.memory_space<vmem>>, vector<1x3x16x16xf32>,
    return
  }
  func.func @transform_0(%arg0: i32) -> (i32, i32) {
    %c0_i32 = arith.constant 0 : i32
    %c0_i32_0 = arith.constant 0 : i32
    %c0_i32_1 = arith.constant 0 : i32
    return %c0_i32, %c0_i32_0 : i32, i32
  }
  func.func @transform_1(%arg0: i32) -> (i32, i32, i32, i32) {
    %c0_i32 = arith.constant 0 : i32
    %c0_i32_0 = arith.constant 0 : i32
    %c0_i32_1 = arith.constant 0 : i32
    %c0_i32_2 = arith.constant 0 : i32
    return %arg0, %c0_i32, %c0_i32_0, %c0_i32_1 : i32, i32, i32, i32
  }
  func.func @transform_2(%arg0: i32) -> (i32, i32, i32, i32) {
    %c0_i32 = arith.constant 0 : i32
    %c0_i32_0 = arith.constant 0 : i32
    %c0_i32_1 = arith.constant 0 : i32
    %c0_i32_2 = arith.constant 0 : i32
    return %arg0, %c0_i32, %c0_i32_0, %c0_i32_1 : i32, i32, i32, i32
  }
}

</mosaic_0001>

<bundles_post_ra>
// kernel: kernel_extractor_forward.31
= control target key start
LH: loop header
LB: loop body
LE: loop exit
PB: predicated region body
PF: predicated region fallthrough
CT: control target
= control target key end

     0   :  { %v257_v1 = vmov 0   ;;  %vm110_vm0 = vcmask 1042432   ;;  %vm106_vm1 = vcmask 441344   ;;  %s338_s1 = inlined_call_operand.vmem [shape: bf16[54,512], index: 1, kind: input, shape index: {}]   ;;  %s339_s2 = inlined_call_operand.vmem [shape: f32[8,1], index: 2, kind: input, shape index: {}]   ;;  %s340_s0 = inlined_call_operand.vmem [shape: bf16[8,54], index: 0, kind: input, shape index: {}]   ;;  %s341_s3 = inlined_call_operand.vmem [shape: f32[8,512], index: 3, kind: output, shape index: {}]  }
   0x1   :  { %v235_v0 = vld [vmem:[%s338_s1 + $0x4] ss:$16 sps:$4 sm:$0xff]   ;;  %155 = vmatprep.mubr.bf16.mxu0 %v257_v1  ;;  %196 = vmatprep.mubr.bf16.mxu1 %v257_v1  ;;  %v237_v2 = vld [vmem:[%s338_s1 + $0xc] ss:$16 sps:$4 sm:$0xff]   ;;  %v239_v3 = vld [vmem:[%s338_s1] ss:$16 sps:$4 sm:$0xff]  }
   0x2   :  { %234 = vset.pattern.permute.xlu0 %v257_v1  ;;  %123 = vmatprep.subr.bf16.mxu0 %v235_v0  ;;  %v240_v4 = vld [vmem:[%s338_s1 + $0x8] ss:$16 sps:$4 sm:$0xff]   ;;  %v241_v5 = vld [vmem:[%s338_s1 + $0x24] ss:$16 sps:$4 sm:$0xff]   ;;  %v243_v6 = vld [vmem:[%s338_s1 + $0x2c] ss:$16 sps:$4 sm:$0xff]  }
   0x3   :  { %164 = vmatprep.subr.bf16.mxu1 %v237_v2  ;;  %124 = vmatpush1.bf16.msra.mxu0 %v239_v3  ;;  %v245_v7 = vld [vmem:[%s338_s1 + $0x20] ss:$16 sps:$4 sm:$0xff]   ;;  %v246_v8 = vld [vmem:[%s338_s1 + $0x28] ss:$16 sps:$4 sm:$0xff]   ;;  %v247_v9 = vld [vmem:[%s338_s1 + $0x44] ss:$16 sps:$4 sm:$0xff]  }
   0x4   :  { %165 = vmatpush1.bf16.msra.mxu1 %v240_v4  ;;  %125 = vmatprep.subr.bf16.mxu0 %v241_v5  ;;  %v249_v10 = vld [vmem:[%s338_s1 + $0x4c] ss:$16 sps:$4 sm:$0xff]   ;;  %v251_v11 = vld [vmem:[%s338_s1 + $0x40] ss:$16 sps:$4 sm:$0xff]   ;;  %v252_v12 = vld [vmem:[%s338_s1 + $0x48] ss:$16 sps:$4 sm:$0xff]  }
   0x5   :  { %166 = vmatprep.subr.bf16.mxu1 %v243_v6  ;;  %v28_v13 = vld [vmem:[%s338_s1 + $0x60] sm:$0x77]  ;;  %v29_v14 = vld [vmem:[%s338_s1 + $0x68] sm:$0x77] }
   0x6   :  { %v226_v15 = vcombine.high %v28_v13, %v28_v13  ;;  %v228_v16 = vcombine.high %v29_v14, %v29_v14  ;;  %v225_v17 = vcombine.low %v28_v13, %v28_v13  ;;  %v30_v18 = vld [vmem:[%s339_s2] sm:$0xff]  ;;  %v227_v19 = vcombine.low %v29_v14, %v29_v14 }
   0x7   :  { %126 = vmatpush1.bf16.msra.mxu0 %v245_v7  ;;  %33 = vperm.xlu0 %234, %v30_v18   ;;  %v15_v22 = vld [vmem:[%s340_s0] sm:$0xf] }
   0x8   :  { %167 = vmatpush1.bf16.msra.mxu1 %v246_v8  ;;  %127 = vmatprep.subr.bf16.mxu0 %v247_v9  ;;  %v112_v20 = vsel %vm110_vm0, %v225_v17, 0  ;;  %v118_v21 = vsel %vm110_vm0, %v227_v19, 0 }
   0x9   :  { %168 = vmatprep.subr.bf16.mxu1 %v249_v10 }
   0xb   :  { %128 = vmatpush1.bf16.msra.mxu0 %v251_v11 }
   0xc   :  { %169 = vmatpush1.bf16.msra.mxu1 %v252_v12  ;;  %229 = vmatprep.subr.msk.bf16.mxu0 %vm110_vm0, %v226_v15 }
   0xd   :  { %231 = vmatprep.subr.msk.bf16.mxu1 %vm110_vm0, %v228_v16 }
   0xf   :  { %130 = vmatpush1.bf16.msra.mxu0 %v112_v20 }
  0x10   :  { %171 = vmatpush1.bf16.msra.mxu1 %v118_v21 }
  0x12   :  { %230 = vmatmul.mubr.msk.bf16.vlgmr.msra.gmra.mrb[0].mxu0 %vm106_vm1, %v15_v22 }
  0x13   :  { %232 = vmatmul.mubr.msk.bf16.vlgmr.msra.gmra.mrb[0].mxu1 %vm106_vm1, %v15_v22 }
  0x86   :  { %v34_v23 = vpop.permute.xlu0 %33 }
  0xe5   :  { %v157_v24 = vpop.f32.mrb[0].mxu0 }
  0xe6   :  { %v198_v25 = vpop.f32.mrb[0].mxu1  ;;  %v158_v26 = vadd.f32 %v157_v24, %v34_v23  ;;  %v159_v28 = vpop.f32.mrb[1].mxu0 }
  0xe7   :  { %v199_v27 = vadd.f32 %v198_v25, %v34_v23  ;;  %v200_v29 = vpop.f32.mrb[1].mxu1  ;;  %v160_v30 = vadd.f32 %v159_v28, %v34_v23  ;;  %v161_v32 = vpop.f32.mrb[2].mxu0 }
  0xe8   :  { %v201_v31 = vadd.f32 %v200_v29, %v34_v23  ;;  %v202_v33 = vpop.f32.mrb[2].mxu1  ;;  %205 = vst [vmem:[%s341_s3] sm:$0xff] %v158_v26  ;;  %v162_v34 = vpop.f32.mrb[3].mxu0 }
  0xe9   :  { %207 = vst [vmem:[%s341_s3 + $0x10] sm:$0xff] %v199_v27  ;;  %v203_v35 = vpop.f32.mrb[3].mxu1  ;;  %206 = vst [vmem:[%s341_s3 + $0x8] sm:$0xff] %v160_v30 }
  0xea   :  { %208 = vst [vmem:[%s341_s3 + $0x18] sm:$0xff] %v201_v31 }

// kernel: kernel_extractor_forward.32
= control target key start
LH: loop header
LB: loop body
LE: loop exit
PB: predicated region body
PF: predicated region fallthrough
CT: control target
= control target key end

     0   :  { %v295_v1 = vmov 0   ;;  %vm134_vm0 = vcmask 1043456   ;;  %vm130_vm1 = vcmask 588800   ;;  %s388_s1 = inlined_call_operand.vmem [shape: bf16[72,512], index: 1, kind: input, shape index: {}]   ;;  %s389_s2 = inlined_call_operand.vmem [shape: f32[8,1], index: 2, kind: input, shape index: {}]   ;;  %s390_s0 = inlined_call_operand.vmem [shape: bf16[8,72], index: 0, kind: input, shape index: {}]   ;;  %s391_s3 = inlined_call_operand.vmem [shape: f32[8,512], index: 3, kind: output, shape index: {}]  }
   0x1   :  { %v267_v0 = vld [vmem:[%s388_s1 + $0x4] ss:$16 sps:$4 sm:$0xff]   ;;  %179 = vmatprep.mubr.bf16.mxu0 %v295_v1  ;;  %220 = vmatprep.mubr.bf16.mxu1 %v295_v1  ;;  %v269_v2 = vld [vmem:[%s388_s1 + $0xc] ss:$16 sps:$4 sm:$0xff]   ;;  %v271_v3 = vld [vmem:[%s388_s1] ss:$16 sps:$4 sm:$0xff]  }
   0x2   :  { %266 = vset.pattern.permute.xlu0 %v295_v1  ;;  %147 = vmatprep.subr.bf16.mxu0 %v267_v0  ;;  %v272_v4 = vld [vmem:[%s388_s1 + $0x8] ss:$16 sps:$4 sm:$0xff]   ;;  %v273_v5 = vld [vmem:[%s388_s1 + $0x24] ss:$16 sps:$4 sm:$0xff]   ;;  %v275_v6 = vld [vmem:[%s388_s1 + $0x2c] ss:$16 sps:$4 sm:$0xff]  }
   0x3   :  { %188 = vmatprep.subr.bf16.mxu1 %v269_v2  ;;  %148 = vmatpush1.bf16.msra.mxu0 %v271_v3  ;;  %v277_v7 = vld [vmem:[%s388_s1 + $0x20] ss:$16 sps:$4 sm:$0xff]   ;;  %v278_v8 = vld [vmem:[%s388_s1 + $0x28] ss:$16 sps:$4 sm:$0xff]   ;;  %v279_v9 = vld [vmem:[%s388_s1 + $0x44] ss:$16 sps:$4 sm:$0xff]  }
   0x4   :  { %189 = vmatpush1.bf16.msra.mxu1 %v272_v4  ;;  %149 = vmatprep.subr.bf16.mxu0 %v273_v5  ;;  %v281_v10 = vld [vmem:[%s388_s1 + $0x4c] ss:$16 sps:$4 sm:$0xff]   ;;  %v283_v11 = vld [vmem:[%s388_s1 + $0x40] ss:$16 sps:$4 sm:$0xff]   ;;  %v284_v12 = vld [vmem:[%s388_s1 + $0x48] ss:$16 sps:$4 sm:$0xff]  }
   0x5   :  { %190 = vmatprep.subr.bf16.mxu1 %v275_v6  ;;  %v285_v13 = vld [vmem:[%s388_s1 + $0x64] ss:$16 sps:$4 sm:$0xff]   ;;  %v287_v14 = vld [vmem:[%s388_s1 + $0x6c] ss:$16 sps:$4 sm:$0xff]   ;;  %v289_v18 = vld [vmem:[%s388_s1 + $0x60] ss:$16 sps:$4 sm:$0xff]  }
   0x6   :  { %v32_v15 = vld [vmem:[%s388_s1 + $0x80] sm:$0xff]  ;;  %v33_v16 = vld [vmem:[%s388_s1 + $0x88] sm:$0xff] }
   0x7   :  { %150 = vmatpush1.bf16.msra.mxu0 %v277_v7  ;;  %v34_v17 = vld [vmem:[%s389_s2] sm:$0xff]  ;;  %v290_v19 = vld [vmem:[%s388_s1 + $0x68] ss:$16 sps:$4 sm:$0xff]   ;;  %v258_v20 = vcombine.high %v32_v15, %v32_v15  ;;  %v260_v21 = vcombine.high %v33_v16, %v33_v16  ;;  %v257_v22 = vcombine.low %v32_v15, %v32_v15  ;;  %v259_v23 = vcombine.low %v33_v16, %v33_v16 }
   0x8   :  { %191 = vmatpush1.bf16.msra.mxu1 %v278_v8  ;;  %151 = vmatprep.subr.bf16.mxu0 %v279_v9  ;;  %v15_v26 = vld [vmem:[%s390_s0] sm:$0xf] }
   0x9   :  { %192 = vmatprep.subr.bf16.mxu1 %v281_v10  ;;  %37 = vperm.xlu0 %266, %v34_v17   ;;  %v136_v24 = vsel %vm134_vm0, %v257_v22, 0  ;;  %v142_v25 = vsel %vm134_vm0, %v259_v23, 0 }
   0xb   :  { %152 = vmatpush1.bf16.msra.mxu0 %v283_v11 }
   0xc   :  { %193 = vmatpush1.bf16.msra.mxu1 %v284_v12  ;;  %153 = vmatprep.subr.bf16.mxu0 %v285_v13 }
   0xd   :  { %194 = vmatprep.subr.bf16.mxu1 %v287_v14 }
   0xf   :  { %154 = vmatpush1.bf16.msra.mxu0 %v289_v18 }
  0x10   :  { %195 = vmatpush1.bf16.msra.mxu1 %v290_v19  ;;  %261 = vmatprep.subr.msk.bf16.mxu0 %vm134_vm0, %v258_v20 }
  0x11   :  { %263 = vmatprep.subr.msk.bf16.mxu1 %vm134_vm0, %v260_v21 }
  0x13   :  { %156 = vmatpush1.bf16.msra.mxu0 %v136_v24 }
  0x14   :  { %197 = vmatpush1.bf16.msra.mxu1 %v142_v25 }
  0x16   :  { %262 = vmatmul.mubr.msk.bf16.vlgmr.msra.gmra.mrb[0].mxu0 %vm130_vm1, %v15_v26 }
  0x17   :  { %264 = vmatmul.mubr.msk.bf16.vlgmr.msra.gmra.mrb[0].mxu1 %vm130_vm1, %v15_v26 }
  0x88   :  { %v38_v27 = vpop.permute.xlu0 %37 }
  0xe9   :  { %v181_v28 = vpop.f32.mrb[0].mxu0 }
  0xea   :  { %v222_v29 = vpop.f32.mrb[0].mxu1  ;;  %v182_v30 = vadd.f32 %v181_v28, %v38_v27  ;;  %v183_v32 = vpop.f32.mrb[1].mxu0 }
  0xeb   :  { %v223_v31 = vadd.f32 %v222_v29, %v38_v27  ;;  %v224_v33 = vpop.f32.mrb[1].mxu1  ;;  %v184_v34 = vadd.f32 %v183_v32, %v38_v27  ;;  %v185_v36 = vpop.f32.mrb[2].mxu0 }
  0xec   :  { %v225_v35 = vadd.f32 %v224_v33, %v38_v27  ;;  %v226_v37 = vpop.f32.mrb[2].mxu1  ;;  %v229_v38 = vmax.f32 %v182_v30, 0.0  ;;  %v186_v40 = vpop.f32.mrb[3].mxu0 }
  0xed   :  { %v231_v39 = vmax.f32 %v223_v31, 0.0  ;;  %v227_v41 = vpop.f32.mrb[3].mxu1  ;;  %v230_v42 = vmax.f32 %v184_v34, 0.0 }
  0xee   :  { %v232_v43 = vmax.f32 %v225_v35, 0.0  ;;  %233 = vst [vmem:[%s391_s3] sm:$0xff] %v229_v38 }
  0xef   :  { %235 = vst [vmem:[%s391_s3 + $0x10] sm:$0xff] %v231_v39  ;;  %234 = vst [vmem:[%s391_s3 + $0x8] sm:$0xff] %v230_v42 }
  0xf0   :  { %236 = vst [vmem:[%s391_s3 + $0x18] sm:$0xff] %v232_v43 }

// kernel: kernel_extractor_forward.33
= control target key start
LH: loop header
LB: loop body
LE: loop exit
PB: predicated region body
PF: predicated region fallthrough
CT: control target
= control target key end

     0   :  { %v302_v1 = vmov 0   ;;  %vm137_vm0 = vcmask 1043456   ;;  %vm133_vm1 = vcmask 588800   ;;  %s412_s1 = inlined_call_operand.vmem [shape: bf16[72,512], index: 1, kind: input, shape index: {}]   ;;  %s413_s2 = inlined_call_operand.vmem [shape: f32[8,1], index: 2, kind: input, shape index: {}]   ;;  %s414_s0 = inlined_call_operand.vmem [shape: bf16[8,72], index: 0, kind: input, shape index: {}]   ;;  %s415_s3 = inlined_call_operand.vmem [shape: f32[8,512], index: 3, kind: input, shape index: {}]   ;;  %s416_s4 = inlined_call_operand.vmem [shape: f32[8,512], index: 4, kind: output, shape index: {}]  }
   0x1   :  { %v274_v0 = vld [vmem:[%s412_s1 + $0x4] ss:$16 sps:$4 sm:$0xff]   ;;  %182 = vmatprep.mubr.bf16.mxu0 %v302_v1  ;;  %223 = vmatprep.mubr.bf16.mxu1 %v302_v1  ;;  %v276_v2 = vld [vmem:[%s412_s1 + $0xc] ss:$16 sps:$4 sm:$0xff]   ;;  %v278_v3 = vld [vmem:[%s412_s1] ss:$16 sps:$4 sm:$0xff]  }
   0x2   :  { %273 = vset.pattern.permute.xlu0 %v302_v1  ;;  %150 = vmatprep.subr.bf16.mxu0 %v274_v0  ;;  %v279_v4 = vld [vmem:[%s412_s1 + $0x8] ss:$16 sps:$4 sm:$0xff]   ;;  %v280_v5 = vld [vmem:[%s412_s1 + $0x24] ss:$16 sps:$4 sm:$0xff]   ;;  %v282_v6 = vld [vmem:[%s412_s1 + $0x2c] ss:$16 sps:$4 sm:$0xff]  }
   0x3   :  { %191 = vmatprep.subr.bf16.mxu1 %v276_v2  ;;  %151 = vmatpush1.bf16.msra.mxu0 %v278_v3  ;;  %v284_v7 = vld [vmem:[%s412_s1 + $0x20] ss:$16 sps:$4 sm:$0xff]   ;;  %v285_v8 = vld [vmem:[%s412_s1 + $0x28] ss:$16 sps:$4 sm:$0xff]   ;;  %v286_v9 = vld [vmem:[%s412_s1 + $0x44] ss:$16 sps:$4 sm:$0xff]  }
   0x4   :  { %192 = vmatpush1.bf16.msra.mxu1 %v279_v4  ;;  %152 = vmatprep.subr.bf16.mxu0 %v280_v5  ;;  %v288_v10 = vld [vmem:[%s412_s1 + $0x4c] ss:$16 sps:$4 sm:$0xff]   ;;  %v290_v11 = vld [vmem:[%s412_s1 + $0x40] ss:$16 sps:$4 sm:$0xff]   ;;  %v291_v12 = vld [vmem:[%s412_s1 + $0x48] ss:$16 sps:$4 sm:$0xff]  }
   0x5   :  { %193 = vmatprep.subr.bf16.mxu1 %v282_v6  ;;  %v292_v13 = vld [vmem:[%s412_s1 + $0x64] ss:$16 sps:$4 sm:$0xff]   ;;  %v294_v14 = vld [vmem:[%s412_s1 + $0x6c] ss:$16 sps:$4 sm:$0xff]   ;;  %v296_v18 = vld [vmem:[%s412_s1 + $0x60] ss:$16 sps:$4 sm:$0xff]  }
   0x6   :  { %v35_v15 = vld [vmem:[%s412_s1 + $0x80] sm:$0xff]  ;;  %v36_v16 = vld [vmem:[%s412_s1 + $0x88] sm:$0xff]  ;;  %v234_v31 = vld [vmem:[%s415_s3 + $0x10] sm:$0xff] }
   0x7   :  { %153 = vmatpush1.bf16.msra.mxu0 %v284_v7  ;;  %v37_v17 = vld [vmem:[%s413_s2] sm:$0xff]  ;;  %v297_v19 = vld [vmem:[%s412_s1 + $0x68] ss:$16 sps:$4 sm:$0xff]   ;;  %v265_v20 = vcombine.high %v35_v15, %v35_v15  ;;  %v267_v21 = vcombine.high %v36_v16, %v36_v16  ;;  %v264_v22 = vcombine.low %v35_v15, %v35_v15  ;;  %v266_v23 = vcombine.low %v36_v16, %v36_v16 }
   0x8   :  { %194 = vmatpush1.bf16.msra.mxu1 %v285_v8  ;;  %154 = vmatprep.subr.bf16.mxu0 %v286_v9  ;;  %v18_v26 = vld [vmem:[%s414_s0] sm:$0xf]  ;;  %v233_v35 = vld [vmem:[%s415_s3 + $0x8] sm:$0xff]  ;;  %v235_v37 = vld [vmem:[%s415_s3 + $0x18] sm:$0xff] }
   0x9   :  { %195 = vmatprep.subr.bf16.mxu1 %v288_v10  ;;  %40 = vperm.xlu0 %273, %v37_v17   ;;  %v139_v24 = vsel %vm137_vm0, %v264_v22, 0  ;;  %v145_v25 = vsel %vm137_vm0, %v266_v23, 0  ;;  %v232_v29 = vld [vmem:[%s415_s3] sm:$0xff] }
   0xb   :  { %155 = vmatpush1.bf16.msra.mxu0 %v290_v11 }
   0xc   :  { %196 = vmatpush1.bf16.msra.mxu1 %v291_v12  ;;  %156 = vmatprep.subr.bf16.mxu0 %v292_v13 }
   0xd   :  { %197 = vmatprep.subr.bf16.mxu1 %v294_v14 }
   0xf   :  { %157 = vmatpush1.bf16.msra.mxu0 %v296_v18 }
  0x10   :  { %198 = vmatpush1.bf16.msra.mxu1 %v297_v19  ;;  %268 = vmatprep.subr.msk.bf16.mxu0 %vm137_vm0, %v265_v20 }
  0x11   :  { %270 = vmatprep.subr.msk.bf16.mxu1 %vm137_vm0, %v267_v21 }
  0x13   :  { %159 = vmatpush1.bf16.msra.mxu0 %v139_v24 }
  0x14   :  { %200 = vmatpush1.bf16.msra.mxu1 %v145_v25 }
  0x16   :  { %269 = vmatmul.mubr.msk.bf16.vlgmr.msra.gmra.mrb[0].mxu0 %vm133_vm1, %v18_v26 }
  0x17   :  { %271 = vmatmul.mubr.msk.bf16.vlgmr.msra.gmra.mrb[0].mxu1 %vm133_vm1, %v18_v26 }
  0x88   :  { %v41_v27 = vpop.permute.xlu0 %40 }
  0xe9   :  { %v184_v28 = vpop.f32.mrb[0].mxu0 }
  0xea   :  { %v225_v30 = vpop.f32.mrb[0].mxu1  ;;  %v185_v32 = vadd.f32 %v184_v28, %v41_v27  ;;  %v186_v34 = vpop.f32.mrb[1].mxu0 }
  0xeb   :  { %v226_v33 = vadd.f32 %v225_v30, %v41_v27  ;;  %v227_v36 = vpop.f32.mrb[1].mxu1  ;;  %v187_v38 = vadd.f32 %v186_v34, %v41_v27  ;;  %v188_v40 = vpop.f32.mrb[2].mxu0 }
  0xec   :  { %v228_v39 = vadd.f32 %v227_v36, %v41_v27  ;;  %v229_v41 = vpop.f32.mrb[2].mxu1  ;;  %v236_v42 = vadd.f32 %v232_v29, %v185_v32  ;;  %v189_v44 = vpop.f32.mrb[3].mxu0 }
  0xed   :  { %v238_v43 = vadd.f32 %v234_v31, %v226_v33  ;;  %v230_v45 = vpop.f32.mrb[3].mxu1  ;;  %v237_v46 = vadd.f32 %v233_v35, %v187_v38 }
  0xee   :  { %v239_v47 = vadd.f32 %v235_v37, %v228_v39  ;;  %240 = vst [vmem:[%s416_s4] sm:$0xff] %v236_v42 }
  0xef   :  { %242 = vst [vmem:[%s416_s4 + $0x10] sm:$0xff] %v238_v43  ;;  %241 = vst [vmem:[%s416_s4 + $0x8] sm:$0xff] %v237_v46 }
  0xf0   :  { %243 = vst [vmem:[%s416_s4 + $0x18] sm:$0xff] %v239_v47 }

// kernel: kernel_extractor_forward.35
= control target key start
LH: loop header
LB: loop body
LE: loop exit
PB: predicated region body
PF: predicated region fallthrough
CT: control target
= control target key end

     0   :  { %v306_v1 = vmov 0   ;;  %vm137_vm0 = vcmask 1043456   ;;  %vm133_vm1 = vcmask 588800   ;;  %s416_s1 = inlined_call_operand.vmem [shape: bf16[72,512], index: 1, kind: input, shape index: {}]   ;;  %s417_s2 = inlined_call_operand.vmem [shape: f32[8,1], index: 2, kind: input, shape index: {}]   ;;  %s418_s0 = inlined_call_operand.vmem [shape: bf16[8,72], index: 0, kind: input, shape index: {}]   ;;  %s419_s3 = inlined_call_operand.vmem [shape: f32[8,512], index: 3, kind: input, shape index: {}]   ;;  %s420_s4 = inlined_call_operand.vmem [shape: f32[8,512], index: 4, kind: output, shape index: {}]  }
   0x1   :  { %v278_v0 = vld [vmem:[%s416_s1 + $0x4] ss:$16 sps:$4 sm:$0xff]   ;;  %182 = vmatprep.mubr.bf16.mxu0 %v306_v1  ;;  %223 = vmatprep.mubr.bf16.mxu1 %v306_v1  ;;  %v280_v2 = vld [vmem:[%s416_s1 + $0xc] ss:$16 sps:$4 sm:$0xff]   ;;  %v282_v3 = vld [vmem:[%s416_s1] ss:$16 sps:$4 sm:$0xff]  }
   0x2   :  { %277 = vset.pattern.permute.xlu0 %v306_v1  ;;  %150 = vmatprep.subr.bf16.mxu0 %v278_v0  ;;  %v283_v4 = vld [vmem:[%s416_s1 + $0x8] ss:$16 sps:$4 sm:$0xff]   ;;  %v284_v5 = vld [vmem:[%s416_s1 + $0x24] ss:$16 sps:$4 sm:$0xff]   ;;  %v286_v6 = vld [vmem:[%s416_s1 + $0x2c] ss:$16 sps:$4 sm:$0xff]  }
   0x3   :  { %191 = vmatprep.subr.bf16.mxu1 %v280_v2  ;;  %151 = vmatpush1.bf16.msra.mxu0 %v282_v3  ;;  %v288_v7 = vld [vmem:[%s416_s1 + $0x20] ss:$16 sps:$4 sm:$0xff]   ;;  %v289_v8 = vld [vmem:[%s416_s1 + $0x28] ss:$16 sps:$4 sm:$0xff]   ;;  %v290_v9 = vld [vmem:[%s416_s1 + $0x44] ss:$16 sps:$4 sm:$0xff]  }
   0x4   :  { %192 = vmatpush1.bf16.msra.mxu1 %v283_v4  ;;  %152 = vmatprep.subr.bf16.mxu0 %v284_v5  ;;  %v292_v10 = vld [vmem:[%s416_s1 + $0x4c] ss:$16 sps:$4 sm:$0xff]   ;;  %v294_v11 = vld [vmem:[%s416_s1 + $0x40] ss:$16 sps:$4 sm:$0xff]   ;;  %v295_v12 = vld [vmem:[%s416_s1 + $0x48] ss:$16 sps:$4 sm:$0xff]  }
   0x5   :  { %193 = vmatprep.subr.bf16.mxu1 %v286_v6  ;;  %v296_v13 = vld [vmem:[%s416_s1 + $0x64] ss:$16 sps:$4 sm:$0xff]   ;;  %v298_v14 = vld [vmem:[%s416_s1 + $0x6c] ss:$16 sps:$4 sm:$0xff]   ;;  %v300_v18 = vld [vmem:[%s416_s1 + $0x60] ss:$16 sps:$4 sm:$0xff]  }
   0x6   :  { %v35_v15 = vld [vmem:[%s416_s1 + $0x80] sm:$0xff]  ;;  %v36_v16 = vld [vmem:[%s416_s1 + $0x88] sm:$0xff]  ;;  %v234_v31 = vld [vmem:[%s419_s3 + $0x10] sm:$0xff] }
   0x7   :  { %153 = vmatpush1.bf16.msra.mxu0 %v288_v7  ;;  %v37_v17 = vld [vmem:[%s417_s2] sm:$0xff]  ;;  %v301_v19 = vld [vmem:[%s416_s1 + $0x68] ss:$16 sps:$4 sm:$0xff]   ;;  %v269_v20 = vcombine.high %v35_v15, %v35_v15  ;;  %v271_v21 = vcombine.high %v36_v16, %v36_v16  ;;  %v268_v22 = vcombine.low %v35_v15, %v35_v15  ;;  %v270_v23 = vcombine.low %v36_v16, %v36_v16 }
   0x8   :  { %194 = vmatpush1.bf16.msra.mxu1 %v289_v8  ;;  %154 = vmatprep.subr.bf16.mxu0 %v290_v9  ;;  %v18_v26 = vld [vmem:[%s418_s0] sm:$0xf]  ;;  %v233_v35 = vld [vmem:[%s419_s3 + $0x8] sm:$0xff]  ;;  %v235_v37 = vld [vmem:[%s419_s3 + $0x18] sm:$0xff] }
   0x9   :  { %195 = vmatprep.subr.bf16.mxu1 %v292_v10  ;;  %40 = vperm.xlu0 %277, %v37_v17   ;;  %v139_v24 = vsel %vm137_vm0, %v268_v22, 0  ;;  %v145_v25 = vsel %vm137_vm0, %v270_v23, 0  ;;  %v232_v29 = vld [vmem:[%s419_s3] sm:$0xff] }
   0xb   :  { %155 = vmatpush1.bf16.msra.mxu0 %v294_v11 }
   0xc   :  { %196 = vmatpush1.bf16.msra.mxu1 %v295_v12  ;;  %156 = vmatprep.subr.bf16.mxu0 %v296_v13 }
   0xd   :  { %197 = vmatprep.subr.bf16.mxu1 %v298_v14 }
   0xf   :  { %157 = vmatpush1.bf16.msra.mxu0 %v300_v18 }
  0x10   :  { %198 = vmatpush1.bf16.msra.mxu1 %v301_v19  ;;  %272 = vmatprep.subr.msk.bf16.mxu0 %vm137_vm0, %v269_v20 }
  0x11   :  { %274 = vmatprep.subr.msk.bf16.mxu1 %vm137_vm0, %v271_v21 }
  0x13   :  { %159 = vmatpush1.bf16.msra.mxu0 %v139_v24 }
  0x14   :  { %200 = vmatpush1.bf16.msra.mxu1 %v145_v25 }
  0x16   :  { %273 = vmatmul.mubr.msk.bf16.vlgmr.msra.gmra.mrb[0].mxu0 %vm133_vm1, %v18_v26 }
  0x17   :  { %275 = vmatmul.mubr.msk.bf16.vlgmr.msra.gmra.mrb[0].mxu1 %vm133_vm1, %v18_v26 }
  0x88   :  { %v41_v27 = vpop.permute.xlu0 %40 }
  0xe9   :  { %v184_v28 = vpop.f32.mrb[0].mxu0 }
  0xea   :  { %v225_v30 = vpop.f32.mrb[0].mxu1  ;;  %v185_v32 = vadd.f32 %v184_v28, %v41_v27  ;;  %v186_v34 = vpop.f32.mrb[1].mxu0 }
  0xeb   :  { %v226_v33 = vadd.f32 %v225_v30, %v41_v27  ;;  %v227_v36 = vpop.f32.mrb[1].mxu1  ;;  %v187_v38 = vadd.f32 %v186_v34, %v41_v27  ;;  %v188_v40 = vpop.f32.mrb[2].mxu0 }
  0xec   :  { %v228_v39 = vadd.f32 %v227_v36, %v41_v27  ;;  %v229_v41 = vpop.f32.mrb[2].mxu1  ;;  %v236_v42 = vadd.f32 %v232_v29, %v185_v32  ;;  %v189_v44 = vpop.f32.mrb[3].mxu0 }
  0xed   :  { %v238_v43 = vadd.f32 %v234_v31, %v226_v33  ;;  %v230_v45 = vpop.f32.mrb[3].mxu1  ;;  %v237_v46 = vadd.f32 %v233_v35, %v187_v38 }
  0xee   :  { %v239_v47 = vadd.f32 %v235_v37, %v228_v39  ;;  %v240_v48 = vmax.f32 %v236_v42, 0.0 }
  0xef   :  { %v242_v49 = vmax.f32 %v238_v43, 0.0  ;;  %v241_v50 = vmax.f32 %v237_v46, 0.0 }
  0xf0   :  { %v243_v51 = vmax.f32 %v239_v47, 0.0  ;;  %244 = vst [vmem:[%s420_s4] sm:$0xff] %v240_v48 }
  0xf1   :  { %246 = vst [vmem:[%s420_s4 + $0x10] sm:$0xff] %v242_v49  ;;  %245 = vst [vmem:[%s420_s4 + $0x8] sm:$0xff] %v241_v50 }
  0xf2   :  { %247 = vst [vmem:[%s420_s4 + $0x18] sm:$0xff] %v243_v51 }

// kernel: kernel_extractor_forward.36
= control target key start
LH: loop header
LB: loop body
LE: loop exit
PB: predicated region body
PF: predicated region fallthrough
CT: control target
= control target key end

     0   :  { %v162_v0 = vmov 0.0   ;;  %vm163_vm0 = vmmov 0   ;;  %v164_v2 = vmov 0   ;;  %vm74_vm1 = vcmask 1043456   ;;  %s215_s1 = inlined_call_operand.vmem [shape: bf16[72,128], index: 1, kind: input, shape index: {}]   ;;  %s216_s2 = inlined_call_operand.vmem [shape: f32[16,1], index: 2, kind: input, shape index: {}]   ;;  %s217_s0 = inlined_call_operand.vmem [shape: bf16[16,72], index: 0, kind: input, shape index: {}]   ;;  %s218_s3 = inlined_call_operand.vmem [shape: f32[16,128], index: 3, kind: output, shape index: {}]  }
   0x1   :  { %138 = vmatprep.subr.bf16.mxu0 %v162_v0  ;;  %v156_v1 = vld [vmem:[%s215_s1] sm:$0xff]   ;;  %148 = vmatprep.mubr.msk.bf16.mxu0 %vm163_vm0, %v162_v0  ;;  %v157_v3 = vld [vmem:[%s215_s1 + $0x8] sm:$0xff]   ;;  %v158_v5 = vld [vmem:[%s215_s1 + $0x10] sm:$0xff]   ;;  %vm70_vm2 = vcmask 588800  }
   0x2   :  { %155 = vset.pattern.permute.xlu0 %v164_v2  ;;  %139 = vmatpush3.bf16.msra.mxu0 %v156_v1  ;;  %v26_v4 = vld [vmem:[%s216_s2] sm:$0xff]  ;;  %v27_v6 = vld [vmem:[%s216_s2 + $0x8] sm:$0xff]  ;;  %v159_v7 = vld [vmem:[%s215_s1 + $0x18] sm:$0xff]  }
   0x3   :  { %140 = vmatprep.subr.bf16.mxu0 %v162_v0  ;;  %30 = vperm.xlu0 %155, %v26_v4   ;;  %v160_v8 = vld [vmem:[%s215_s1 + $0x20] ss:$0 sps:$4 sm:$0xff]  }
   0x4   :  { %v76_v9 = vsel %vm74_vm1, %v160_v8, 0  ;;  %v161_v10 = vld [vmem:[%s217_s0] sm:$0xff]  }
   0x6   :  { %141 = vmatpush3.bf16.msra.mxu0 %v157_v3 }
   0x7   :  { %142 = vmatprep.subr.bf16.mxu0 %v162_v0  ;;  %35 = vperm.xlu0 %155, %v27_v6  }
   0xa   :  { %143 = vmatpush3.bf16.msra.mxu0 %v158_v5 }
   0xb   :  { %144 = vmatprep.subr.bf16.mxu0 %v162_v0 }
   0xe   :  { %145 = vmatpush3.bf16.msra.mxu0 %v159_v7 }
   0xf   :  { %146 = vmatprep.subr.bf16.mxu0 %v162_v0 }
  0x12   :  { %147 = vmatpush3.bf16.msra.mxu0 %v76_v9 }
  0x15   :  { %149 = vmatmul.mubr.msk.bf16.vlgmr.msra.gmra.mrb[0].mxu0 %vm70_vm2, %v161_v10 }
  0x82   :  { %v31_v11 = vpop.permute.xlu0 %30 }
  0x86   :  { %v36_v15 = vpop.permute.xlu0 %35 }
  0xe8   :  { %v112_v12 = vpop.f32.mrb[0].mxu0 }
  0xe9   :  { %v113_v13 = vadd.f32 %v112_v12, %v31_v11  ;;  %v150_v14 = vpop.f32.mrb[1].mxu0 }
  0xea   :  { %v115_v16 = vpop.f32.mrb[2].mxu0 }
  0xeb   :  { %119 = vst [vmem:[%s218_s3] sm:$0xff] %v113_v13  ;;  %v116_v17 = vadd.f32 %v115_v16, %v36_v15  ;;  %v151_v18 = vpop.f32.mrb[3].mxu0 }
  0xed   :  { %120 = vst [vmem:[%s218_s3 + $0x8] sm:$0xff] %v116_v17 }

// kernel: kernel_extractor_forward.37
= control target key start
LH: loop header
LB: loop body
LE: loop exit
PB: predicated region body
PF: predicated region fallthrough
CT: control target
= control target key end

     0   :  { %v189_v0 = vmov 0   ;;  %vm110_vm0 = vcmask 130048   ;;  %s255_s1 = inlined_call_operand.vmem [shape: bf16[144,128], index: 1, kind: input, shape index: {}]   ;;  %s256_s0 = inlined_call_operand.vmem [shape: bf16[16,144], index: 0, kind: input, shape index: {}]   ;;  %s257_s2 = inlined_call_operand.vmem [shape: f32[16,1], index: 2, kind: input, shape index: {}]   ;;  %s258_s3 = inlined_call_operand.vmem [shape: f32[16,128], index: 3, kind: output, shape index: {}]  }
   0x1   :  { %114 = vmatprep.subr.bf16.mxu0 %v189_v0  ;;  %v177_v1 = vld [vmem:[%s255_s1] sm:$0xff]   ;;  %176 = vset.pattern.permute.xlu0 %v189_v0  ;;  %v178_v2 = vld [vmem:[%s255_s1 + $0x8] sm:$0xff]   ;;  %v179_v3 = vld [vmem:[%s255_s1 + $0x10] sm:$0xff]  }
   0x2   :  { %115 = vmatpush1.bf16.msra.mxu0 %v177_v1  ;;  %v180_v4 = vld [vmem:[%s255_s1 + $0x18] sm:$0xff]   ;;  %v188_v5 = vld [vmem:[%s256_s0 + $0x4] ss:$8 sps:$4 sm:$0xff]   ;;  %v183_v10 = vld [vmem:[%s255_s1 + $0x30] sm:$0xff]  }
   0x3   :  { %116 = vmatprep.subr.bf16.mxu0 %v189_v0  ;;  %v35_v6 = vld [vmem:[%s257_s2] sm:$0xff]  ;;  %174 = vmatprep.mubr.msk.bf16.mxu0 %vm110_vm0, %v188_v5  ;;  %v36_v7 = vld [vmem:[%s257_s2 + $0x8] sm:$0xff]  ;;  %v184_v11 = vld [vmem:[%s255_s1 + $0x38] sm:$0xff]  }
   0x4   :  { %39 = vperm.xlu0 %176, %v35_v6   ;;  %v181_v8 = vld [vmem:[%s255_s1 + $0x20] sm:$0xff]   ;;  %v182_v9 = vld [vmem:[%s255_s1 + $0x28] sm:$0xff]  }
   0x5   :  { %v185_v12 = vld [vmem:[%s255_s1 + $0x40] sm:$0xff]  }
   0x6   :  { %117 = vmatpush1.bf16.msra.mxu0 %v178_v2  ;;  %v186_v13 = vld [vmem:[%s256_s0] ss:$8 sps:$4 sm:$0xff]  }
   0x7   :  { %118 = vmatprep.subr.bf16.mxu0 %v189_v0 }
   0x8   :  { %44 = vperm.xlu0 %176, %v36_v7  }
   0xa   :  { %119 = vmatpush1.bf16.msra.mxu0 %v179_v3 }
   0xb   :  { %120 = vmatprep.subr.bf16.mxu0 %v189_v0 }
   0xe   :  { %121 = vmatpush1.bf16.msra.mxu0 %v180_v4 }
   0xf   :  { %122 = vmatprep.subr.bf16.mxu0 %v189_v0 }
  0x12   :  { %123 = vmatpush1.bf16.msra.mxu0 %v181_v8 }
  0x13   :  { %124 = vmatprep.subr.bf16.mxu0 %v189_v0 }
  0x16   :  { %125 = vmatpush1.bf16.msra.mxu0 %v182_v9 }
  0x17   :  { %126 = vmatprep.subr.bf16.mxu0 %v189_v0 }
  0x1a   :  { %127 = vmatpush1.bf16.msra.mxu0 %v183_v10 }
  0x1b   :  { %128 = vmatprep.subr.bf16.mxu0 %v189_v0 }
  0x1e   :  { %129 = vmatpush1.bf16.msra.mxu0 %v184_v11 }
  0x1f   :  { %130 = vmatprep.subr.bf16.mxu0 %v189_v0 }
  0x22   :  { %131 = vmatpush1.bf16.msra.mxu0 %v185_v12 }
  0x25   :  { %147 = vmatmul.mubr.bf16.vlgmr.msra.gmra.mrb[0].mxu0 %v186_v13 }
  0x83   :  { %v40_v14 = vpop.permute.xlu0 %39 }
  0x87   :  { %v45_v18 = vpop.permute.xlu0 %44 }
  0xf8   :  { %v148_v15 = vpop.f32.mrb[0].mxu0 }
  0xf9   :  { %v149_v16 = vadd.f32 %v148_v15, %v40_v14  ;;  %v150_v17 = vpop.f32.mrb[1].mxu0 }
  0xfa   :  { %v151_v19 = vpop.f32.mrb[2].mxu0 }
  0xfb   :  { %v155_v20 = vmax.f32 %v149_v16, 0.0  ;;  %v152_v21 = vadd.f32 %v151_v19, %v45_v18  ;;  %v153_v22 = vpop.f32.mrb[3].mxu0 }
  0xfd   :  { %157 = vst [vmem:[%s258_s3] sm:$0xff] %v155_v20  ;;  %v156_v23 = vmax.f32 %v152_v21, 0.0 }
  0xff   :  { %158 = vst [vmem:[%s258_s3 + $0x8] sm:$0xff] %v156_v23 }

// kernel: kernel_extractor_forward.38
= control target key start
LH: loop header
LB: loop body
LE: loop exit
PB: predicated region body
PF: predicated region fallthrough
CT: control target
= control target key end

     0   :  { %v194_v0 = vmov 0   ;;  %vm113_vm0 = vcmask 130048   ;;  %s271_s1 = inlined_call_operand.vmem [shape: bf16[144,128], index: 1, kind: input, shape index: {}]   ;;  %s272_s0 = inlined_call_operand.vmem [shape: bf16[16,144], index: 0, kind: input, shape index: {}]   ;;  %s273_s2 = inlined_call_operand.vmem [shape: f32[16,1], index: 2, kind: input, shape index: {}]   ;;  %s274_s3 = inlined_call_operand.vmem [shape: f32[16,128], index: 3, kind: input, shape index: {}]   ;;  %s275_s4 = inlined_call_operand.vmem [shape: f32[16,128], index: 4, kind: output, shape index: {}]  }
   0x1   :  { %117 = vmatprep.subr.bf16.mxu0 %v194_v0  ;;  %v182_v1 = vld [vmem:[%s271_s1] sm:$0xff]   ;;  %181 = vset.pattern.permute.xlu0 %v194_v0  ;;  %v183_v2 = vld [vmem:[%s271_s1 + $0x8] sm:$0xff]   ;;  %v184_v3 = vld [vmem:[%s271_s1 + $0x10] sm:$0xff]  }
   0x2   :  { %118 = vmatpush1.bf16.msra.mxu0 %v182_v1  ;;  %v185_v4 = vld [vmem:[%s271_s1 + $0x18] sm:$0xff]   ;;  %v193_v5 = vld [vmem:[%s272_s0 + $0x4] ss:$8 sps:$4 sm:$0xff]   ;;  %v188_v10 = vld [vmem:[%s271_s1 + $0x30] sm:$0xff]  }
   0x3   :  { %119 = vmatprep.subr.bf16.mxu0 %v194_v0  ;;  %v38_v6 = vld [vmem:[%s273_s2] sm:$0xff]  ;;  %179 = vmatprep.mubr.msk.bf16.mxu0 %vm113_vm0, %v193_v5  ;;  %v39_v7 = vld [vmem:[%s273_s2 + $0x8] sm:$0xff]  ;;  %v189_v11 = vld [vmem:[%s271_s1 + $0x38] sm:$0xff]  }
   0x4   :  { %42 = vperm.xlu0 %181, %v38_v6   ;;  %v186_v8 = vld [vmem:[%s271_s1 + $0x20] sm:$0xff]   ;;  %v187_v9 = vld [vmem:[%s271_s1 + $0x28] sm:$0xff]  }
   0x5   :  { %v190_v12 = vld [vmem:[%s271_s1 + $0x40] sm:$0xff]   ;;  %v159_v21 = vld [vmem:[%s274_s3 + $0x8] sm:$0xff] }
   0x6   :  { %120 = vmatpush1.bf16.msra.mxu0 %v183_v2  ;;  %v191_v13 = vld [vmem:[%s272_s0] ss:$8 sps:$4 sm:$0xff]  }
   0x7   :  { %121 = vmatprep.subr.bf16.mxu0 %v194_v0  ;;  %v158_v16 = vld [vmem:[%s274_s3] sm:$0xff] }
   0x8   :  { %47 = vperm.xlu0 %181, %v39_v7  }
   0xa   :  { %122 = vmatpush1.bf16.msra.mxu0 %v184_v3 }
   0xb   :  { %123 = vmatprep.subr.bf16.mxu0 %v194_v0 }
   0xe   :  { %124 = vmatpush1.bf16.msra.mxu0 %v185_v4 }
   0xf   :  { %125 = vmatprep.subr.bf16.mxu0 %v194_v0 }
  0x12   :  { %126 = vmatpush1.bf16.msra.mxu0 %v186_v8 }
  0x13   :  { %127 = vmatprep.subr.bf16.mxu0 %v194_v0 }
  0x16   :  { %128 = vmatpush1.bf16.msra.mxu0 %v187_v9 }
  0x17   :  { %129 = vmatprep.subr.bf16.mxu0 %v194_v0 }
  0x1a   :  { %130 = vmatpush1.bf16.msra.mxu0 %v188_v10 }
  0x1b   :  { %131 = vmatprep.subr.bf16.mxu0 %v194_v0 }
  0x1e   :  { %132 = vmatpush1.bf16.msra.mxu0 %v189_v11 }
  0x1f   :  { %133 = vmatprep.subr.bf16.mxu0 %v194_v0 }
  0x22   :  { %134 = vmatpush1.bf16.msra.mxu0 %v190_v12 }
  0x25   :  { %150 = vmatmul.mubr.bf16.vlgmr.msra.gmra.mrb[0].mxu0 %v191_v13 }
  0x83   :  { %v43_v14 = vpop.permute.xlu0 %42 }
  0x87   :  { %v48_v19 = vpop.permute.xlu0 %47 }
  0xf8   :  { %v151_v15 = vpop.f32.mrb[0].mxu0 }
  0xf9   :  { %v152_v17 = vadd.f32 %v151_v15, %v43_v14  ;;  %v153_v18 = vpop.f32.mrb[1].mxu0 }
  0xfa   :  { %v154_v20 = vpop.f32.mrb[2].mxu0 }
  0xfb   :  { %v160_v22 = vadd.f32 %v158_v16, %v152_v17  ;;  %v155_v23 = vadd.f32 %v154_v20, %v48_v19  ;;  %v156_v24 = vpop.f32.mrb[3].mxu0 }
  0xfd   :  { %162 = vst [vmem:[%s275_s4] sm:$0xff] %v160_v22  ;;  %v161_v25 = vadd.f32 %v159_v21, %v155_v23 }
  0xff   :  { %163 = vst [vmem:[%s275_s4 + $0x8] sm:$0xff] %v161_v25 }

// kernel: kernel_extractor_forward.40
= control target key start
LH: loop header
LB: loop body
LE: loop exit
PB: predicated region body
PF: predicated region fallthrough
CT: control target
= control target key end

     0   :  { %v196_v0 = vmov 0   ;;  %vm113_vm0 = vcmask 130048   ;;  %s273_s1 = inlined_call_operand.vmem [shape: bf16[144,128], index: 1, kind: input, shape index: {}]   ;;  %s274_s0 = inlined_call_operand.vmem [shape: bf16[16,144], index: 0, kind: input, shape index: {}]   ;;  %s275_s2 = inlined_call_operand.vmem [shape: f32[16,1], index: 2, kind: input, shape index: {}]   ;;  %s276_s3 = inlined_call_operand.vmem [shape: f32[16,128], index: 3, kind: input, shape index: {}]   ;;  %s277_s4 = inlined_call_operand.vmem [shape: f32[16,128], index: 4, kind: output, shape index: {}]  }
   0x1   :  { %117 = vmatprep.subr.bf16.mxu0 %v196_v0  ;;  %v184_v1 = vld [vmem:[%s273_s1] sm:$0xff]   ;;  %183 = vset.pattern.permute.xlu0 %v196_v0  ;;  %v185_v2 = vld [vmem:[%s273_s1 + $0x8] sm:$0xff]   ;;  %v186_v3 = vld [vmem:[%s273_s1 + $0x10] sm:$0xff]  }
   0x2   :  { %118 = vmatpush1.bf16.msra.mxu0 %v184_v1  ;;  %v187_v4 = vld [vmem:[%s273_s1 + $0x18] sm:$0xff]   ;;  %v195_v5 = vld [vmem:[%s274_s0 + $0x4] ss:$8 sps:$4 sm:$0xff]   ;;  %v190_v10 = vld [vmem:[%s273_s1 + $0x30] sm:$0xff]  }
   0x3   :  { %119 = vmatprep.subr.bf16.mxu0 %v196_v0  ;;  %v38_v6 = vld [vmem:[%s275_s2] sm:$0xff]  ;;  %181 = vmatprep.mubr.msk.bf16.mxu0 %vm113_vm0, %v195_v5  ;;  %v39_v7 = vld [vmem:[%s275_s2 + $0x8] sm:$0xff]  ;;  %v191_v11 = vld [vmem:[%s273_s1 + $0x38] sm:$0xff]  }
   0x4   :  { %42 = vperm.xlu0 %183, %v38_v6   ;;  %v188_v8 = vld [vmem:[%s273_s1 + $0x20] sm:$0xff]   ;;  %v189_v9 = vld [vmem:[%s273_s1 + $0x28] sm:$0xff]  }
   0x5   :  { %v192_v12 = vld [vmem:[%s273_s1 + $0x40] sm:$0xff]   ;;  %v159_v21 = vld [vmem:[%s276_s3 + $0x8] sm:$0xff] }
   0x6   :  { %120 = vmatpush1.bf16.msra.mxu0 %v185_v2  ;;  %v193_v13 = vld [vmem:[%s274_s0] ss:$8 sps:$4 sm:$0xff]  }
   0x7   :  { %121 = vmatprep.subr.bf16.mxu0 %v196_v0  ;;  %v158_v16 = vld [vmem:[%s276_s3] sm:$0xff] }
   0x8   :  { %47 = vperm.xlu0 %183, %v39_v7  }
   0xa   :  { %122 = vmatpush1.bf16.msra.mxu0 %v186_v3 }
   0xb   :  { %123 = vmatprep.subr.bf16.mxu0 %v196_v0 }
   0xe   :  { %124 = vmatpush1.bf16.msra.mxu0 %v187_v4 }
   0xf   :  { %125 = vmatprep.subr.bf16.mxu0 %v196_v0 }
  0x12   :  { %126 = vmatpush1.bf16.msra.mxu0 %v188_v8 }
  0x13   :  { %127 = vmatprep.subr.bf16.mxu0 %v196_v0 }
  0x16   :  { %128 = vmatpush1.bf16.msra.mxu0 %v189_v9 }
  0x17   :  { %129 = vmatprep.subr.bf16.mxu0 %v196_v0 }
  0x1a   :  { %130 = vmatpush1.bf16.msra.mxu0 %v190_v10 }
  0x1b   :  { %131 = vmatprep.subr.bf16.mxu0 %v196_v0 }
  0x1e   :  { %132 = vmatpush1.bf16.msra.mxu0 %v191_v11 }
  0x1f   :  { %133 = vmatprep.subr.bf16.mxu0 %v196_v0 }
  0x22   :  { %134 = vmatpush1.bf16.msra.mxu0 %v192_v12 }
  0x25   :  { %150 = vmatmul.mubr.bf16.vlgmr.msra.gmra.mrb[0].mxu0 %v193_v13 }
  0x83   :  { %v43_v14 = vpop.permute.xlu0 %42 }
  0x87   :  { %v48_v19 = vpop.permute.xlu0 %47 }
  0xf8   :  { %v151_v15 = vpop.f32.mrb[0].mxu0 }
  0xf9   :  { %v152_v17 = vadd.f32 %v151_v15, %v43_v14  ;;  %v153_v18 = vpop.f32.mrb[1].mxu0 }
  0xfa   :  { %v154_v20 = vpop.f32.mrb[2].mxu0 }
  0xfb   :  { %v160_v22 = vadd.f32 %v158_v16, %v152_v17  ;;  %v155_v23 = vadd.f32 %v154_v20, %v48_v19  ;;  %v156_v24 = vpop.f32.mrb[3].mxu0 }
  0xfd   :  { %v162_v25 = vmax.f32 %v160_v22, 0.0  ;;  %v161_v26 = vadd.f32 %v159_v21, %v155_v23 }
  0xff   :  { %164 = vst [vmem:[%s277_s4] sm:$0xff] %v162_v25  ;;  %v163_v27 = vmax.f32 %v161_v26, 0.0 }
 0x101   :  { %165 = vst [vmem:[%s277_s4 + $0x8] sm:$0xff] %v163_v27 }

// kernel: kernel_extractor_forward.41
= control target key start
LH: loop header
LB: loop body
LE: loop exit
PB: predicated region body
PF: predicated region fallthrough
CT: control target
= control target key end

     0   :  { %v252_v0 = vmov 0   ;;  %vm133_vm0 = vcmask 130048   ;;  %s336_s1 = inlined_call_operand.vmem [shape: bf16[144,128], index: 1, kind: input, shape index: {}]   ;;  %s337_s0 = inlined_call_operand.vmem [shape: bf16[32,144], index: 0, kind: input, shape index: {}]   ;;  %s338_s2 = inlined_call_operand.vmem [shape: f32[32,1], index: 2, kind: input, shape index: {}]   ;;  %s339_s3 = inlined_call_operand.vmem [shape: f32[32,128], index: 3, kind: output, shape index: {}]  }
   0x1   :  { %140 = vmatprep.subr.bf16.mxu0 %v252_v0  ;;  %216 = vmatprep.subr.bf16.mxu1 %v252_v0  ;;  %v237_v1 = vld [vmem:[%s336_s1] sm:$0xff]   ;;  %v238_v2 = vld [vmem:[%s336_s1 + $0x8] sm:$0xff]   ;;  %v239_v3 = vld [vmem:[%s336_s1 + $0x10] sm:$0xff]  }
   0x2   :  { %236 = vset.pattern.permute.xlu1 %v252_v0  ;;  %235 = vset.pattern.permute.xlu0 %v252_v0  ;;  %v240_v4 = vld [vmem:[%s336_s1 + $0x18] sm:$0xff]   ;;  %v248_v5 = vld [vmem:[%s337_s0 + $0x4] ss:$8 sps:$4 sm:$0xff]   ;;  %v39_v7 = vld [vmem:[%s338_s2 + $0x10] sm:$0xff] }
   0x3   :  { %141 = vmatpush1.bf16.msra.mxu0 %v237_v1  ;;  %225 = vmatpush1.bf16.msra.mxu1 %v237_v1  ;;  %v251_v6 = vld [vmem:[%s337_s0 + $0x14] ss:$8 sps:$4 sm:$0xff]   ;;  %v37_v8 = vld [vmem:[%s338_s2] sm:$0xff]  ;;  %v38_v11 = vld [vmem:[%s338_s2 + $0x8] sm:$0xff] }
   0x4   :  { %142 = vmatprep.subr.bf16.mxu0 %v252_v0  ;;  %217 = vmatprep.subr.bf16.mxu1 %v252_v0  ;;  %v40_v9 = vld [vmem:[%s338_s2 + $0x18] sm:$0xff]  ;;  %v241_v10 = vld [vmem:[%s336_s1 + $0x20] sm:$0xff]   ;;  %v242_v12 = vld [vmem:[%s336_s1 + $0x28] sm:$0xff]  }
   0x5   :  { %214 = vmatprep.mubr.msk.bf16.mxu0 %vm133_vm0, %v248_v5  ;;  %53 = vperm.xlu1 %236, %v39_v7   ;;  %v243_v13 = vld [vmem:[%s336_s1 + $0x30] sm:$0xff]   ;;  %v244_v14 = vld [vmem:[%s336_s1 + $0x38] sm:$0xff]   ;;  %v245_v15 = vld [vmem:[%s336_s1 + $0x40] sm:$0xff]  }
   0x6   :  { %215 = vmatprep.mubr.msk.bf16.mxu1 %vm133_vm0, %v251_v6  ;;  %43 = vperm.xlu0 %235, %v37_v8   ;;  %v246_v16 = vld [vmem:[%s337_s0] ss:$8 sps:$4 sm:$0xff]   ;;  %v249_v17 = vld [vmem:[%s337_s0 + $0x10] ss:$8 sps:$4 sm:$0xff]  }
   0x7   :  { %143 = vmatpush1.bf16.msra.mxu0 %v238_v2  ;;  %226 = vmatpush1.bf16.msra.mxu1 %v238_v2 }
   0x8   :  { %144 = vmatprep.subr.bf16.mxu0 %v252_v0  ;;  %218 = vmatprep.subr.bf16.mxu1 %v252_v0 }
   0x9   :  { %58 = vperm.xlu1 %236, %v40_v9  }
   0xa   :  { %48 = vperm.xlu0 %235, %v38_v11  }
   0xb   :  { %145 = vmatpush1.bf16.msra.mxu0 %v239_v3  ;;  %227 = vmatpush1.bf16.msra.mxu1 %v239_v3 }
   0xc   :  { %146 = vmatprep.subr.bf16.mxu0 %v252_v0  ;;  %219 = vmatprep.subr.bf16.mxu1 %v252_v0 }
   0xf   :  { %147 = vmatpush1.bf16.msra.mxu0 %v240_v4  ;;  %228 = vmatpush1.bf16.msra.mxu1 %v240_v4 }
  0x10   :  { %148 = vmatprep.subr.bf16.mxu0 %v252_v0  ;;  %220 = vmatprep.subr.bf16.mxu1 %v252_v0 }
  0x13   :  { %149 = vmatpush1.bf16.msra.mxu0 %v241_v10  ;;  %229 = vmatpush1.bf16.msra.mxu1 %v241_v10 }
  0x14   :  { %150 = vmatprep.subr.bf16.mxu0 %v252_v0  ;;  %221 = vmatprep.subr.bf16.mxu1 %v252_v0 }
  0x17   :  { %151 = vmatpush1.bf16.msra.mxu0 %v242_v12  ;;  %230 = vmatpush1.bf16.msra.mxu1 %v242_v12 }
  0x18   :  { %152 = vmatprep.subr.bf16.mxu0 %v252_v0  ;;  %222 = vmatprep.subr.bf16.mxu1 %v252_v0 }
  0x1b   :  { %153 = vmatpush1.bf16.msra.mxu0 %v243_v13  ;;  %231 = vmatpush1.bf16.msra.mxu1 %v243_v13 }
  0x1c   :  { %154 = vmatprep.subr.bf16.mxu0 %v252_v0  ;;  %223 = vmatprep.subr.bf16.mxu1 %v252_v0 }
  0x1f   :  { %155 = vmatpush1.bf16.msra.mxu0 %v244_v14  ;;  %232 = vmatpush1.bf16.msra.mxu1 %v244_v14 }
  0x20   :  { %156 = vmatprep.subr.bf16.mxu0 %v252_v0  ;;  %224 = vmatprep.subr.bf16.mxu1 %v252_v0 }
  0x23   :  { %157 = vmatpush1.bf16.msra.mxu0 %v245_v15  ;;  %233 = vmatpush1.bf16.msra.mxu1 %v245_v15 }
  0x26   :  { %173 = vmatmul.mubr.bf16.vlgmr.msra.gmra.mrb[0].mxu0 %v246_v16  ;;  %181 = vmatmul.mubr.bf16.vlgmr.msra.gmra.mrb[0].mxu1 %v249_v17 }
  0x84   :  { %v54_v18 = vpop.permute.xlu1 %53 }
  0x85   :  { %v44_v19 = vpop.permute.xlu0 %43 }
  0x88   :  { %v59_v20 = vpop.permute.xlu1 %58 }
  0x89   :  { %v49_v21 = vpop.permute.xlu0 %48 }
  0xf9   :  { %v174_v22 = vpop.f32.mrb[0].mxu0  ;;  %v182_v23 = vpop.f32.mrb[0].mxu1 }
  0xfa   :  { %v175_v24 = vadd.f32 %v174_v22, %v44_v19  ;;  %v183_v25 = vadd.f32 %v182_v23, %v54_v18  ;;  %v176_v26 = vpop.f32.mrb[1].mxu0  ;;  %v184_v27 = vpop.f32.mrb[1].mxu1 }
  0xfb   :  { %v177_v28 = vpop.f32.mrb[2].mxu0  ;;  %v185_v29 = vpop.f32.mrb[2].mxu1 }
  0xfc   :  { %v189_v30 = vmax.f32 %v175_v24, 0.0  ;;  %v191_v31 = vmax.f32 %v183_v25, 0.0  ;;  %v178_v32 = vadd.f32 %v177_v28, %v49_v21  ;;  %v186_v33 = vadd.f32 %v185_v29, %v59_v20  ;;  %v179_v34 = vpop.f32.mrb[3].mxu0  ;;  %v187_v35 = vpop.f32.mrb[3].mxu1 }
  0xfe   :  { %193 = vst [vmem:[%s339_s3] sm:$0xff] %v189_v30  ;;  %195 = vst [vmem:[%s339_s3 + $0x10] sm:$0xff] %v191_v31  ;;  %v190_v36 = vmax.f32 %v178_v32, 0.0  ;;  %v192_v37 = vmax.f32 %v186_v33, 0.0 }
 0x100   :  { %194 = vst [vmem:[%s339_s3 + $0x8] sm:$0xff] %v190_v36  ;;  %196 = vst [vmem:[%s339_s3 + $0x18] sm:$0xff] %v192_v37 }

// kernel: kernel_extractor_forward.42
= control target key start
LH: loop header
LB: loop body
LE: loop exit
PB: predicated region body
PF: predicated region fallthrough
CT: control target
= control target key end

     0   :  { %v433_v1 = vmov 0   ;;  %vm221_vm0 = vcmask 261120   ;;  %s552_s1 = inlined_call_operand.vmem [shape: bf16[288,128], index: 1, kind: input, shape index: {}]   ;;  %s553_s0 = inlined_call_operand.vmem [shape: bf16[32,288], index: 0, kind: input, shape index: {}]   ;;  %s554_s2 = inlined_call_operand.vmem [shape: f32[32,1], index: 2, kind: input, shape index: {}]   ;;  %s555_s3 = inlined_call_operand.vmem [shape: f32[32,128], index: 3, kind: output, shape index: {}]  }
   0x1   :  { %v407_v0 = vld [vmem:[%s552_s1 + $0x40] sm:$0xff]   ;;  %405 = vset.pattern.permute.xlu0 %v433_v1  ;;  %406 = vset.pattern.permute.xlu1 %v433_v1  ;;  %v409_v3 = vld [vmem:[%s552_s1 + $0x48] sm:$0xff]   ;;  %v411_v5 = vld [vmem:[%s552_s1 + $0x50] sm:$0xff]  }
   0x2   :  { %v408_v2 = vld [vmem:[%s552_s1] sm:$0xff]   ;;  %364 = vmatprep.subr.bf16.mxu0 %v407_v0  ;;  %v410_v4 = vld [vmem:[%s552_s1 + $0x8] sm:$0xff]   ;;  %v412_v6 = vld [vmem:[%s552_s1 + $0x10] sm:$0xff]  }
   0x3   :  { %365 = vmatpush3.bf16.msra.mxu0 %v408_v2  ;;  %v413_v7 = vld [vmem:[%s552_s1 + $0x58] sm:$0xff]   ;;  %v415_v9 = vld [vmem:[%s552_s1 + $0x60] sm:$0xff]   ;;  %v417_v12 = vld [vmem:[%s552_s1 + $0x68] sm:$0xff]  }
   0x4   :  { %366 = vmatprep.subr.bf16.mxu0 %v409_v3  ;;  %v414_v8 = vld [vmem:[%s552_s1 + $0x18] sm:$0xff]   ;;  %v416_v10 = vld [vmem:[%s552_s1 + $0x20] sm:$0xff]   ;;  %v418_v13 = vld [vmem:[%s552_s1 + $0x28] sm:$0xff]  }
   0x5   :  { %v422_v11 = vld [vmem:[%s552_s1 + $0x80] sm:$0xff]   ;;  %v419_v14 = vld [vmem:[%s552_s1 + $0x70] sm:$0xff]   ;;  %v427_v16 = vld [vmem:[%s552_s1 + $0x88] sm:$0xff]  }
   0x6   :  { %396 = vmatprep.subr.bf16.mxu1 %v422_v11  ;;  %v426_v15 = vld [vmem:[%s553_s0 + $0x4] ss:$12 sps:$4 sm:$0xff]   ;;  %v428_v17 = vld [vmem:[%s553_s0 + $0x8] ss:$12 sps:$4 sm:$0xff]   ;;  %v429_v18 = vld [vmem:[%s553_s0 + $0x20] ss:$12 sps:$4 sm:$0xff]  }
   0x7   :  { %367 = vmatpush3.bf16.msra.mxu0 %v410_v4  ;;  %397 = vmatpush3.bf16.msra.mxu1 %v422_v11  ;;  %v59_v19 = vld [vmem:[%s554_s2] sm:$0xff]  ;;  %v420_v20 = vld [vmem:[%s552_s1 + $0x30] sm:$0xff]   ;;  %v421_v22 = vld [vmem:[%s552_s1 + $0x78] sm:$0xff]  }
   0x8   :  { %368 = vmatprep.subr.bf16.mxu0 %v411_v5  ;;  %260 = vmatprep.mubr.bf16.mxu0 %v426_v15  ;;  %v61_v21 = vld [vmem:[%s554_s2 + $0x10] sm:$0xff]  ;;  %v60_v23 = vld [vmem:[%s554_s2 + $0x8] sm:$0xff]  ;;  %v62_v24 = vld [vmem:[%s554_s2 + $0x18] sm:$0xff] }
   0x9   :  { %398 = vmatprep.subr.bf16.mxu1 %v427_v16  ;;  %400 = vmatprep.mubr.msk.bf16.mxu1 %vm221_vm0, %v428_v17  ;;  %v423_v25 = vld [vmem:[%s552_s1 + $0x38] sm:$0xff]   ;;  %v424_v26 = vld [vmem:[%s553_s0] ss:$12 sps:$4 sm:$0xff]  }
   0xa   :  { %65 = vperm.xlu0 %405, %v59_v19   ;;  %75 = vperm.xlu1 %406, %v61_v21   ;;  %v430_v27 = vld [vmem:[%s553_s0 + $0x1c] ss:$12 sps:$4 sm:$0xff]   ;;  %v432_v28 = vld [vmem:[%s553_s0 + $0x18] ss:$12 sps:$4 sm:$0xff]  }
   0xb   :  { %369 = vmatpush3.bf16.msra.mxu0 %v412_v6  ;;  %399 = vmatpush3.bf16.msra.mxu1 %v427_v16 }
   0xc   :  { %370 = vmatprep.subr.bf16.mxu0 %v413_v7 }
   0xe   :  { %401 = vmatmul.mubr.msk.bf16.vlgmr.msra.gmra.mrb[0].mxu1 %vm221_vm0, %v429_v18  ;;  %70 = vperm.xlu0 %405, %v60_v23  }
   0xf   :  { %371 = vmatpush3.bf16.msra.mxu0 %v414_v8  ;;  %80 = vperm.xlu1 %406, %v62_v24  }
  0x10   :  { %372 = vmatprep.subr.bf16.mxu0 %v415_v9 }
  0x13   :  { %373 = vmatpush3.bf16.msra.mxu0 %v416_v10 }
  0x14   :  { %374 = vmatprep.subr.bf16.mxu0 %v417_v12 }
  0x17   :  { %375 = vmatpush3.bf16.msra.mxu0 %v418_v13 }
  0x18   :  { %376 = vmatprep.subr.bf16.mxu0 %v419_v14 }
  0x1b   :  { %377 = vmatpush3.bf16.msra.mxu0 %v420_v20 }
  0x1c   :  { %378 = vmatprep.subr.bf16.mxu0 %v421_v22 }
  0x1f   :  { %379 = vmatpush3.bf16.msra.mxu0 %v423_v25 }
  0x22   :  { %261 = vmatmul.mubr.bf16.vlgmr.msra.gmra.mrb[0].mxu0 %v424_v26 }
  0x23   :  { %268 = vmatprep.mubr.bf16.mxu0 %v430_v27 }
  0x2a   :  { %269 = vmatmul.mubr.bf16.gmra.mrb[4].mxu0 %v432_v28 }
  0x89   :  { %v66_v33 = vpop.permute.xlu0 %65  ;;  %v76_v44 = vpop.permute.xlu1 %75 }
  0x8d   :  { %v71_v39 = vpop.permute.xlu0 %70 }
  0x8e   :  { %v81_v55 = vpop.permute.xlu1 %80 }
  0xe1   :  { %v402_v29 = vpop.f32.mrb[0].mxu1 }
  0xe2   :  { %v311_v30 = vpop.f32.mrb[1].mxu1 }
  0xe3   :  { %v403_v31 = vpop.f32.mrb[2].mxu1 }
  0xe4   :  { %v314_v32 = vpop.f32.mrb[3].mxu1 }
  0xf5   :  { %v380_v34 = vpop.f32.mrb[0].mxu0 }
  0xf6   :  { %v381_v35 = vpop.f32.mrb[1].mxu0 }
  0xf7   :  { %v382_v36 = vadd.f32 %v381_v35, %v380_v34  ;;  %v383_v37 = vpop.f32.mrb[2].mxu0 }
  0xf8   :  { %v384_v38 = vpop.f32.mrb[3].mxu0 }
  0xf9   :  { %v385_v40 = vadd.f32 %v384_v38, %v383_v37  ;;  %v263_v41 = vadd.f32 %v382_v36, %v66_v33 }
  0xfb   :  { %v266_v42 = vadd.f32 %v385_v40, %v71_v39  ;;  %v312_v43 = vadd.f32 %v311_v30, %v263_v41 }
  0xfd   :  { %v326_v45 = vmax.f32 %v312_v43, 0.0  ;;  %v315_v46 = vadd.f32 %v314_v32, %v266_v42  ;;  %v386_v47 = vpop.f32.mrb[4].mxu0 }
  0xfe   :  { %v387_v48 = vpop.f32.mrb[5].mxu0 }
  0xff   :  { %330 = vst [vmem:[%s555_s3] sm:$0xff] %v326_v45  ;;  %v327_v49 = vmax.f32 %v315_v46, 0.0  ;;  %v388_v50 = vadd.f32 %v387_v48, %v386_v47  ;;  %v389_v51 = vpop.f32.mrb[6].mxu0 }
 0x100   :  { %v390_v52 = vpop.f32.mrb[7].mxu0 }
 0x101   :  { %331 = vst [vmem:[%s555_s3 + $0x8] sm:$0xff] %v327_v49  ;;  %v271_v53 = vadd.f32 %v388_v50, %v76_v44  ;;  %v391_v54 = vadd.f32 %v390_v52, %v389_v51 }
 0x103   :  { %v320_v56 = vadd.f32 %v402_v29, %v271_v53  ;;  %v274_v57 = vadd.f32 %v391_v54, %v81_v55 }
 0x105   :  { %v328_v58 = vmax.f32 %v320_v56, 0.0  ;;  %v323_v59 = vadd.f32 %v403_v31, %v274_v57 }
 0x107   :  { %332 = vst [vmem:[%s555_s3 + $0x10] sm:$0xff] %v328_v58  ;;  %v329_v60 = vmax.f32 %v323_v59, 0.0 }
 0x109   :  { %333 = vst [vmem:[%s555_s3 + $0x18] sm:$0xff] %v329_v60 }

// kernel: kernel_extractor_forward.46
= control target key start
LH: loop header
LB: loop body
LE: loop exit
PB: predicated region body
PF: predicated region fallthrough
CT: control target
= control target key end

     0   :  { %v515_v1 = vmov 0   ;;  %s656_s1 = inlined_call_operand.vmem [shape: bf16[512,128], index: 1, kind: input, shape index: {}]   ;;  %s657_s0 = inlined_call_operand.vmem [shape: bf16[16,512], index: 0, kind: input, shape index: {}]   ;;  %s658_s2 = inlined_call_operand.vmem [shape: f32[16,1], index: 2, kind: input, shape index: {}]   ;;  %s659_s3 = inlined_call_operand.vmem [shape: f32[16,128], index: 3, kind: output, shape index: {}]  }
   0x1   :  { %v477_v0 = vld [vmem:[%s656_s1 + $0x40] sm:$0xff]   ;;  %476 = vset.pattern.permute.xlu0 %v515_v1  ;;  %v481_v5 = vld [vmem:[%s656_s1 + $0x48] sm:$0xff]   ;;  %v485_v9 = vld [vmem:[%s656_s1 + $0x50] sm:$0xff]  }
   0x2   :  { %v478_v2 = vld [vmem:[%s656_s1 + $0xc0] sm:$0xff]   ;;  %431 = vmatprep.subr.bf16.mxu0 %v477_v0  ;;  %v482_v6 = vld [vmem:[%s656_s1 + $0xc8] sm:$0xff]   ;;  %v486_v10 = vld [vmem:[%s656_s1 + $0xd0] sm:$0xff]  }
   0x3   :  { %v479_v3 = vld [vmem:[%s656_s1] sm:$0xff]   ;;  %453 = vmatprep.subr.bf16.mxu1 %v478_v2  ;;  %v483_v7 = vld [vmem:[%s656_s1 + $0x8] sm:$0xff]   ;;  %v487_v11 = vld [vmem:[%s656_s1 + $0x10] sm:$0xff]  }
   0x4   :  { %v480_v4 = vld [vmem:[%s656_s1 + $0x80] sm:$0xff]   ;;  %432 = vmatpush3.bf16.msra.mxu0 %v479_v3  ;;  %v484_v8 = vld [vmem:[%s656_s1 + $0x88] sm:$0xff]   ;;  %v488_v12 = vld [vmem:[%s656_s1 + $0x90] sm:$0xff]  }
   0x5   :  { %454 = vmatpush3.bf16.msra.mxu1 %v480_v4  ;;  %433 = vmatprep.subr.bf16.mxu0 %v481_v5  ;;  %v489_v13 = vld [vmem:[%s656_s1 + $0x58] sm:$0xff]   ;;  %v493_v17 = vld [vmem:[%s656_s1 + $0x60] sm:$0xff]   ;;  %v497_v21 = vld [vmem:[%s656_s1 + $0x68] sm:$0xff]  }
   0x6   :  { %455 = vmatprep.subr.bf16.mxu1 %v482_v6  ;;  %v490_v14 = vld [vmem:[%s656_s1 + $0xd8] sm:$0xff]   ;;  %v494_v18 = vld [vmem:[%s656_s1 + $0xe0] sm:$0xff]   ;;  %v498_v22 = vld [vmem:[%s656_s1 + $0xe8] sm:$0xff]  }
   0x7   :  { %v491_v15 = vld [vmem:[%s656_s1 + $0x18] sm:$0xff]   ;;  %v495_v19 = vld [vmem:[%s656_s1 + $0x20] sm:$0xff]   ;;  %v499_v23 = vld [vmem:[%s656_s1 + $0x28] sm:$0xff]  }
   0x8   :  { %434 = vmatpush3.bf16.msra.mxu0 %v483_v7  ;;  %v492_v16 = vld [vmem:[%s656_s1 + $0x98] sm:$0xff]   ;;  %v496_v20 = vld [vmem:[%s656_s1 + $0xa0] sm:$0xff]   ;;  %v500_v24 = vld [vmem:[%s656_s1 + $0xa8] sm:$0xff]  }
   0x9   :  { %456 = vmatpush3.bf16.msra.mxu1 %v484_v8  ;;  %435 = vmatprep.subr.bf16.mxu0 %v485_v9  ;;  %v501_v25 = vld [vmem:[%s656_s1 + $0x70] sm:$0xff]   ;;  %v505_v29 = vld [vmem:[%s656_s1 + $0x78] sm:$0xff]   ;;  %v83_v37 = vld [vmem:[%s658_s2] sm:$0xff] }
   0xa   :  { %457 = vmatprep.subr.bf16.mxu1 %v486_v10  ;;  %v502_v26 = vld [vmem:[%s656_s1 + $0xf0] sm:$0xff]   ;;  %v506_v30 = vld [vmem:[%s656_s1 + $0xf8] sm:$0xff]   ;;  %87 = vperm.xlu0 %476, %v83_v37   ;;  %v84_v38 = vld [vmem:[%s658_s2 + $0x8] sm:$0xff] }
   0xb   :  { %v503_v27 = vld [vmem:[%s656_s1 + $0x30] sm:$0xff]   ;;  %v507_v31 = vld [vmem:[%s656_s1 + $0x38] sm:$0xff]  }
   0xc   :  { %436 = vmatpush3.bf16.msra.mxu0 %v487_v11  ;;  %v504_v28 = vld [vmem:[%s656_s1 + $0xb0] sm:$0xff]   ;;  %v508_v32 = vld [vmem:[%s656_s1 + $0xb8] sm:$0xff]  }
   0xd   :  { %458 = vmatpush3.bf16.msra.mxu1 %v488_v12  ;;  %437 = vmatprep.subr.bf16.mxu0 %v489_v13  ;;  %v509_v33 = vld [vmem:[%s657_s0] ss:$16 sps:$4 sm:$0xff]   ;;  %v511_v34 = vld [vmem:[%s657_s0 + $0x4] ss:$16 sps:$4 sm:$0xff]   ;;  %v512_v35 = vld [vmem:[%s657_s0 + $0x8] ss:$16 sps:$4 sm:$0xff]  }
   0xe   :  { %459 = vmatprep.subr.bf16.mxu1 %v490_v14  ;;  %v514_v36 = vld [vmem:[%s657_s0 + $0xc] ss:$16 sps:$4 sm:$0xff]   ;;  %339 = vmatprep.mubr.bf16.mxu0 %v511_v34 }
   0xf   :  { %380 = vmatprep.mubr.bf16.mxu1 %v514_v36  ;;  %92 = vperm.xlu0 %476, %v84_v38  }
  0x10   :  { %438 = vmatpush3.bf16.msra.mxu0 %v491_v15 }
  0x11   :  { %460 = vmatpush3.bf16.msra.mxu1 %v492_v16  ;;  %439 = vmatprep.subr.bf16.mxu0 %v493_v17 }
  0x12   :  { %461 = vmatprep.subr.bf16.mxu1 %v494_v18 }
  0x14   :  { %440 = vmatpush3.bf16.msra.mxu0 %v495_v19 }
  0x15   :  { %462 = vmatpush3.bf16.msra.mxu1 %v496_v20  ;;  %441 = vmatprep.subr.bf16.mxu0 %v497_v21 }
  0x16   :  { %463 = vmatprep.subr.bf16.mxu1 %v498_v22 }
  0x18   :  { %442 = vmatpush3.bf16.msra.mxu0 %v499_v23 }
  0x19   :  { %464 = vmatpush3.bf16.msra.mxu1 %v500_v24  ;;  %443 = vmatprep.subr.bf16.mxu0 %v501_v25 }
  0x1a   :  { %465 = vmatprep.subr.bf16.mxu1 %v502_v26 }
  0x1c   :  { %444 = vmatpush3.bf16.msra.mxu0 %v503_v27 }
  0x1d   :  { %466 = vmatpush3.bf16.msra.mxu1 %v504_v28  ;;  %445 = vmatprep.subr.bf16.mxu0 %v505_v29 }
  0x1e   :  { %467 = vmatprep.subr.bf16.mxu1 %v506_v30 }
  0x20   :  { %446 = vmatpush3.bf16.msra.mxu0 %v507_v31 }
  0x21   :  { %468 = vmatpush3.bf16.msra.mxu1 %v508_v32 }
  0x23   :  { %340 = vmatmul.mubr.bf16.vlgmr.msra.gmra.mrb[0].mxu0 %v509_v33 }
  0x24   :  { %381 = vmatmul.mubr.bf16.vlgmr.msra.gmra.mrb[0].mxu1 %v512_v35 }
  0x89   :  { %v88_v39 = vpop.permute.xlu0 %87 }
  0x8e   :  { %v93_v52 = vpop.permute.xlu0 %92 }
  0xf6   :  { %v447_v40 = vpop.f32.mrb[0].mxu0 }
  0xf7   :  { %v469_v41 = vpop.f32.mrb[0].mxu1  ;;  %v448_v42 = vpop.f32.mrb[1].mxu0 }
  0xf8   :  { %v449_v43 = vadd.f32 %v448_v42, %v447_v40  ;;  %v470_v44 = vpop.f32.mrb[1].mxu1  ;;  %v450_v45 = vpop.f32.mrb[2].mxu0 }
  0xf9   :  { %v471_v46 = vadd.f32 %v470_v44, %v469_v41  ;;  %v472_v47 = vpop.f32.mrb[2].mxu1  ;;  %v451_v48 = vpop.f32.mrb[3].mxu0 }
  0xfa   :  { %v342_v49 = vadd.f32 %v449_v43, %v88_v39  ;;  %v452_v50 = vadd.f32 %v451_v48, %v450_v45  ;;  %v473_v51 = vpop.f32.mrb[3].mxu1 }
  0xfb   :  { %v474_v53 = vadd.f32 %v473_v51, %v472_v47 }
  0xfc   :  { %v383_v54 = vadd.f32 %v471_v46, %v342_v49  ;;  %v345_v55 = vadd.f32 %v452_v50, %v93_v52 }
  0xfe   :  { %389 = vst [vmem:[%s659_s3] sm:$0xff] %v383_v54  ;;  %v386_v56 = vadd.f32 %v474_v53, %v345_v55 }
 0x100   :  { %390 = vst [vmem:[%s659_s3 + $0x8] sm:$0xff] %v386_v56 }

// kernel: kernel_extractor_forward.47
= control target key start
LH: loop header
LB: loop body
LE: loop exit
PB: predicated region body
PF: predicated region fallthrough
CT: control target
= control target key end

     0   :  { %v363_v1 = vmov 0.0   ;;  %vm364_vm0 = vmmov 0   ;;  %v365_v3 = vmov 0   ;;  %vm190_vm1 = vcmask 261120   ;;  %s461_s1 = inlined_call_operand.vmem [shape: bf16[288,128], index: 1, kind: input, shape index: {}]   ;;  %s462_s0 = inlined_call_operand.vmem [shape: bf16[16,288], index: 0, kind: input, shape index: {}]   ;;  %s463_s2 = inlined_call_operand.vmem [shape: f32[16,1], index: 2, kind: input, shape index: {}]   ;;  %s464_s3 = inlined_call_operand.vmem [shape: f32[16,128], index: 3, kind: output, shape index: {}]  }
   0x1   :  { %v341_v0 = vld [vmem:[%s461_s1 + $0x40] sm:$0xff]   ;;  %329 = vmatprep.subr.bf16.mxu1 %v363_v1  ;;  %333 = vmatprep.mubr.msk.bf16.mxu1 %vm364_vm0, %v363_v1  ;;  %v343_v4 = vld [vmem:[%s461_s1 + $0x48] sm:$0xff]   ;;  %v345_v6 = vld [vmem:[%s461_s1 + $0x50] sm:$0xff]  }
   0x2   :  { %v342_v2 = vld [vmem:[%s461_s1] sm:$0xff]   ;;  %340 = vset.pattern.permute.xlu0 %v365_v3  ;;  %304 = vmatprep.subr.bf16.mxu0 %v341_v0  ;;  %v344_v5 = vld [vmem:[%s461_s1 + $0x8] sm:$0xff]   ;;  %v346_v7 = vld [vmem:[%s461_s1 + $0x10] sm:$0xff]  }
   0x3   :  { %305 = vmatpush3.bf16.msra.mxu0 %v342_v2  ;;  %v347_v8 = vld [vmem:[%s461_s1 + $0x58] sm:$0xff]   ;;  %v349_v10 = vld [vmem:[%s461_s1 + $0x60] sm:$0xff]   ;;  %v351_v13 = vld [vmem:[%s461_s1 + $0x68] sm:$0xff]  }
   0x4   :  { %306 = vmatprep.subr.bf16.mxu0 %v343_v4  ;;  %v348_v9 = vld [vmem:[%s461_s1 + $0x18] sm:$0xff]   ;;  %v355_v11 = vld [vmem:[%s461_s1 + $0x80] sm:$0xff]   ;;  %v352_v14 = vld [vmem:[%s461_s1 + $0x28] sm:$0xff]  }
   0x5   :  { %v350_v12 = vld [vmem:[%s461_s1 + $0x20] sm:$0xff]   ;;  %330 = vmatpush3.bf16.msra.mxu1 %v355_v11  ;;  %v361_v16 = vld [vmem:[%s461_s1 + $0x88] sm:$0xff]   ;;  %v353_v17 = vld [vmem:[%s461_s1 + $0x70] sm:$0xff]  }
   0x6   :  { %331 = vmatprep.subr.bf16.mxu1 %v363_v1  ;;  %v360_v15 = vld [vmem:[%s462_s0 + $0x4] ss:$12 sps:$4 sm:$0xff]   ;;  %v362_v18 = vld [vmem:[%s462_s0 + $0x8] ss:$12 sps:$4 sm:$0xff]   ;;  %v356_v22 = vld [vmem:[%s461_s1 + $0x78] sm:$0xff]  }
   0x7   :  { %307 = vmatpush3.bf16.msra.mxu0 %v344_v5  ;;  %226 = vmatprep.mubr.bf16.mxu0 %v360_v15  ;;  %v55_v19 = vld [vmem:[%s463_s2] sm:$0xff]  ;;  %v56_v20 = vld [vmem:[%s463_s2 + $0x8] sm:$0xff]  ;;  %v354_v21 = vld [vmem:[%s461_s1 + $0x30] sm:$0xff]  }
   0x8   :  { %308 = vmatprep.subr.bf16.mxu0 %v345_v6  ;;  %59 = vperm.xlu0 %340, %v55_v19   ;;  %v357_v23 = vld [vmem:[%s461_s1 + $0x38] sm:$0xff]   ;;  %v358_v24 = vld [vmem:[%s462_s0] ss:$12 sps:$4 sm:$0xff]  }
   0x9   :  { %332 = vmatpush3.bf16.msra.mxu1 %v361_v16 }
   0xb   :  { %309 = vmatpush3.bf16.msra.mxu0 %v346_v7 }
   0xc   :  { %310 = vmatprep.subr.bf16.mxu0 %v347_v8  ;;  %334 = vmatmul.mubr.msk.bf16.vlgmr.msra.gmra.mrb[0].mxu1 %vm190_vm1, %v362_v18 }
   0xd   :  { %64 = vperm.xlu0 %340, %v56_v20  }
   0xf   :  { %311 = vmatpush3.bf16.msra.mxu0 %v348_v9 }
  0x10   :  { %312 = vmatprep.subr.bf16.mxu0 %v349_v10 }
  0x13   :  { %313 = vmatpush3.bf16.msra.mxu0 %v350_v12 }
  0x14   :  { %314 = vmatprep.subr.bf16.mxu0 %v351_v13 }
  0x17   :  { %315 = vmatpush3.bf16.msra.mxu0 %v352_v14 }
  0x18   :  { %316 = vmatprep.subr.bf16.mxu0 %v353_v17 }
  0x1b   :  { %317 = vmatpush3.bf16.msra.mxu0 %v354_v21 }
  0x1c   :  { %318 = vmatprep.subr.bf16.mxu0 %v356_v22 }
  0x1f   :  { %319 = vmatpush3.bf16.msra.mxu0 %v357_v23 }
  0x22   :  { %227 = vmatmul.mubr.bf16.vlgmr.msra.gmra.mrb[0].mxu0 %v358_v24 }
  0x87   :  { %v60_v29 = vpop.permute.xlu0 %59 }
  0x8c   :  { %v65_v37 = vpop.permute.xlu0 %64 }
  0xdf   :  { %v269_v25 = vpop.f32.mrb[0].mxu1 }
  0xe0   :  { %v335_v26 = vpop.f32.mrb[1].mxu1 }
  0xe1   :  { %v272_v27 = vpop.f32.mrb[2].mxu1 }
  0xe2   :  { %v336_v28 = vpop.f32.mrb[3].mxu1 }
  0xf5   :  { %v320_v30 = vpop.f32.mrb[0].mxu0 }
  0xf6   :  { %v321_v31 = vpop.f32.mrb[1].mxu0 }
  0xf7   :  { %v322_v32 = vadd.f32 %v321_v31, %v320_v30  ;;  %v323_v33 = vpop.f32.mrb[2].mxu0 }
  0xf8   :  { %v324_v34 = vpop.f32.mrb[3].mxu0 }
  0xf9   :  { %v229_v35 = vadd.f32 %v322_v32, %v60_v29  ;;  %v325_v36 = vadd.f32 %v324_v34, %v323_v33 }
  0xfb   :  { %v270_v38 = vadd.f32 %v269_v25, %v229_v35  ;;  %v232_v39 = vadd.f32 %v325_v36, %v65_v37 }
  0xfd   :  { %276 = vst [vmem:[%s464_s3] sm:$0xff] %v270_v38  ;;  %v273_v40 = vadd.f32 %v272_v27, %v232_v39 }
  0xff   :  { %277 = vst [vmem:[%s464_s3 + $0x8] sm:$0xff] %v273_v40 }

// kernel: kernel_extractor_forward.52
= control target key start
LH: loop header
LB: loop body
LE: loop exit
PB: predicated region body
PF: predicated region fallthrough
CT: control target
= control target key end

     0   :  { %v668_v1 = vmov 0   ;;  %s899_s1 = inlined_call_operand.vmem [shape: bf16[256,512], index: 1, kind: input, shape index: {}]   ;;  %s900_s0 = inlined_call_operand.vmem [shape: bf16[8,256], index: 0, kind: input, shape index: {}]   ;;  %s901_s2 = inlined_call_operand.vmem [shape: f32[8,1], index: 2, kind: input, shape index: {}]   ;;  %s902_s3 = inlined_call_operand.vmem [shape: f32[8,512], index: 3, kind: output, shape index: {}]  }
   0x1   :  { %v570_v0 = vld [vmem:[%s899_s1 + $0x4] ss:$16 sps:$4 sm:$0xff]   ;;  %569 = vset.pattern.permute.xlu0 %v668_v1  ;;  %v572_v2 = vld [vmem:[%s899_s1 + $0xc] ss:$16 sps:$4 sm:$0xff]   ;;  %v574_v3 = vld [vmem:[%s899_s1] ss:$16 sps:$4 sm:$0xff]  }
   0x2   :  { %412 = vmatprep.subr.bf16.mxu0 %v570_v0  ;;  %v575_v4 = vld [vmem:[%s899_s1 + $0x8] ss:$16 sps:$4 sm:$0xff]   ;;  %453 = vmatprep.subr.bf16.mxu1 %v572_v2  ;;  %v576_v5 = vld [vmem:[%s899_s1 + $0x24] ss:$16 sps:$4 sm:$0xff]   ;;  %v578_v6 = vld [vmem:[%s899_s1 + $0x2c] ss:$16 sps:$4 sm:$0xff]  }
   0x3   :  { %413 = vmatpush1.bf16.msra.mxu0 %v574_v3  ;;  %454 = vmatpush1.bf16.msra.mxu1 %v575_v4  ;;  %v580_v7 = vld [vmem:[%s899_s1 + $0x20] ss:$16 sps:$4 sm:$0xff]   ;;  %v581_v8 = vld [vmem:[%s899_s1 + $0x28] ss:$16 sps:$4 sm:$0xff]   ;;  %v582_v9 = vld [vmem:[%s899_s1 + $0x44] ss:$16 sps:$4 sm:$0xff]  }
   0x4   :  { %414 = vmatprep.subr.bf16.mxu0 %v576_v5  ;;  %455 = vmatprep.subr.bf16.mxu1 %v578_v6  ;;  %v584_v10 = vld [vmem:[%s899_s1 + $0x4c] ss:$16 sps:$4 sm:$0xff]   ;;  %v586_v11 = vld [vmem:[%s899_s1 + $0x40] ss:$16 sps:$4 sm:$0xff]   ;;  %v587_v12 = vld [vmem:[%s899_s1 + $0x48] ss:$16 sps:$4 sm:$0xff]  }
   0x5   :  { %v588_v13 = vld [vmem:[%s899_s1 + $0x64] ss:$16 sps:$4 sm:$0xff]   ;;  %v590_v14 = vld [vmem:[%s899_s1 + $0x6c] ss:$16 sps:$4 sm:$0xff]   ;;  %v592_v15 = vld [vmem:[%s899_s1 + $0x60] ss:$16 sps:$4 sm:$0xff]  }
   0x6   :  { %v593_v16 = vld [vmem:[%s899_s1 + $0x68] ss:$16 sps:$4 sm:$0xff]   ;;  %v594_v17 = vld [vmem:[%s899_s1 + $0x84] ss:$16 sps:$4 sm:$0xff]   ;;  %v596_v18 = vld [vmem:[%s899_s1 + $0x8c] ss:$16 sps:$4 sm:$0xff]  }
   0x7   :  { %415 = vmatpush1.bf16.msra.mxu0 %v580_v7  ;;  %456 = vmatpush1.bf16.msra.mxu1 %v581_v8  ;;  %v598_v19 = vld [vmem:[%s899_s1 + $0x80] ss:$16 sps:$4 sm:$0xff]   ;;  %v599_v20 = vld [vmem:[%s899_s1 + $0x88] ss:$16 sps:$4 sm:$0xff]   ;;  %v600_v21 = vld [vmem:[%s899_s1 + $0xa4] ss:$16 sps:$4 sm:$0xff]  }
   0x8   :  { %416 = vmatprep.subr.bf16.mxu0 %v582_v9  ;;  %457 = vmatprep.subr.bf16.mxu1 %v584_v10  ;;  %v602_v22 = vld [vmem:[%s899_s1 + $0xac] ss:$16 sps:$4 sm:$0xff]   ;;  %v604_v23 = vld [vmem:[%s899_s1 + $0xa0] ss:$16 sps:$4 sm:$0xff]   ;;  %v605_v24 = vld [vmem:[%s899_s1 + $0xa8] ss:$16 sps:$4 sm:$0xff]  }
   0x9   :  { %v606_v25 = vld [vmem:[%s899_s1 + $0xc4] ss:$16 sps:$4 sm:$0xff]   ;;  %v608_v26 = vld [vmem:[%s899_s1 + $0xcc] ss:$16 sps:$4 sm:$0xff]   ;;  %v610_v27 = vld [vmem:[%s899_s1 + $0xc0] ss:$16 sps:$4 sm:$0xff]  }
   0xa   :  { %v611_v28 = vld [vmem:[%s899_s1 + $0xc8] ss:$16 sps:$4 sm:$0xff]   ;;  %v612_v29 = vld [vmem:[%s899_s1 + $0xe4] ss:$16 sps:$4 sm:$0xff]   ;;  %v614_v30 = vld [vmem:[%s899_s1 + $0xec] ss:$16 sps:$4 sm:$0xff]  }
   0xb   :  { %417 = vmatpush1.bf16.msra.mxu0 %v586_v11  ;;  %458 = vmatpush1.bf16.msra.mxu1 %v587_v12  ;;  %v616_v31 = vld [vmem:[%s899_s1 + $0xe0] ss:$16 sps:$4 sm:$0xff]   ;;  %v617_v32 = vld [vmem:[%s899_s1 + $0xe8] ss:$16 sps:$4 sm:$0xff]   ;;  %v618_v33 = vld [vmem:[%s899_s1 + $0x104] ss:$16 sps:$4 sm:$0xff]  }
   0xc   :  { %418 = vmatprep.subr.bf16.mxu0 %v588_v13  ;;  %459 = vmatprep.subr.bf16.mxu1 %v590_v14  ;;  %v620_v34 = vld [vmem:[%s899_s1 + $0x10c] ss:$16 sps:$4 sm:$0xff]   ;;  %v622_v35 = vld [vmem:[%s899_s1 + $0x100] ss:$16 sps:$4 sm:$0xff]   ;;  %v623_v36 = vld [vmem:[%s899_s1 + $0x108] ss:$16 sps:$4 sm:$0xff]  }
   0xd   :  { %v624_v37 = vld [vmem:[%s899_s1 + $0x124] ss:$16 sps:$4 sm:$0xff]   ;;  %v626_v38 = vld [vmem:[%s899_s1 + $0x12c] ss:$16 sps:$4 sm:$0xff]   ;;  %v628_v39 = vld [vmem:[%s899_s1 + $0x120] ss:$16 sps:$4 sm:$0xff]  }
   0xe   :  { %v629_v40 = vld [vmem:[%s899_s1 + $0x128] ss:$16 sps:$4 sm:$0xff]   ;;  %v630_v41 = vld [vmem:[%s899_s1 + $0x144] ss:$16 sps:$4 sm:$0xff]   ;;  %v632_v42 = vld [vmem:[%s899_s1 + $0x14c] ss:$16 sps:$4 sm:$0xff]  }
   0xf   :  { %419 = vmatpush1.bf16.msra.mxu0 %v592_v15  ;;  %460 = vmatpush1.bf16.msra.mxu1 %v593_v16  ;;  %v634_v43 = vld [vmem:[%s899_s1 + $0x140] ss:$16 sps:$4 sm:$0xff]   ;;  %v635_v44 = vld [vmem:[%s899_s1 + $0x148] ss:$16 sps:$4 sm:$0xff]   ;;  %v636_v45 = vld [vmem:[%s899_s1 + $0x164] ss:$16 sps:$4 sm:$0xff]  }
  0x10   :  { %420 = vmatprep.subr.bf16.mxu0 %v594_v17  ;;  %461 = vmatprep.subr.bf16.mxu1 %v596_v18  ;;  %v638_v46 = vld [vmem:[%s899_s1 + $0x16c] ss:$16 sps:$4 sm:$0xff]   ;;  %v14_v47 = vld [vmem:[%s900_s0] sm:$0xff]  ;;  %v641_v50 = vld [vmem:[%s899_s1 + $0x168] ss:$16 sps:$4 sm:$0xff]  }
  0x11   :  { %v503_v48 = vcombine.high %v14_v47, %v14_v47  ;;  %v640_v49 = vld [vmem:[%s899_s1 + $0x160] ss:$16 sps:$4 sm:$0xff]   ;;  %v642_v52 = vld [vmem:[%s899_s1 + $0x184] ss:$16 sps:$4 sm:$0xff]   ;;  %v644_v53 = vld [vmem:[%s899_s1 + $0x18c] ss:$16 sps:$4 sm:$0xff]   ;;  %v502_v4 = vcombine.low %v14_v47, %v14_v47 }
  0x12   :  { %v79_v51 = vld [vmem:[%s901_s2] sm:$0xff]  ;;  %v647_v55 = vld [vmem:[%s899_s1 + $0x188] ss:$16 sps:$4 sm:$0xff]   ;;  %v650_v57 = vld [vmem:[%s899_s1 + $0x1ac] ss:$16 sps:$4 sm:$0xff]  }
  0x13   :  { %421 = vmatpush1.bf16.msra.mxu0 %v598_v19  ;;  %462 = vmatpush1.bf16.msra.mxu1 %v599_v20  ;;  %v646_v54 = vld [vmem:[%s899_s1 + $0x180] ss:$16 sps:$4 sm:$0xff]   ;;  %v648_v56 = vld [vmem:[%s899_s1 + $0x1a4] ss:$16 sps:$4 sm:$0xff]   ;;  %v653_v59 = vld [vmem:[%s899_s1 + $0x1a8] ss:$16 sps:$4 sm:$0xff]  }
  0x14   :  { %422 = vmatprep.subr.bf16.mxu0 %v600_v21  ;;  %463 = vmatprep.subr.bf16.mxu1 %v602_v22  ;;  %v652_v58 = vld [vmem:[%s899_s1 + $0x1a0] ss:$16 sps:$4 sm:$0xff]   ;;  %v654_v60 = vld [vmem:[%s899_s1 + $0x1c4] ss:$16 sps:$4 sm:$0xff]   ;;  %v656_v61 = vld [vmem:[%s899_s1 + $0x1cc] ss:$16 sps:$4 sm:$0xff]  }
  0x15   :  { %444 = vmatprep.mubr.bf16.mxu0 %v503_v48  ;;  %485 = vmatprep.mubr.bf16.mxu1 %v503_v48  ;;  %v658_v62 = vld [vmem:[%s899_s1 + $0x1c0] ss:$16 sps:$4 sm:$0xff]   ;;  %v659_v63 = vld [vmem:[%s899_s1 + $0x1c8] ss:$16 sps:$4 sm:$0xff]   ;;  %v660_v0 = vld [vmem:[%s899_s1 + $0x1e4] ss:$16 sps:$4 sm:$0xff]  }
  0x16   :  { %82 = vperm.xlu0 %569, %v79_v51   ;;  %v662_v1 = vld [vmem:[%s899_s1 + $0x1ec] ss:$16 sps:$4 sm:$0xff]   ;;  %v664_v2 = vld [vmem:[%s899_s1 + $0x1e0] ss:$16 sps:$4 sm:$0xff]   ;;  %v665_v3 = vld [vmem:[%s899_s1 + $0x1e8] ss:$16 sps:$4 sm:$0xff]  }
  0x17   :  { %423 = vmatpush1.bf16.msra.mxu0 %v604_v23  ;;  %464 = vmatpush1.bf16.msra.mxu1 %v605_v24 }
  0x18   :  { %424 = vmatprep.subr.bf16.mxu0 %v606_v25  ;;  %465 = vmatprep.subr.bf16.mxu1 %v608_v26 }
  0x1b   :  { %425 = vmatpush1.bf16.msra.mxu0 %v610_v27  ;;  %466 = vmatpush1.bf16.msra.mxu1 %v611_v28 }
  0x1c   :  { %426 = vmatprep.subr.bf16.mxu0 %v612_v29  ;;  %467 = vmatprep.subr.bf16.mxu1 %v614_v30 }
  0x1f   :  { %427 = vmatpush1.bf16.msra.mxu0 %v616_v31  ;;  %468 = vmatpush1.bf16.msra.mxu1 %v617_v32 }
  0x20   :  { %428 = vmatprep.subr.bf16.mxu0 %v618_v33  ;;  %469 = vmatprep.subr.bf16.mxu1 %v620_v34 }
  0x23   :  { %429 = vmatpush1.bf16.msra.mxu0 %v622_v35  ;;  %470 = vmatpush1.bf16.msra.mxu1 %v623_v36 }
  0x24   :  { %430 = vmatprep.subr.bf16.mxu0 %v624_v37  ;;  %471 = vmatprep.subr.bf16.mxu1 %v626_v38 }
  0x27   :  { %431 = vmatpush1.bf16.msra.mxu0 %v628_v39  ;;  %472 = vmatpush1.bf16.msra.mxu1 %v629_v40 }
  0x28   :  { %432 = vmatprep.subr.bf16.mxu0 %v630_v41  ;;  %473 = vmatprep.subr.bf16.mxu1 %v632_v42 }
  0x2b   :  { %433 = vmatpush1.bf16.msra.mxu0 %v634_v43  ;;  %474 = vmatpush1.bf16.msra.mxu1 %v635_v44 }
  0x2c   :  { %434 = vmatprep.subr.bf16.mxu0 %v636_v45  ;;  %475 = vmatprep.subr.bf16.mxu1 %v638_v46 }
  0x2f   :  { %435 = vmatpush1.bf16.msra.mxu0 %v640_v49  ;;  %476 = vmatpush1.bf16.msra.mxu1 %v641_v50 }
  0x30   :  { %436 = vmatprep.subr.bf16.mxu0 %v642_v52  ;;  %477 = vmatprep.subr.bf16.mxu1 %v644_v53 }
  0x33   :  { %437 = vmatpush1.bf16.msra.mxu0 %v646_v54  ;;  %478 = vmatpush1.bf16.msra.mxu1 %v647_v55 }
  0x34   :  { %438 = vmatprep.subr.bf16.mxu0 %v648_v56  ;;  %479 = vmatprep.subr.bf16.mxu1 %v650_v57 }
  0x37   :  { %439 = vmatpush1.bf16.msra.mxu0 %v652_v58  ;;  %480 = vmatpush1.bf16.msra.mxu1 %v653_v59 }
  0x38   :  { %440 = vmatprep.subr.bf16.mxu0 %v654_v60  ;;  %481 = vmatprep.subr.bf16.mxu1 %v656_v61 }
  0x3b   :  { %441 = vmatpush1.bf16.msra.mxu0 %v658_v62  ;;  %482 = vmatpush1.bf16.msra.mxu1 %v659_v63 }
  0x3c   :  { %442 = vmatprep.subr.bf16.mxu0 %v660_v0  ;;  %483 = vmatprep.subr.bf16.mxu1 %v662_v1 }
  0x3f   :  { %443 = vmatpush1.bf16.msra.mxu0 %v664_v2  ;;  %484 = vmatpush1.bf16.msra.mxu1 %v665_v3 }
  0x42   :  { %445 = vmatmul.mubr.bf16.vlgmr.msra.gmra.mrb[0].mxu0 %v502_v4  ;;  %486 = vmatmul.mubr.bf16.vlgmr.msra.gmra.mrb[0].mxu1 %v502_v4 }
  0x95   :  { %v83_v5 = vpop.permute.xlu0 %82 }
 0x115   :  { %v446_v6 = vpop.f32.mrb[0].mxu0  ;;  %v487_v7 = vpop.f32.mrb[0].mxu1 }
 0x116   :  { %v447_v8 = vadd.f32 %v446_v6, %v83_v5  ;;  %v488_v9 = vadd.f32 %v487_v7, %v83_v5  ;;  %v448_v10 = vpop.f32.mrb[1].mxu0  ;;  %v489_v11 = vpop.f32.mrb[1].mxu1 }
 0x117   :  { %v449_v12 = vadd.f32 %v448_v10, %v83_v5  ;;  %v490_v13 = vadd.f32 %v489_v11, %v83_v5  ;;  %v450_v14 = vpop.f32.mrb[2].mxu0  ;;  %v491_v15 = vpop.f32.mrb[2].mxu1 }
 0x118   :  { %494 = vst [vmem:[%s902_s3] sm:$0xff] %v447_v8  ;;  %496 = vst [vmem:[%s902_s3 + $0x10] sm:$0xff] %v488_v9  ;;  %v451_v16 = vpop.f32.mrb[3].mxu0  ;;  %v492_v17 = vpop.f32.mrb[3].mxu1 }
 0x119   :  { %495 = vst [vmem:[%s902_s3 + $0x8] sm:$0xff] %v449_v12  ;;  %497 = vst [vmem:[%s902_s3 + $0x18] sm:$0xff] %v490_v13 }

// kernel: kernel_extractor_forward.53
= control target key start
LH: loop header
LB: loop body
LE: loop exit
PB: predicated region body
PF: predicated region fallthrough
CT: control target
= control target key end

     0   :  { %v436_v1 = vmov 0   ;;  %vm244_vm0 = vcmask 130048   ;;  %s583_s1 = inlined_call_operand.vmem [shape: bf16[144,512], index: 1, kind: input, shape index: {}]   ;;  %s584_s0 = inlined_call_operand.vmem [shape: bf16[8,144], index: 0, kind: input, shape index: {}]   ;;  %s585_s2 = inlined_call_operand.vmem [shape: f32[8,1], index: 2, kind: input, shape index: {}]   ;;  %s586_s3 = inlined_call_operand.vmem [shape: f32[8,512], index: 3, kind: output, shape index: {}]  }
   0x1   :  { %v380_v0 = vld [vmem:[%s583_s1 + $0x4] ss:$16 sps:$4 sm:$0xff]   ;;  %379 = vset.pattern.permute.xlu0 %v436_v1  ;;  %v382_v2 = vld [vmem:[%s583_s1 + $0xc] ss:$16 sps:$4 sm:$0xff]   ;;  %v384_v3 = vld [vmem:[%s583_s1] ss:$16 sps:$4 sm:$0xff]  }
   0x2   :  { %248 = vmatprep.subr.bf16.mxu0 %v380_v0  ;;  %v385_v4 = vld [vmem:[%s583_s1 + $0x8] ss:$16 sps:$4 sm:$0xff]   ;;  %289 = vmatprep.subr.bf16.mxu1 %v382_v2  ;;  %v386_v5 = vld [vmem:[%s583_s1 + $0x24] ss:$16 sps:$4 sm:$0xff]   ;;  %v388_v6 = vld [vmem:[%s583_s1 + $0x2c] ss:$16 sps:$4 sm:$0xff]  }
   0x3   :  { %249 = vmatpush1.bf16.msra.mxu0 %v384_v3  ;;  %290 = vmatpush1.bf16.msra.mxu1 %v385_v4  ;;  %v390_v7 = vld [vmem:[%s583_s1 + $0x20] ss:$16 sps:$4 sm:$0xff]   ;;  %v391_v8 = vld [vmem:[%s583_s1 + $0x28] ss:$16 sps:$4 sm:$0xff]   ;;  %v392_v9 = vld [vmem:[%s583_s1 + $0x44] ss:$16 sps:$4 sm:$0xff]  }
   0x4   :  { %250 = vmatprep.subr.bf16.mxu0 %v386_v5  ;;  %291 = vmatprep.subr.bf16.mxu1 %v388_v6  ;;  %v394_v10 = vld [vmem:[%s583_s1 + $0x4c] ss:$16 sps:$4 sm:$0xff]   ;;  %v396_v11 = vld [vmem:[%s583_s1 + $0x40] ss:$16 sps:$4 sm:$0xff]   ;;  %v397_v12 = vld [vmem:[%s583_s1 + $0x48] ss:$16 sps:$4 sm:$0xff]  }
   0x5   :  { %v398_v13 = vld [vmem:[%s583_s1 + $0x64] ss:$16 sps:$4 sm:$0xff]   ;;  %v400_v14 = vld [vmem:[%s583_s1 + $0x6c] ss:$16 sps:$4 sm:$0xff]   ;;  %v402_v15 = vld [vmem:[%s583_s1 + $0x60] ss:$16 sps:$4 sm:$0xff]  }
   0x6   :  { %v403_v16 = vld [vmem:[%s583_s1 + $0x68] ss:$16 sps:$4 sm:$0xff]   ;;  %v404_v17 = vld [vmem:[%s583_s1 + $0x84] ss:$16 sps:$4 sm:$0xff]   ;;  %v406_v18 = vld [vmem:[%s583_s1 + $0x8c] ss:$16 sps:$4 sm:$0xff]  }
   0x7   :  { %251 = vmatpush1.bf16.msra.mxu0 %v390_v7  ;;  %292 = vmatpush1.bf16.msra.mxu1 %v391_v8  ;;  %v408_v19 = vld [vmem:[%s583_s1 + $0x80] ss:$16 sps:$4 sm:$0xff]   ;;  %v409_v20 = vld [vmem:[%s583_s1 + $0x88] ss:$16 sps:$4 sm:$0xff]   ;;  %v410_v21 = vld [vmem:[%s583_s1 + $0xa4] ss:$16 sps:$4 sm:$0xff]  }
   0x8   :  { %252 = vmatprep.subr.bf16.mxu0 %v392_v9  ;;  %293 = vmatprep.subr.bf16.mxu1 %v394_v10  ;;  %v412_v22 = vld [vmem:[%s583_s1 + $0xac] ss:$16 sps:$4 sm:$0xff]   ;;  %v414_v23 = vld [vmem:[%s583_s1 + $0xa0] ss:$16 sps:$4 sm:$0xff]   ;;  %v415_v24 = vld [vmem:[%s583_s1 + $0xa8] ss:$16 sps:$4 sm:$0xff]  }
   0x9   :  { %v416_v25 = vld [vmem:[%s583_s1 + $0xc4] ss:$16 sps:$4 sm:$0xff]   ;;  %v418_v26 = vld [vmem:[%s583_s1 + $0xcc] ss:$16 sps:$4 sm:$0xff]   ;;  %v420_v27 = vld [vmem:[%s583_s1 + $0xc0] ss:$16 sps:$4 sm:$0xff]  }
   0xa   :  { %v421_v28 = vld [vmem:[%s583_s1 + $0xc8] ss:$16 sps:$4 sm:$0xff]   ;;  %v15_v29 = vld [vmem:[%s584_s0] sm:$0xff]  ;;  %v424_v32 = vld [vmem:[%s583_s1 + $0xec] ss:$16 sps:$4 sm:$0xff]  }
   0xb   :  { %253 = vmatpush1.bf16.msra.mxu0 %v396_v11  ;;  %294 = vmatpush1.bf16.msra.mxu1 %v397_v12  ;;  %v52_v30 = vld [vmem:[%s585_s2] sm:$0xff]  ;;  %v339_v33 = vcombine.high %v15_v29, %v15_v29  ;;  %v427_v35 = vld [vmem:[%s583_s1 + $0xe8] ss:$16 sps:$4 sm:$0xff]   ;;  %v430_v37 = vld [vmem:[%s583_s1 + $0x10c] ss:$16 sps:$4 sm:$0xff]   ;;  %v338_v40 = vcombine.low %v15_v29, %v15_v29 }
   0xc   :  { %254 = vmatprep.subr.bf16.mxu0 %v398_v13  ;;  %295 = vmatprep.subr.bf16.mxu1 %v400_v14  ;;  %v422_v31 = vld [vmem:[%s583_s1 + $0xe4] ss:$16 sps:$4 sm:$0xff]   ;;  %v426_v34 = vld [vmem:[%s583_s1 + $0xe0] ss:$16 sps:$4 sm:$0xff]   ;;  %v433_v39 = vld [vmem:[%s583_s1 + $0x108] ss:$16 sps:$4 sm:$0xff]  }
   0xd   :  { %55 = vperm.xlu0 %379, %v52_v30   ;;  %376 = vmatprep.mubr.msk.bf16.mxu0 %vm244_vm0, %v339_v33  ;;  %v428_v36 = vld [vmem:[%s583_s1 + $0x104] ss:$16 sps:$4 sm:$0xff]   ;;  %v432_v38 = vld [vmem:[%s583_s1 + $0x100] ss:$16 sps:$4 sm:$0xff]  }
   0xe   :  { %377 = vmatprep.mubr.msk.bf16.mxu1 %vm244_vm0, %v339_v33 }
   0xf   :  { %255 = vmatpush1.bf16.msra.mxu0 %v402_v15  ;;  %296 = vmatpush1.bf16.msra.mxu1 %v403_v16 }
  0x10   :  { %256 = vmatprep.subr.bf16.mxu0 %v404_v17  ;;  %297 = vmatprep.subr.bf16.mxu1 %v406_v18 }
  0x13   :  { %257 = vmatpush1.bf16.msra.mxu0 %v408_v19  ;;  %298 = vmatpush1.bf16.msra.mxu1 %v409_v20 }
  0x14   :  { %258 = vmatprep.subr.bf16.mxu0 %v410_v21  ;;  %299 = vmatprep.subr.bf16.mxu1 %v412_v22 }
  0x17   :  { %259 = vmatpush1.bf16.msra.mxu0 %v414_v23  ;;  %300 = vmatpush1.bf16.msra.mxu1 %v415_v24 }
  0x18   :  { %260 = vmatprep.subr.bf16.mxu0 %v416_v25  ;;  %301 = vmatprep.subr.bf16.mxu1 %v418_v26 }
  0x1b   :  { %261 = vmatpush1.bf16.msra.mxu0 %v420_v27  ;;  %302 = vmatpush1.bf16.msra.mxu1 %v421_v28 }
  0x1c   :  { %262 = vmatprep.subr.bf16.mxu0 %v422_v31  ;;  %303 = vmatprep.subr.bf16.mxu1 %v424_v32 }
  0x1f   :  { %263 = vmatpush1.bf16.msra.mxu0 %v426_v34  ;;  %304 = vmatpush1.bf16.msra.mxu1 %v427_v35 }
  0x20   :  { %264 = vmatprep.subr.bf16.mxu0 %v428_v36  ;;  %305 = vmatprep.subr.bf16.mxu1 %v430_v37 }
  0x23   :  { %265 = vmatpush1.bf16.msra.mxu0 %v432_v38  ;;  %306 = vmatpush1.bf16.msra.mxu1 %v433_v39 }
  0x26   :  { %281 = vmatmul.mubr.bf16.vlgmr.msra.gmra.mrb[0].mxu0 %v338_v40  ;;  %322 = vmatmul.mubr.bf16.vlgmr.msra.gmra.mrb[0].mxu1 %v338_v40 }
  0x8c   :  { %v56_v41 = vpop.permute.xlu0 %55 }
  0xf9   :  { %v282_v42 = vpop.f32.mrb[0].mxu0  ;;  %v323_v43 = vpop.f32.mrb[0].mxu1 }
  0xfa   :  { %v283_v44 = vadd.f32 %v282_v42, %v56_v41  ;;  %v324_v45 = vadd.f32 %v323_v43, %v56_v41  ;;  %v284_v46 = vpop.f32.mrb[1].mxu0  ;;  %v325_v47 = vpop.f32.mrb[1].mxu1 }
  0xfb   :  { %v285_v48 = vadd.f32 %v284_v46, %v56_v41  ;;  %v326_v49 = vadd.f32 %v325_v47, %v56_v41  ;;  %v286_v50 = vpop.f32.mrb[2].mxu0  ;;  %v327_v51 = vpop.f32.mrb[2].mxu1 }
  0xfc   :  { %330 = vst [vmem:[%s586_s3] sm:$0xff] %v283_v44  ;;  %332 = vst [vmem:[%s586_s3 + $0x10] sm:$0xff] %v324_v45  ;;  %v287_v52 = vpop.f32.mrb[3].mxu0  ;;  %v328_v53 = vpop.f32.mrb[3].mxu1 }
  0xfd   :  { %331 = vst [vmem:[%s586_s3 + $0x8] sm:$0xff] %v285_v48  ;;  %333 = vst [vmem:[%s586_s3 + $0x18] sm:$0xff] %v326_v49 }

// kernel: kernel_extractor_forward.59
= control target key start
LH: loop header
LB: loop body
LE: loop exit
PB: predicated region body
PF: predicated region fallthrough
CT: control target
= control target key end

     0   :  { %v321_v1 = vmov 0   ;;  %vm146_vm0 = vcmask 1043456   ;;  %vm142_vm1 = vcmask 588800   ;;  %s429_s1 = inlined_call_operand.vmem [shape: bf16[72,512], index: 1, kind: input, shape index: {}]   ;;  %s430_s2 = inlined_call_operand.vmem [shape: f32[9,1], index: 2, kind: input, shape index: {}]   ;;  %s431_s0 = inlined_call_operand.vmem [shape: bf16[9,72], index: 0, kind: input, shape index: {}]   ;;  %s432_s3 = inlined_call_operand.vmem [shape: f32[9,512], index: 3, kind: output, shape index: {}]  }
   0x1   :  { %v292_v0 = vld [vmem:[%s429_s1 + $0x4] ss:$16 sps:$4 sm:$0xff]   ;;  %191 = vmatprep.mubr.bf16.mxu0 %v321_v1  ;;  %234 = vmatprep.mubr.bf16.mxu1 %v321_v1  ;;  %v294_v2 = vld [vmem:[%s429_s1 + $0xc] ss:$16 sps:$4 sm:$0xff]   ;;  %v296_v3 = vld [vmem:[%s429_s1] ss:$16 sps:$4 sm:$0xff]  }
   0x2   :  { %291 = vset.pattern.permute.xlu0 %v321_v1  ;;  %159 = vmatprep.subr.bf16.mxu0 %v292_v0  ;;  %v297_v4 = vld [vmem:[%s429_s1 + $0x8] ss:$16 sps:$4 sm:$0xff]   ;;  %v298_v5 = vld [vmem:[%s429_s1 + $0x24] ss:$16 sps:$4 sm:$0xff]   ;;  %v300_v6 = vld [vmem:[%s429_s1 + $0x2c] ss:$16 sps:$4 sm:$0xff]  }
   0x3   :  { %202 = vmatprep.subr.bf16.mxu1 %v294_v2  ;;  %160 = vmatpush1.bf16.msra.mxu0 %v296_v3  ;;  %v302_v7 = vld [vmem:[%s429_s1 + $0x20] ss:$16 sps:$4 sm:$0xff]   ;;  %v303_v8 = vld [vmem:[%s429_s1 + $0x28] ss:$16 sps:$4 sm:$0xff]   ;;  %v304_v9 = vld [vmem:[%s429_s1 + $0x44] ss:$16 sps:$4 sm:$0xff]  }
   0x4   :  { %203 = vmatpush1.bf16.msra.mxu1 %v297_v4  ;;  %161 = vmatprep.subr.bf16.mxu0 %v298_v5  ;;  %v306_v10 = vld [vmem:[%s429_s1 + $0x4c] ss:$16 sps:$4 sm:$0xff]   ;;  %v308_v11 = vld [vmem:[%s429_s1 + $0x40] ss:$16 sps:$4 sm:$0xff]   ;;  %v309_v12 = vld [vmem:[%s429_s1 + $0x48] ss:$16 sps:$4 sm:$0xff]  }
   0x5   :  { %204 = vmatprep.subr.bf16.mxu1 %v300_v6  ;;  %v310_v13 = vld [vmem:[%s429_s1 + $0x64] ss:$16 sps:$4 sm:$0xff]   ;;  %v312_v14 = vld [vmem:[%s429_s1 + $0x6c] ss:$16 sps:$4 sm:$0xff]   ;;  %v314_v17 = vld [vmem:[%s429_s1 + $0x60] ss:$16 sps:$4 sm:$0xff]  }
   0x6   :  { %v33_v15 = vld [vmem:[%s429_s1 + $0x80] sm:$0xff]  ;;  %v34_v16 = vld [vmem:[%s429_s1 + $0x88] sm:$0xff] }
   0x7   :  { %162 = vmatpush1.bf16.msra.mxu0 %v302_v7  ;;  %v315_v18 = vld [vmem:[%s429_s1 + $0x68] ss:$16 sps:$4 sm:$0xff]   ;;  %v283_v19 = vcombine.high %v33_v15, %v33_v15  ;;  %v35_v20 = vld [vmem:[%s430_s2] sm:$0xff]  ;;  %v285_v21 = vcombine.high %v34_v16, %v34_v16  ;;  %v282_v22 = vcombine.low %v33_v15, %v33_v15  ;;  %v284_v23 = vcombine.low %v34_v16, %v34_v16 }
   0x8   :  { %205 = vmatpush1.bf16.msra.mxu1 %v303_v8  ;;  %163 = vmatprep.subr.bf16.mxu0 %v304_v9  ;;  %v36_v24 = vld [vmem:[%s430_s2 + $0x8] sm:$0x1]  ;;  %v320_v27 = vld [vmem:[%s431_s0] sm:$0x1f]  }
   0x9   :  { %206 = vmatprep.subr.bf16.mxu1 %v306_v10  ;;  %39 = vperm.xlu0 %291, %v35_v20   ;;  %v148_v25 = vsel %vm146_vm0, %v282_v22, 0  ;;  %v154_v26 = vsel %vm146_vm0, %v284_v23, 0 }
   0xb   :  { %164 = vmatpush1.bf16.msra.mxu0 %v308_v11 }
   0xc   :  { %207 = vmatpush1.bf16.msra.mxu1 %v309_v12  ;;  %165 = vmatprep.subr.bf16.mxu0 %v310_v13 }
   0xd   :  { %208 = vmatprep.subr.bf16.mxu1 %v312_v14  ;;  %44 = vperm.xlu0 %291, %v36_v24  }
   0xf   :  { %166 = vmatpush1.bf16.msra.mxu0 %v314_v17 }
  0x10   :  { %209 = vmatpush1.bf16.msra.mxu1 %v315_v18  ;;  %286 = vmatprep.subr.msk.bf16.mxu0 %vm146_vm0, %v283_v19 }
  0x11   :  { %288 = vmatprep.subr.msk.bf16.mxu1 %vm146_vm0, %v285_v21 }
  0x13   :  { %168 = vmatpush1.bf16.msra.mxu0 %v148_v25 }
  0x14   :  { %211 = vmatpush1.bf16.msra.mxu1 %v154_v26 }
  0x16   :  { %287 = vmatmul.mubr.msk.bf16.vlgmr.msra.gmra.mrb[0].mxu0 %vm142_vm1, %v320_v27 }
  0x17   :  { %289 = vmatmul.mubr.msk.bf16.vlgmr.msra.gmra.mrb[0].mxu1 %vm142_vm1, %v320_v27 }
  0x88   :  { %v40_v28 = vpop.permute.xlu0 %39 }
  0x8c   :  { %v45_v29 = vpop.permute.xlu0 %44 }
  0xe9   :  { %v193_v30 = vpop.f32.mrb[0].mxu0 }
  0xea   :  { %v236_v31 = vpop.f32.mrb[0].mxu1  ;;  %v194_v32 = vadd.f32 %v193_v30, %v40_v28  ;;  %v195_v34 = vpop.f32.mrb[1].mxu0 }
  0xeb   :  { %v237_v33 = vadd.f32 %v236_v31, %v40_v28  ;;  %v238_v35 = vpop.f32.mrb[1].mxu1  ;;  %v196_v36 = vadd.f32 %v195_v34, %v40_v28  ;;  %v197_v38 = vpop.f32.mrb[2].mxu0 }
  0xec   :  { %v239_v37 = vadd.f32 %v238_v35, %v40_v28  ;;  %v240_v39 = vpop.f32.mrb[2].mxu1  ;;  %v245_v40 = vmax.f32 %v194_v32, 0.0  ;;  %v198_v42 = vadd.f32 %v197_v38, %v45_v29  ;;  %v199_v44 = vpop.f32.mrb[3].mxu0 }
  0xed   :  { %v247_v41 = vmax.f32 %v237_v33, 0.0  ;;  %v241_v43 = vadd.f32 %v240_v39, %v45_v29  ;;  %v242_v45 = vpop.f32.mrb[3].mxu1  ;;  %v246_v46 = vmax.f32 %v196_v36, 0.0  ;;  %v200_v48 = vadd.f32 %v199_v44, %v45_v29 }
  0xee   :  { %v248_v47 = vmax.f32 %v239_v37, 0.0  ;;  %v243_v49 = vadd.f32 %v242_v45, %v45_v29  ;;  %253 = vst [vmem:[%s432_s3] sm:$0xff] %v245_v40  ;;  %v249_v50 = vmax.f32 %v198_v42, 0.0 }
  0xef   :  { %255 = vst [vmem:[%s432_s3 + $0x10] sm:$0xff] %v247_v41  ;;  %v251_v51 = vmax.f32 %v241_v43, 0.0  ;;  %254 = vst [vmem:[%s432_s3 + $0x8] sm:$0xff] %v246_v46  ;;  %v250_v52 = vmax.f32 %v200_v48, 0.0 }
  0xf0   :  { %256 = vst [vmem:[%s432_s3 + $0x18] sm:$0xff] %v248_v47  ;;  %v252_v53 = vmax.f32 %v243_v49, 0.0  ;;  %257 = vst [vmem:[%s432_s3 + $0x20] sm:$0x1] %v249_v50 }
  0xf1   :  { %259 = vst [vmem:[%s432_s3 + $0x30] sm:$0x1] %v251_v51  ;;  %258 = vst [vmem:[%s432_s3 + $0x28] sm:$0x1] %v250_v52 }
  0xf2   :  { %260 = vst [vmem:[%s432_s3 + $0x38] sm:$0x1] %v252_v53 }

// kernel: kernel_extractor_forward.60
= control target key start
LH: loop header
LB: loop body
LE: loop exit
PB: predicated region body
PF: predicated region fallthrough
CT: control target
= control target key end

     0   :  { %s258_s6 = smov 0   ;;  %s283_s0 = inlined_call_operand.vmem [shape: f32[2,9,256], index: 0, kind: input, shape index: {}]   ;;  %s284_s1 = inlined_call_operand.vmem [shape: f32[2,9,1], index: 1, kind: output, shape index: {}]  }
   0x1 LB: > { %s219_s7 = sadd.s32 4294967295, %s246_s6   ;;  %p223_p0 = scmp.ge.s32.totalorder %s246_s6, 1  ;;  %s246_s6 = sphi %s258_s6, %s11_s6  }
   0x2   : > { %p87_p1 = scmp.lt.s32.totalorder %s246_s6, 3 }
   0x4   : > { %p88_p2 = pnand %p223_p0, %p87_p1 }
   0x5   : > { %p107_p3 = scmp.lt.s32.totalorder (!%p88_p2), %s219_s7, 1  ;;  %vm121_vm0 = vcmask (!%p88_p2), 1040384   ;;  %vm160_vm1 = vcmask (!%p88_p2), 7168   ;;  %vm162_vm2 = vcmask (!%p88_p2), 0  }
   0x6   : > { %91 = sbr.rel (%p88_p2) target bundleno = 190 (0xbe), region = 24 }
   0xd   : > { %s286_s7 = smov (!%p107_p3, %s219_s7), 1 }
   0xe   : > { %s230_s8 = sshll.u32 %s286_s7, 5  ;;  %s231_s12 = sshll.u32 %s286_s7, 4 }
   0xf   : > { %s111_s11 = scalar_lea.vmem %s283_s0, %s230_s8  ;;  %s116_s15 = scalar_lea.vmem %s284_s1, %s231_s12 }
  0x10   : > { %v117_v0 = vld [vmem:[%s111_s11] sm:$0xff]  ;;  %v118_v1 = vld [vmem:[%s111_s11 + $0x8] sm:$0xff]  ;;  %v119_v2 = vld [vmem:[%s111_s11 + $0x10] sm:$0x1] }
  0x11   : > { %v120_v3 = vld [vmem:[%s111_s11 + $0x18] sm:$0x1]  ;;  %v122_v4 = vsel %vm121_vm0, %v119_v2, 0.0 }
  0x12   : > { %v123_v5 = vadd.f32 %v122_v4, %v117_v0  ;;  %v130_v6 = vsel %vm121_vm0, %v120_v3, 0.0 }
  0x13   : > { %v131_v7 = vadd.f32 %v130_v6, %v118_v1 }
  0x14   : > { %v124_v8 = vrot.slane %v123_v5, 4 }
  0x15   : > { %v132_v9 = vrot.slane %v131_v7, 4 }
  0x16   : > { %v125_v10 = vadd.f32 %v124_v8, %v123_v5 }
  0x17   : > { %v133_v11 = vadd.f32 %v132_v9, %v131_v7 }
  0x18   : > { %v126_v12 = vrot.slane %v125_v10, 2 }
  0x19   : > { %v134_v13 = vrot.slane %v133_v11, 2 }
  0x1a   : > { %v127_v14 = vadd.f32 %v126_v12, %v125_v10 }
  0x1b   : > { %v135_v15 = vadd.f32 %v134_v13, %v133_v11 }
  0x1c   : > { %v128_v16 = vrot.slane %v127_v14, 1 }
  0x1d   : > { %v136_v17 = vrot.slane %v135_v15, 1 }
  0x1e   : > { %v129_v18 = vadd.f32 %v128_v16, %v127_v14 }
  0x1f   : > { %v137_v19 = vadd.f32 %v136_v17, %v135_v15 }
  0x20   : > { %v139_v20 = vmul.f32 0.11111111, %v129_v18 }
  0x21   : > { %v140_v21 = vmul.f32 0.11111111, %v137_v19 }
  0x22   : > { %v141_v22 = vsub.f32 %v117_v0, %v139_v20  ;;  %v143_v23 = vsub.f32 %v119_v2, %v139_v20 }
  0x23   : > { %v142_v24 = vsub.f32 %v118_v1, %v140_v21  ;;  %v144_v25 = vsub.f32 %v120_v3, %v140_v21 }
  0x24   : > { %v145_v26 = vadd.f32 0.11111111, %v141_v22  ;;  %v147_v27 = vadd.f32 0.11111111, %v143_v23 }
  0x25   : > { %v146_v28 = vadd.f32 0.11111111, %v142_v24  ;;  %v148_v29 = vadd.f32 0.11111111, %v144_v25 }
  0x26   : > { %v152_v30 = vsel %vm121_vm0, %v147_v27, 0.0 }
  0x27   : > { %v149_v31 = vadd.f32 %v146_v28, %v145_v26  ;;  %v153_v32 = vsel %vm121_vm0, %v148_v29, 0.0 }
  0x28   : > { %v154_v33 = vadd.f32 %v153_v32, %v152_v30 }
  0x29   : > { %150 = vadd.xlane.f32.xlu0 %v149_v31 }
  0x2d   : > { %155 = vadd.xlane.f32.xlu0 %v154_v33 }
  0xb6   : > { %v151_v34 = vpop.xlane.xlu0 %150 }
  0xb7   : > { %v158_v35 = vmul.f32 0.00390625, %v151_v34 }
  0xb9   : > { %161 = vst.msk [vmem:[%s116_s15] sm:$0xff] %vm160_vm1, %v158_v35 }
  0xba   : > { %v156_v36 = vpop.xlane.xlu0 %155 }
  0xbb   : > { %v159_v37 = vmul.f32 0.00390625, %v156_v36 }
  0xbd   : > { %163 = vst.msk [vmem:[%s116_s15 + $0x8] sm:$0x1] %vm162_vm2, %v159_v37 }
  0xbe PF: > { %s11_s6 = sadd.s32 1, %s246_s6  }
  0xbf   : > { %p8_p4 = scmp.ge.s32.totalorder %s11_s6, 4  }
  0xc1   :  { %10 = sbr.rel (!%p8_p4) target bundleno = 1 (0x1), region = 54 }

// kernel: kernel_extractor_forward.61
= control target key start
LH: loop header
LB: loop body
LE: loop exit
PB: predicated region body
PF: predicated region fallthrough
CT: control target
= control target key end

     0   :  { %7 = vsyncpa [#allocation4], 0  ;;  %s1280_s0 = inlined_call_operand.vmem [shape: f32[2,9], index: 0, kind: input, shape index: {}]   ;;  %s1281_s1 = inlined_call_operand.vmem [shape: f32[2,3,18,18], index: 1, kind: input, shape index: {}]   ;;  %s1282_s2 = inlined_call_operand.hbm [shape: f32[2,3,16,16], index: 2, kind: output, shape index: {}]  }
   0x1   :  { %8 = vsyncpa [#allocation3], 0 }
   0x2   :  { %10 = vsyncpa [#allocation3 + $0x1], 0  ;;  %s863_s9 = smov 0   ;;  %s865_s10 = smov 0  }
   0x3   :  { %s867_s11 = smov 0   ;;  %s869_s12 = smov 0  }
   0x4 LB: > { %s884_s13 = sadd.s32 4294967295, %s840_s12   ;;  %s691_s14 = sadd.s32 4294967294, %s840_s12   ;;  %s840_s12 = sphi %s869_s12, %s1289_s12   ;;  %s836_s11 = sphi %s867_s11, %s1288_s11   ;;  %s832_s10 = sphi %s865_s10, %s1287_s10   ;;  %s828_s9 = sphi %s863_s9, %s1286_s9  }
   0x5   : > { %s888_s15 = sadd.s32 1, %s840_s12   ;;  %s70_s16 = sadd.s32 1, %s836_s11 }
   0x6   : > { %s67_s17 = ssub.s32 %s840_s12, %s888_s15  ;;  %p80_p0 = scmp.ne.s32.totalorder %s836_s11, %s832_s10 }
   0x7   : > { %p68_p1 = scmp.eq.s32.totalorder %s67_s17, 0  ;;  %p81_p2 = scmp.eq.s32.totalorder %s884_s13, 1 }
   0x8   : > { %p86_p3 = scmp.ne.s32.totalorder %s832_s10, %s828_s9  ;;  %p87_p4 = scmp.eq.s32.totalorder %s691_s14, 1 }
   0x9   : > { %s899_s18 = scalar_select %p68_p1, %s836_s11, %s70_s16  }
   0xa   : > { %p901_p5 = por %p81_p2, %p80_p0  ;;  %p905_p6 = por %p87_p4, %p86_p3 }
   0xb   : > { %p692_p7 = scmp.ge.s32.totalorder %s840_s12, 1  ;;  %p94_p8 = scmp.lt.s32.totalorder %s840_s12, 3 }
   0xc   : > { %p719_p9 = scmp.eq.s32.totalorder %s884_s13, 0  ;;  %s107_s24 = sshll.u32 %s1280_s0, 4  ;;  %s108_s24 = int_to_ptr.vmem [resolvable:$true] %s107_s24 }
   0xd   : > { %p912_p10 = pnand %p692_p7, %p94_p8  ;;  %s759_s25 = scalar_lea.vmem %s108_s24, 32 }
   0xe   : > { %p760_p13 = scmp.ne.s32.totalorder %s108_s24, %s759_s25  ;;  %p767_p3 = scmp.lt.s32.totalorder %s108_s24, %s108_s24 }
   0xf   : > { %p711_p11 = pneg %p912_p10  ;;  %p768_p4 = scmp.lt.s32.totalorder %s759_s25, %s759_s25 }
  0x11   : > { %p712_p12 = pnand %p719_p9, %p711_p11  ;;  %p769_p7 = por %p768_p4, %p767_p3 }
  0x13   : > { %p761_p0 = pneg %p712_p12 }
  0x15   : > { %p762_p1 = pnand %p761_p0, %p760_p13 }
  0x17   : > { %p763_p2 = pneg %p762_p1 }
  0x19   : > { %p770_p8 = pnand %p769_p7, %p763_p2 }
  0x1b   : > { %773 = shalt.err (!%p770_p8)
}
  0x1c   : > { %s842_s26 = smov [#allocation2]   ;;  %128 = sbr.rel (%p912_p10) target bundleno = 250 (0xfa), region = 28 }
  0x1d   : > { %714 = dma.vmem_to_smem (!%p712_p12), %s108_s24, 32, %s842_s26, [#allocation4]  }
  0x23   : > { %819 = dma.done.wait (%p719_p9), [#allocation4], 32  }
  0x24   : > { %821 = vsyncadd (%p719_p9), [#allocation4], 4294967264 }
  0x25   : > { %134 = sfence }
  0x26   : > { %p151_p11 = scmp.lt.s32.totalorder %s884_s13, 1  ;;  %s931_s27 = sshll.u32 %s884_s13, 7  ;;  %vm279_vm0 = vcmask 1046528   ;;  %vm448_vm1 = vcmask 1045504   ;;  %vm596_vm2 = vcmask 130048  }
  0x27   : > { %s180_s28 = sadd.s32 1, %s931_s27  ;;  %s219_s7 = sadd.s32 2, %s931_s27 }
  0x28   : > { %s152_s29 = scalar_select %p151_p11, %s884_s13, 1 }
  0x29   : > { %s181_s30 = sld [smem:[#allocation2 + %s180_s28]]  ;;  %s307_s8 = sadd.s32 4, %s931_s27 }
  0x2a   : > { %s703_s3 = smul.u32 72, %s152_s29  ;;  %s220_s14 = sld [smem:[#allocation2 + %s219_s7]] }
  0x2b   : > { %s308_s16 = sld [smem:[#allocation2 + %s307_s8]]  ;;  %s843_s17 = smov 127  }
  0x2c   : > { %s938_s6 = scalar_lea.vmem %s1281_s1, %s703_s3  ;;  %s367_s21 = sadd.s32 5, %s931_s27 }
  0x2d   : > { %v942_v0 = vld [vmem:[%s938_s6 + $0x18] sm:$0xff]  ;;  %v945_v1 = vld [vmem:[%s938_s6] sm:$0xff]  ;;  %v952_v4 = vld [vmem:[%s938_s6 + $0x8] sm:$0xff]  ;;  %s368_s22 = sld [smem:[#allocation2 + %s367_s21]]  ;;  %s476_s23 = sadd.s32 7, %s931_s27 }
  0x2e   : > { %v949_v3 = vld [vmem:[%s938_s6 + $0x20] sm:$0xff]  ;;  %v961_v9 = vld [vmem:[%s938_s6 + $0x38] sm:$0xff]  ;;  %v964_v10 = vld [vmem:[%s938_s6 + $0x30] sm:$0xff]  ;;  %s844_s24 = smov 126   ;;  %s997_s25 = sld [smem:[#allocation2 + %s476_s23]] }
  0x2f   : > { %v182_v2 = vstv %s181_s30  ;;  %v976_v17 = vld [vmem:[%s938_s6 + $0x10] sm:$0x3]  ;;  %v980_v19 = vld [vmem:[%s938_s6 + $0x28] sm:$0x3]  ;;  %v984_v21 = vld [vmem:[%s938_s6 + $0x40] sm:$0x3] }
  0x30   : > { %v185_v5 = vmul.f32 %v182_v2, %v942_v0  ;;  %v183_v6 = vmul.f32 %v182_v2, %v945_v1  ;;  %v186_v7 = vmul.f32 %v182_v2, %v949_v3  ;;  %v184_v8 = vmul.f32 %v182_v2, %v952_v4  ;;  %s1000_s26 = sld [smem:[#allocation2 + %s931_s27]]  ;;  %s258_s28 = sadd.s32 3, %s931_s27 }
  0x31   : > { %v188_v11 = vmul.f32 %v182_v2, %v961_v9  ;;  %v187_v12 = vmul.f32 %v182_v2, %v964_v10  ;;  %v221_v13 = vstv %s220_s14  ;;  %v309_v14 = vstv %s308_s16  ;;  %s427_s29 = sadd.s32 6, %s931_s27  ;;  %s1021_s30 = sld [smem:[#allocation2 + %s258_s28]] }
  0x32   : > { %199 = vrot.lane.b32.xlu1 %v185_v5, %s843_s17  ;;  %195 = vrot.lane.b32.xlu0 %v183_v6, %s843_s17  ;;  %v223_v15 = vmul.f32 %v221_v13, %v952_v4  ;;  %v222_v16 = vmul.f32 %v221_v13, %v945_v1  ;;  %v311_v18 = vmul.f32 %v309_v14, %v952_v4  ;;  %s1023_s3 = sld [smem:[#allocation2 + %s427_s29]]  ;;  %s536_s4 = sadd.s32 8, %s931_s27 }
  0x33   : > { %v312_v20 = vmul.f32 %v309_v14, %v976_v17  ;;  %v225_v22 = vmul.f32 %v221_v13, %v949_v3  ;;  %v224_v23 = vmul.f32 %v221_v13, %v942_v0  ;;  %v310_v24 = vmul.f32 %v309_v14, %v945_v1  ;;  %s537_s27 = sld [smem:[#allocation2 + %s536_s4]]  ;;  %s148_s5 = sand.u32 1, %s832_s10  }
  0x34   : > { %v369_v25 = vstv %s368_s22  ;;  %v314_v26 = vmul.f32 %v309_v14, %v949_v3  ;;  %v315_v27 = vmul.f32 %v309_v14, %v980_v19  ;;  %v329_v28 = vrot.slane %v311_v18, 1  ;;  %s702_s6 = smul.u32 48, %s148_s5  ;;  %s845_s23 = smov [#allocation5]  }
  0x35   : > { %v313_v29 = vmul.f32 %v309_v14, %v942_v0  ;;  %v317_v30 = vmul.f32 %v309_v14, %v961_v9  ;;  %v318_v31 = vmul.f32 %v309_v14, %v984_v21  ;;  %v331_v32 = vrot.slane %v312_v20, 1  ;;  %s704_s8 = smul.u32 768, %s884_s13  ;;  %s1239_s13 = scalar_lea.sflag [#allocation3], %s148_s5 }
  0x36   : > { %201 = vrot.lane.b32.xlu1 %v186_v7, %s843_s17  ;;  %197 = vrot.lane.b32.xlu0 %v184_v8, %s843_s17  ;;  %v316_v33 = vmul.f32 %v309_v14, %v964_v10  ;;  %v371_v34 = vmul.f32 %v369_v25, %v952_v4  ;;  %v372_v35 = vmul.f32 %v369_v25, %v976_v17  ;;  %v328_v38 = vrot.slane %v310_v24, 1  ;;  %s150_s7 = scalar_lea.vmem [#allocation5], %s702_s6 }
  0x37   : > { %v227_v36 = vmul.f32 %v221_v13, %v961_v9  ;;  %v226_v37 = vmul.f32 %v221_v13, %v964_v10  ;;  %v370_v39 = vmul.f32 %v369_v25, %v945_v1  ;;  %v334_v40 = vrot.slane %v314_v26, 1  ;;  %s617_s14 = sshll.u32 %s150_s7, 4  ;;  %s1231_s21 = scalar_lea.hbm %s1282_s2, %s704_s8  ;;  %s1233_s14 = int_to_ptr.vmem [resolvable:$true] %s617_s14 }
  0x38   : > { %v374_v41 = vmul.f32 %v369_v25, %v949_v3  ;;  %v375_v42 = vmul.f32 %v369_v25, %v980_v19  ;;  %v373_v43 = vmul.f32 %v369_v25, %v942_v0  ;;  %v336_v44 = vrot.slane %v315_v27, 1  ;;  %s774_s22 = scalar_lea.vmem %s1233_s14, 768 }
  0x39   : > { %v333_v45 = vrot.slane %v313_v29, 1  ;;  %v339_v46 = vrot.slane %v317_v30, 1  ;;  %v341_v47 = vrot.slane %v318_v31, 1  ;;  %v332_v48 = vsel %vm279_vm0, %v329_v28, %v331_v32  ;;  %p775_p9 = scmp.ne.s32.totalorder %s1233_s14, %s774_s22 }
  0x3a   : > { %205 = vrot.lane.b32.xlu1 %v188_v11, %s843_s17  ;;  %203 = vrot.lane.b32.xlu0 %v187_v12, %s843_s17  ;;  %v338_v49 = vrot.slane %v316_v33, 1  ;;  %v389_v50 = vrot.slane %v371_v34, 1  ;;  %v391_v51 = vrot.slane %v372_v35, 1  ;;  %v388_v52 = vrot.slane %v370_v39, 1 }
  0x3b   : > { %v377_v53 = vmul.f32 %v369_v25, %v961_v9  ;;  %v378_v54 = vmul.f32 %v369_v25, %v984_v21  ;;  %v376_v55 = vmul.f32 %v369_v25, %v964_v10  ;;  %v330_v56 = vsel %vm279_vm0, %v328_v38, %v329_v28  ;;  %p776_p10 = pnand %p775_p9, %p901_p5 }
  0x3c   : > { %v394_v57 = vrot.slane %v374_v41, 1  ;;  %v396_v58 = vrot.slane %v375_v42, 1  ;;  %v393_v59 = vrot.slane %v373_v43, 1  ;;  %v337_v60 = vsel %vm279_vm0, %v334_v40, %v336_v44 }
  0x3d   : > { %v1028_v61 = vstv %s997_s25  ;;  %v167_v62 = vstv %s1000_s26  ;;  %v335_v63 = vsel %vm279_vm0, %v333_v45, %v334_v40  ;;  %v342_v2 = vsel %vm279_vm0, %v339_v46, %v341_v47  ;;  %p777_p12 = pneg %p776_p10 }
  0x3e   : > { %236 = vrot.lane.b32.xlu1 %v223_v15, %s844_s24  ;;  %234 = vrot.lane.b32.xlu0 %v222_v16, %s844_s24  ;;  %v340_v5 = vsel %vm279_vm0, %v338_v49, %v339_v46  ;;  %v392_v6 = vsel %vm279_vm0, %v389_v50, %v391_v51  ;;  %v390_v7 = vsel %vm279_vm0, %v388_v52, %v389_v50  ;;  %v399_v8 = vrot.slane %v377_v53, 1 }
  0x3f   : > { %v401_v11 = vrot.slane %v378_v54, 1  ;;  %v398_v12 = vrot.slane %v376_v55, 1  ;;  %v1039_v13 = vsel %vm279_vm0, %v394_v57, %v396_v58  ;;  %v1042_v14 = vsel %vm279_vm0, %v393_v59, %v394_v57 }
  0x40   : > { %v1046_v15 = vmul.f32 %v1028_v61, %v952_v4  ;;  %v1049_v16 = vmul.f32 %v167_v62, %v942_v0  ;;  %v1053_v18 = vmul.f32 %v1028_v61, %v976_v17  ;;  %v1057_v20 = vmul.f32 %v1028_v61, %v945_v1 }
  0x41   : > { %v1067_v24 = vmul.f32 %v1028_v61, %v949_v3  ;;  %v1070_v25 = vmul.f32 %v167_v62, %v952_v4  ;;  %v1073_v26 = vmul.f32 %v167_v62, %v961_v9  ;;  %v1076_v27 = vmul.f32 %v167_v62, %v964_v10 }
  0x42   : > { %240 = vrot.lane.b32.xlu1 %v225_v22, %s844_s24  ;;  %238 = vrot.lane.b32.xlu0 %v224_v23, %s844_s24  ;;  %v1060_v22 = vmul.f32 %v167_v62, %v945_v1  ;;  %v1063_v23 = vmul.f32 %v167_v62, %v949_v3  ;;  %v1081_v28 = vsel %vm279_vm0, %v399_v8, %v401_v11  ;;  %v260_v30 = vstv %s1021_s30 }
  0x43   : > { %v1084_v29 = vsel %vm279_vm0, %v398_v12, %v399_v8  ;;  %v429_v31 = vstv %s1023_s3  ;;  %v262_v32 = vmul.f32 %v260_v30, %v952_v4  ;;  %v263_v33 = vmul.f32 %v260_v30, %v976_v17 }
  0x44   : > { %v261_v34 = vmul.f32 %v260_v30, %v945_v1  ;;  %v265_v35 = vmul.f32 %v260_v30, %v949_v3  ;;  %v268_v38 = vmul.f32 %v260_v30, %v961_v9  ;;  %v269_v39 = vmul.f32 %v260_v30, %v984_v21 }
  0x45   : > { %v281_v40 = vrot.slane %v262_v32, 1  ;;  %v283_v41 = vrot.slane %v263_v33, 1  ;;  %v267_v50 = vmul.f32 %v260_v30, %v964_v10  ;;  %v431_v51 = vmul.f32 %v429_v31, %v952_v4 }
  0x46   : > { %244 = vrot.lane.b32.xlu1 %v227_v36, %s844_s24  ;;  %242 = vrot.lane.b32.xlu0 %v226_v37, %s844_s24  ;;  %v266_v36 = vmul.f32 %v260_v30, %v980_v19  ;;  %v264_v37 = vmul.f32 %v260_v30, %v942_v0  ;;  %v280_v42 = vrot.slane %v261_v34, 1  ;;  %v286_v43 = vrot.slane %v265_v35, 1 }
  0x47   : > { %v291_v46 = vrot.slane %v268_v38, 1  ;;  %v293_v47 = vrot.slane %v269_v39, 1  ;;  %v432_v55 = vmul.f32 %v429_v31, %v976_v17  ;;  %v450_v57 = vrot.slane %v431_v51, 2 }
  0x48   : > { %v288_v44 = vrot.slane %v266_v36, 1  ;;  %v285_v45 = vrot.slane %v264_v37, 1  ;;  %v1102_v49 = vsel %vm279_vm0, %v280_v42, %v281_v40  ;;  %v430_v58 = vmul.f32 %v429_v31, %v945_v1 }
  0x49   : > { %v1113_v54 = vsel %vm279_vm0, %v291_v46, %v293_v47  ;;  %v434_v59 = vmul.f32 %v429_v31, %v949_v3  ;;  %v435_v62 = vmul.f32 %v429_v31, %v980_v19  ;;  %v438_v12 = vmul.f32 %v429_v31, %v984_v21 }
  0x4a   : > { %345 = vrot.lane.b32.xlu1 %v332_v48, %s843_s17  ;;  %343 = vrot.lane.b32.xlu0 %v330_v56, %s843_s17  ;;  %v1099_v48 = vsel %vm279_vm0, %v281_v40, %v283_v41  ;;  %v1107_v52 = vsel %vm279_vm0, %v286_v43, %v288_v44  ;;  %v1110_v53 = vsel %vm279_vm0, %v285_v45, %v286_v43  ;;  %v290_v56 = vrot.slane %v267_v50, 1 }
  0x4b   : > { %v449_v8 = vrot.slane %v430_v58, 2  ;;  %v455_v11 = vrot.slane %v434_v59, 2  ;;  %v484_v33 = vmul.f32 %v1028_v61, %v980_v19  ;;  %v462_v35 = vrot.slane %v438_v12, 2 }
  0x4c   : > { %v436_v36 = vmul.f32 %v429_v31, %v964_v10  ;;  %v498_v37 = vrot.slane %v1046_v15, 2  ;;  %v482_v38 = vmul.f32 %v1028_v61, %v942_v0  ;;  %v500_v41 = vrot.slane %v1053_v18, 2 }
  0x4d   : > { %v1134_v34 = vsel %vm448_vm1, %v449_v8, %v450_v57  ;;  %v487_v15 = vmul.f32 %v1028_v61, %v984_v21  ;;  %v503_v18 = vrot.slane %v1067_v24, 2  ;;  %v485_v44 = vmul.f32 %v1028_v61, %v964_v10 }
  0x4e   : > { %349 = vrot.lane.b32.xlu1 %v337_v60, %s843_s17  ;;  %347 = vrot.lane.b32.xlu0 %v335_v63, %s843_s17  ;;  %v452_v60 = vrot.slane %v432_v55, 2  ;;  %v433_v63 = vmul.f32 %v429_v31, %v942_v0  ;;  %v459_v42 = vrot.slane %v436_v36, 2  ;;  %v501_v45 = vsel %vm448_vm1, %v498_v37, %v500_v41 }
  0x4f   : > { %v502_v47 = vrot.slane %v482_v38, 2  ;;  %v538_v50 = vstv %s537_s27  ;;  %v510_v55 = vrot.slane %v487_v15, 2 }
  0x50   : > { %v1129_v30 = vsel %vm448_vm1, %v450_v57, %v452_v60  ;;  %v539_v57 = vmul.f32 %v538_v50, %v945_v1  ;;  %v543_v60 = vmul.f32 %v538_v50, %v949_v3  ;;  %v547_v12 = vmul.f32 %v538_v50, %v984_v21 }
  0x51   : > { %v504_v24 = vsel %vm448_vm1, %v502_v47, %v503_v18 }
  0x52   : > { %353 = vrot.lane.b32.xlu1 %v342_v2, %s843_s17  ;;  %351 = vrot.lane.b32.xlu0 %v340_v5, %s843_s17  ;;  %v437_v2 = vmul.f32 %v429_v31, %v961_v9  ;;  %v1125_v5 = vsel %vm279_vm0, %v290_v56, %v291_v46  ;;  %v497_v31 = vrot.slane %v1057_v20, 2  ;;  %v505_v20 = vrot.slane %v484_v33, 2 }
  0x53   : > { %v540_v56 = vmul.f32 %v538_v50, %v952_v4  ;;  %v557_v8 = vrot.slane %v539_v57, 2  ;;  %v542_v4 = vmul.f32 %v538_v50, %v942_v0  ;;  %v563_v1 = vrot.slane %v543_v60, 2 }
  0x54   : > { %v460_v32 = vrot.slane %v437_v2, 2  ;;  %v499_v46 = vsel %vm448_vm1, %v497_v31, %v498_v37 }
  0x56   : > { %405 = vrot.lane.b32.xlu1 %v392_v6, %s844_s24  ;;  %403 = vrot.lane.b32.xlu0 %v390_v7, %s844_s24  ;;  %v457_v6 = vrot.slane %v435_v62, 2  ;;  %v454_v7 = vrot.slane %v433_v63, 2  ;;  %v1160_v43 = vsel %vm448_vm1, %v459_v42, %v460_v32  ;;  %v544_v62 = vmul.f32 %v538_v50, %v980_v19 }
  0x57   : > { %v558_v63 = vrot.slane %v540_v56, 2  ;;  %v562_v19 = vrot.slane %v542_v4, 2 }
  0x58   : > { %v1145_v39 = vsel %vm448_vm1, %v455_v11, %v457_v6  ;;  %v1148_v40 = vsel %vm448_vm1, %v454_v7, %v455_v11  ;;  %v546_v11 = vmul.f32 %v538_v50, %v961_v9  ;;  %v545_v7 = vmul.f32 %v538_v50, %v964_v10 }
  0x59   : > { %v559_v3 = vsel %vm448_vm1, %v557_v8, %v558_v63 }
  0x5a   : > { %409 = vrot.lane.b32.xlu1 %v1039_v13, %s844_s24  ;;  %407 = vrot.lane.b32.xlu0 %v1042_v14, %s844_s24  ;;  %v1153_v13 = vsel %vm448_vm1, %v460_v32, %v462_v35  ;;  %v486_v14 = vmul.f32 %v1028_v61, %v961_v9  ;;  %v541_v61 = vmul.f32 %v538_v50, %v976_v17  ;;  %v565_v17 = vrot.slane %v544_v62, 2 }
  0x5b   : > { %v564_v32 = vsel %vm448_vm1, %v562_v19, %v563_v1  ;;  %v568_v33 = vrot.slane %v546_v11, 2  ;;  %v570_v35 = vrot.slane %v547_v12, 2  ;;  %v567_v9 = vrot.slane %v545_v7, 2 }
  0x5c   : > { %v508_v51 = vrot.slane %v486_v14, 2  ;;  %v560_v2 = vrot.slane %v541_v61, 2  ;;  %v566_v0 = vsel %vm448_vm1, %v563_v1, %v565_v17 }
  0x5d   : > { %v571_v21 = vsel %vm448_vm1, %v568_v33, %v570_v35  ;;  %v569_v36 = vsel %vm448_vm1, %v567_v9, %v568_v33 }
  0x5e   : > { %413 = vrot.lane.b32.xlu1 %v1081_v28, %s844_s24  ;;  %411 = vrot.lane.b32.xlu0 %v1084_v29, %s844_s24  ;;  %v506_v28 = vsel %vm448_vm1, %v503_v18, %v505_v20  ;;  %v507_v29 = vrot.slane %v485_v44, 2  ;;  %v511_v58 = vsel %vm448_vm1, %v508_v51, %v510_v55  ;;  %v561_v6 = vsel %vm448_vm1, %v558_v63, %v560_v2 }
  0x60   : > { %v509_v59 = vsel %vm448_vm1, %v507_v29, %v508_v51 }
  0x62   : > { %514 = vrot.lane.b32.xlu1 %v501_v45, %s843_s17  ;;  %512 = vrot.lane.b32.xlu0 %v499_v46, %s843_s17 }
  0x66   : > { %518 = vrot.lane.b32.xlu1 %v506_v28, %s843_s17  ;;  %516 = vrot.lane.b32.xlu0 %v504_v24, %s843_s17 }
  0x6a   : > { %522 = vrot.lane.b32.xlu1 %v511_v58, %s843_s17  ;;  %520 = vrot.lane.b32.xlu0 %v509_v59, %s843_s17 }
  0x6e   : > { %574 = vrot.lane.b32.xlu1 %v561_v6, %s844_s24  ;;  %572 = vrot.lane.b32.xlu0 %v559_v3, %s844_s24 }
  0x72   : > { %578 = vrot.lane.b32.xlu1 %v566_v0, %s844_s24  ;;  %576 = vrot.lane.b32.xlu0 %v564_v32, %s844_s24 }
  0x76   : > { %582 = vrot.lane.b32.xlu1 %v571_v21, %s844_s24  ;;  %580 = vrot.lane.b32.xlu0 %v569_v36, %s844_s24  ;;  %s778_s24 = sshll.u32 %s845_s23, 4  ;;  %s779_s24 = int_to_ptr.vmem [resolvable:$false] %s778_s24 }
  0x77   : > { %s780_s25 = scalar_lea.vmem %s779_s24, 1536  ;;  %p781_p13 = scmp.lt.s32.totalorder %s1233_s14, %s779_s24 }
  0x78   : > { %p782_p0 = scmp.lt.s32.totalorder %s780_s25, %s774_s22 }
  0x7a   : > { %p783_p1 = por %p782_p0, %p781_p13 }
  0x7c   : > { %p784_p2 = pnand %p783_p1, %p777_p12 }
  0xa4   : > { %v200_v10 = vpop.permute.xlu1 %199  ;;  %v196_v37 = vpop.permute.xlu0 %195 }
  0xa5   : > { %v213_v14 = vadd.f32 %v196_v37, %v1060_v22  ;;  %v215_v46 = vadd.f32 %v200_v10, %v1049_v16 }
  0xa8   : > { %v202_v38 = vpop.permute.xlu1 %201  ;;  %v198_v41 = vpop.permute.xlu0 %197 }
  0xa9   : > { %v214_v15 = vadd.f32 %v198_v41, %v1070_v25  ;;  %v216_v47 = vadd.f32 %v202_v38, %v1063_v23 }
  0xac   : > { %v206_v31 = vpop.permute.xlu1 %205  ;;  %v204_v42 = vpop.permute.xlu0 %203 }
  0xad   : > { %v218_v22 = vadd.f32 %v206_v31, %v1073_v26  ;;  %v217_v25 = vadd.f32 %v204_v42, %v1076_v27 }
  0xb0   : > { %v237_v18 = vpop.permute.xlu1 %236  ;;  %v235_v20 = vpop.permute.xlu0 %234 }
  0xb1   : > { %v253_v44 = vadd.f32 %v237_v18, %v214_v15  ;;  %v252_v45 = vadd.f32 %v235_v20, %v213_v14 }
  0xb3   : > { %v302_v50 = vadd.f32 %v1099_v48, %v253_v44  ;;  %v301_v51 = vadd.f32 %v1102_v49, %v252_v45 }
  0xb4   : > { %v241_v55 = vpop.permute.xlu1 %240  ;;  %v239_v28 = vpop.permute.xlu0 %238 }
  0xb5   : > { %v255_v29 = vadd.f32 %v241_v55, %v216_v47  ;;  %v254_v24 = vadd.f32 %v239_v28, %v215_v46 }
  0xb7   : > { %v304_v56 = vadd.f32 %v1107_v52, %v255_v29  ;;  %v303_v61 = vadd.f32 %v1110_v53, %v254_v24 }
  0xb8   : > { %v245_v57 = vpop.permute.xlu1 %244  ;;  %v243_v16 = vpop.permute.xlu0 %242 }
  0xb9   : > { %v257_v58 = vadd.f32 %v245_v57, %v218_v22  ;;  %v256_v23 = vadd.f32 %v243_v16, %v217_v25 }
  0xbb   : > { %v306_v48 = vadd.f32 %v1113_v54, %v257_v58  ;;  %v305_v49 = vadd.f32 %v1125_v5, %v256_v23 }
  0xbc   : > { %v346_v59 = vpop.permute.xlu1 %345  ;;  %v344_v60 = vpop.permute.xlu0 %343 }
  0xbd   : > { %v362_v8 = vadd.f32 %v346_v59, %v302_v50  ;;  %v361_v27 = vadd.f32 %v344_v60, %v301_v51 }
  0xc0   : > { %v350_v62 = vpop.permute.xlu1 %349  ;;  %v348_v63 = vpop.permute.xlu0 %347 }
  0xc1   : > { %v364_v17 = vadd.f32 %v350_v62, %v304_v56  ;;  %v363_v11 = vadd.f32 %v348_v63, %v303_v61 }
  0xc4   : > { %v354_v2 = vpop.permute.xlu1 %353  ;;  %v352_v26 = vpop.permute.xlu0 %351 }
  0xc5   : > { %v366_v7 = vadd.f32 %v354_v2, %v306_v48  ;;  %v365_v0 = vadd.f32 %v352_v26, %v305_v49 }
  0xc8   : > { %v406_v4 = vpop.permute.xlu1 %405  ;;  %v404_v52 = vpop.permute.xlu0 %403 }
  0xc9   : > { %v422_v1 = vadd.f32 %v406_v4, %v362_v8  ;;  %v421_v53 = vadd.f32 %v404_v52, %v361_v27 }
  0xcb   : > { %v471_v12 = vadd.f32 %v1129_v30, %v422_v1  ;;  %v470_v54 = vadd.f32 %v1134_v34, %v421_v53 }
  0xcc   : > { %v410_v6 = vpop.permute.xlu1 %409  ;;  %v408_v5 = vpop.permute.xlu0 %407 }
  0xcd   : > { %v424_v3 = vadd.f32 %v410_v6, %v364_v17  ;;  %v423_v19 = vadd.f32 %v408_v5, %v363_v11 }
  0xcf   : > { %v473_v32 = vadd.f32 %v1145_v39, %v424_v3  ;;  %v472_v33 = vadd.f32 %v1148_v40, %v423_v19 }
  0xd0   : > { %v414_v35 = vpop.permute.xlu1 %413  ;;  %v412_v9 = vpop.permute.xlu0 %411 }
  0xd1   : > { %v426_v21 = vadd.f32 %v414_v35, %v366_v7  ;;  %v425_v36 = vadd.f32 %v412_v9, %v365_v0 }
  0xd3   : > { %v475_v30 = vadd.f32 %v1153_v13, %v426_v21  ;;  %v474_v34 = vadd.f32 %v1160_v43, %v425_v36 }
  0xd4   : > { %v515_v10 = vpop.permute.xlu1 %514  ;;  %v513_v37 = vpop.permute.xlu0 %512 }
  0xd5   : > { %v531_v39 = vadd.f32 %v515_v10, %v471_v12  ;;  %v530_v40 = vadd.f32 %v513_v37, %v470_v54 }
  0xd8   : > { %v519_v38 = vpop.permute.xlu1 %518  ;;  %v517_v41 = vpop.permute.xlu0 %516 }
  0xd9   : > { %v533_v13 = vadd.f32 %v519_v38, %v473_v32  ;;  %v532_v44 = vadd.f32 %v517_v41, %v472_v33 }
  0xdc   : > { %v523_v31 = vpop.permute.xlu1 %522  ;;  %v521_v42 = vpop.permute.xlu0 %520 }
  0xdd   : > { %v535_v50 = vadd.f32 %v523_v31, %v475_v30  ;;  %v534_v51 = vadd.f32 %v521_v42, %v474_v34 }
  0xe0   : > { %v575_v14 = vpop.permute.xlu1 %574  ;;  %v573_v15 = vpop.permute.xlu0 %572 }
  0xe1   : > { %v591_v18 = vadd.f32 %v575_v14, %v531_v39  ;;  %v590_v20 = vadd.f32 %v573_v15, %v530_v40 }
  0xe3   : > { %598 = vst.msk [vmem:[%s150_s7 + $0x8] sm:$0xff] %vm596_vm2, %v591_v18  ;;  %597 = vst.msk [vmem:[%s150_s7] sm:$0xff] %vm596_vm2, %v590_v20 }
  0xe4   : > { %v579_v43 = vpop.permute.xlu1 %578  ;;  %v577_v45 = vpop.permute.xlu0 %576 }
  0xe5   : > { %v593_v46 = vadd.f32 %v579_v43, %v533_v13  ;;  %v592_v47 = vadd.f32 %v577_v45, %v532_v44 }
  0xe7   : > { %600 = vst.msk [vmem:[%s150_s7 + $0x18] sm:$0xff] %vm596_vm2, %v593_v46  ;;  %599 = vst.msk [vmem:[%s150_s7 + $0x10] sm:$0xff] %vm596_vm2, %v592_v47 }
  0xe8   : > { %v583_v55 = vpop.permute.xlu1 %582  ;;  %v581_v28 = vpop.permute.xlu0 %580 }
  0xe9   : > { %v595_v29 = vadd.f32 %v583_v55, %v535_v50  ;;  %v594_v24 = vadd.f32 %v581_v28, %v534_v51 }
  0xeb   : > { %602 = vst.msk [vmem:[%s150_s7 + $0x28] sm:$0xff] %vm596_vm2, %v595_v29  ;;  %601 = vst.msk [vmem:[%s150_s7 + $0x20] sm:$0xff] %vm596_vm2, %v594_v24 }
  0xec   : > { %787 = shalt.err (!%p784_p2)
}
  0xed   : > { %s788_s26 = scalar_lea.hbm %s1231_s21, 768  ;;  %s792_s30 = scalar_lea.hbm %s1282_s2, 1536 }
  0xee   : > { %p789_p3 = scmp.ne.s32.totalorder %s1231_s21, %s788_s26  ;;  %p793_p8 = scmp.lt.u32.totalorder %s1231_s21, %s1282_s2 }
  0xef   : > { %p794_p11 = scmp.lt.u32.totalorder %s792_s30, %s788_s26  ;;  %p796_p10 = scmp.lt.u32.totalorder %s788_s26, %s1231_s21 }
  0xf0   : > { %p790_p4 = pnand %p789_p3, %p901_p5 }
  0xf1   : > { %p795_p9 = por %p794_p11, %p793_p8 }
  0xf2   : > { %p791_p7 = pneg %p790_p4 }
  0xf3   : > { %p797_p12 = por %p796_p10, %p795_p9 }
  0xf5   : > { %p798_p13 = pnand %p797_p12, %p791_p7 }
  0xf7   : > { %801 = shalt.err (!%p798_p13)
}
  0xf8   : > { %s846_s27 = smov 128   ;;  %s847_s5 = smov 8  }
  0xf9   : > { %709 = dma.vmem_to_hbm [thread:$0]  (%p901_p5), %s1233_s14, 768, %s1231_s21, %s1239_s13, %s846_s27, %s846_s27, %s847_s5  }
  0xfa PF: > { %p721_p0 = scmp.ge.s32.totalorder %s840_s12, 2  ;;  %s632_s6 = sand.u32 1, %s828_s9  }
  0xfb   : > { %s633_s7 = scalar_lea.sflag [#allocation3], %s632_s6 }
  0xfc   : > { %p716_p1 = pnand %p721_p0, %p905_p6 }
  0xfe   : > { %823 = dma.done.wait (!%p716_p1), %s633_s7, 768  }
  0xff   : > { %825 = vsyncadd (!%p716_p1), %s633_s7, 4294966528  ;;  %p13_p2 = scmp.ge.s32.totalorder %s888_s15, 4   ;;  %s1286_s9 = smov %s832_s10 }
 0x100   : > { %s1287_s10 = smov %s836_s11  ;;  %s1288_s11 = smov %s899_s18 }
 0x101   : > { %s1289_s12 = smov %s888_s15  ;;  %15 = sbr.rel (!%p13_p2) target bundleno = 4 (0x4), region = 68 }
 0x108   :  { %638 = vsyncpa [#allocation3], 1 }
 0x109   :  { %640 = vsyncpa [#allocation3 + $0x1], 1 }
 0x10a   :  { %641 = vsyncpa [#allocation4], 1 }
 0x10b   :  { %643 = vsyncpa [#allocation4 + $0x1], 1 }

</bundles_post_ra>
